<compile_context>
chip_gen: v5e
topology: v5e:2x2
jax: 0.10.0
libtpu: 0.0.40
codegen_flags: <defaults>
</compile_context>

<pallas_src>
import functools

import jax
import jax.numpy as jnp
from jax.experimental import pallas as pl
from jax.experimental.pallas import tpu as pltpu


# ---------------------------------------------------------------------------
# Kernel
# ---------------------------------------------------------------------------
def fpn_block_kernel(x_ref, skip_ref, w_ref, b_ref, o_ref, *, precision):
    # x_ref    : [1, TH//2, Wx, Cp]
    # skip_ref : [1, TH,    Ws, Cs]
    # w_ref    : [Cs, Cp]
    # b_ref    : [1,  Cp]
    # o_ref    : [1, TH,    Ws, Cp]
    thh, wx, cp = x_ref.shape[1:]
    th, ws, cs = skip_ref.shape[1:]
    out_dtype = o_ref.dtype

    # 1x1 conv over channels == MXU matmul with f32 accumulation.
    # f32 operands use precision=HIGHEST (PyTorch-matching contraction);
    # bf16 operands feed the MXU natively.
    skip2d = skip_ref[0].reshape(th * ws, cs)
    conv = jnp.dot(skip2d, w_ref[...],
                   preferred_element_type=jnp.float32, precision=precision)
    conv = conv + b_ref[...].astype(jnp.float32)
    # Slim epilogue: drop to the output dtype immediately after the bias add.
    conv = conv.astype(out_dtype).reshape(th, ws, cp)

    # Nearest-neighbor 2x upsample of x: out[h, w] = x[h // 2, w // 2].
    # H duplication is a leading-dim broadcast+merge; W duplication is a
    # sublane interleave on the XLU (overlaps with DMA in this mem-bound op).
    x = x_ref[0]
    if x.dtype != out_dtype:
        x = x.astype(out_dtype)
    up = jnp.broadcast_to(x[:, None, :, None, :], (thh, 2, wx, 2, cp))
    up = up.reshape(th, ws, cp)

    # Single add + store in the output dtype.
    o_ref[0] = up + conv


# ---------------------------------------------------------------------------
# Helpers
# ---------------------------------------------------------------------------
def _round_up(v, m):
    return (v + m - 1) // m * m


def _maybe_pad_channels(c, lane=128):
    """Pad to a lane multiple when the traffic overhead is <= 2x.

    This pads every C >= 64 up to 128 (lane-dense stores, no vst.msk); tiny
    channel counts (e.g. demo C=8) stay unpadded -- padding 8 -> 128 would cost
    far more HBM traffic than the masked stores it removes.
    """
    cp = _round_up(c, lane)
    return cp if cp <= 2 * c else c


def _vmem_capacity_bytes():
    """Per-core VMEM capacity; conservative 64 MiB (v7x) if the query fails."""
    try:
        cap = int(pltpu.get_tpu_info().vmem_capacity_bytes)
        if cap > 0:
            return cap
    except Exception:
        pass
    return 64 << 20


# ---------------------------------------------------------------------------
# NHWC (transpose-free) entry point
# ---------------------------------------------------------------------------
def fpn_block_nhwc(x, skip, w, b, *, out_channels_padded=False):
    """FPNBlock in NHWC.

    x    : [N, Hx, Wx, Cp]     skip : [N, Hs, Ws, Cs]  (Hs=2*Hx, Ws=2*Wx)
    w    : [Cs, Cp]            b    : [Cp]
    Returns [N, Hs, Ws, Cp] in x.dtype ([N, Hs, Ws, Cp_padded] if
    out_channels_padded=True, letting a decoder keep the lane-padded layout
    and skip the post-call channel slice).
    """
    N, Hx, Wx, Cp = x.shape
    _, Hs, Ws, Cs = skip.shape
    assert Hs == 2 * Hx and Ws == 2 * Wx
    assert w.shape == (Cs, Cp) and b.shape == (Cp,)

    out_dtype = x.dtype

    # ---- lane-dense channels, sublane-friendly widths ---------------------
    Cp_p = _maybe_pad_channels(Cp)
    Cs_p = _maybe_pad_channels(Cs)
    Wx_p = _round_up(Wx, 4)           # -> Ws_p multiple of 8: reshapes stay
    Ws_p = 2 * Wx_p                   #    relayout-free inside the kernel

    if Cp_p != Cp or Wx_p != Wx:
        x = jnp.pad(x, ((0, 0), (0, 0), (0, Wx_p - Wx), (0, Cp_p - Cp)))
    if Cs_p != Cs or Wx_p != Wx:
        skip = jnp.pad(skip, ((0, 0), (0, 0), (0, Ws_p - Ws), (0, Cs_p - Cs)))
    if Cp_p != Cp or Cs_p != Cs:
        w = jnp.pad(w, ((0, Cs_p - Cs), (0, Cp_p - Cp)))
        b = jnp.pad(b, ((0, Cp_p - Cp),))

    in_b = jnp.dtype(x.dtype).itemsize
    out_b = jnp.dtype(out_dtype).itemsize

    # ---- generation-aware VMEM budget --------------------------------------
    vmem_cap = _vmem_capacity_bytes()
    # Cap safely below physical VMEM: ~48 MiB on v7x (64 MiB), ~96 MiB on
    # v5e/v6e (128 MiB), leaving headroom for Mosaic internal scratch.
    vmem_limit_cap = max(32 << 20, vmem_cap - max(16 << 20, vmem_cap // 4))
    work_budget = vmem_limit_cap - (4 << 20)

    # Full per-output-row footprint: double-buffered I/O tiles plus the
    # in-kernel temporaries (conv + up in the output dtype, and the transient
    # f32 matmul result before the cast).
    row_io = (Ws_p * Cs_p * in_b               # skip rows
              + (Wx_p * Cp_p * in_b) // 2      # half an x row per output row
              + Ws_p * Cp_p * out_b)           # output rows
    row_tmp = 2 * Ws_p * Cp_p * out_b + Ws_p * Cp_p * 4
    per_row_full = 2 * row_io + row_tmp

    wb_bytes = (Cs_p * Cp_p + Cp_p) * jnp.dtype(w.dtype).itemsize
    fixed = wb_bytes + (2 << 20)               # single-buffered weights + scratch

    # Largest even TH whose full footprint fits; last grid tile may be short
    # (pl.cdiv grid) so TH no longer has to divide Hs.
    TH = max(2, int(((work_budget - fixed) // max(per_row_full, 1)) // 2 * 2))
    TH = min(TH, Hs)
    if N == 1 and Hs >= 4:
        # Keep >= 2 row tiles so both v7x TensorCores get "parallel" work.
        TH = min(TH, max(2, (Hs // 2) // 2 * 2))
    THh = TH // 2
    R = pl.cdiv(Hs, TH)

    est = fixed + TH * per_row_full
    vmem_limit = int(min(vmem_limit_cap, max(32 << 20, est + (4 << 20))))

    # f32 operands -> HIGHEST precision to match the PyTorch f32 conv; bf16
    # operands take the native MXU path.  (v5e + large f32 Cs: prefer casting
    # skip/w to bf16 in the caller to stay memory-bound.)
    want_precision = (jax.lax.Precision.HIGHEST
                      if jnp.dtype(skip.dtype) == jnp.dtype(jnp.float32)
                      else None)

    b2 = b.reshape(1, Cp_p)

    def run(buffered_weights, precision):
        weight_kw = {}
        if buffered_weights:
            # Weights/bias have constant index maps and are fetched once;
            # a single buffer avoids wasting VMEM on their double-buffer.
            weight_kw = dict(pipeline_mode=pl.Buffered(buffer_count=1))
        kernel = functools.partial(fpn_block_kernel, precision=precision)
        call = pl.pallas_call(
            kernel,
            out_shape=jax.ShapeDtypeStruct((N, Hs, Ws_p, Cp_p), out_dtype),
            grid_spec=pltpu.PrefetchScalarGridSpec(
                num_scalar_prefetch=0,
                grid=(N, R),
                in_specs=[
                    pl.BlockSpec((1, THh, Wx_p, Cp_p), lambda n, r: (n, r, 0, 0)),
                    pl.BlockSpec((1, TH, Ws_p, Cs_p), lambda n, r: (n, r, 0, 0)),
                    pl.BlockSpec((Cs_p, Cp_p), lambda n, r: (0, 0), **weight_kw),
                    pl.BlockSpec((1, Cp_p), lambda n, r: (0, 0), **weight_kw),
                ],
                out_specs=pl.BlockSpec((1, TH, Ws_p, Cp_p),
                                       lambda n, r: (n, r, 0, 0)),
            ),
            compiler_params=pltpu.CompilerParams(
                dimension_semantics=("parallel", "parallel"),
                vmem_limit_bytes=vmem_limit),
        )
        return call(x, skip, w, b2)

    # Feature-detection fallbacks (older jax: pipeline_mode / Buffered(1) or
    # precision=HIGHEST in the Mosaic dot lowering may be unavailable).  All
    # configs compute the same result; only perf/numerics-of-contraction vary.
    configs = [(True, want_precision), (False, want_precision), (False, None)]
    out, last_err = None, None
    for buffered_weights, precision in configs:
        try:
            out = run(buffered_weights, precision)
            break
        except Exception as e:  # pragma: no cover - version-dependent paths
            last_err = e
    if out is None:
        raise last_err

    if Ws_p != Ws or (Cp_p != Cp and not out_channels_padded):
        cp_end = Cp_p if out_channels_padded else Cp
        out = out[:, :, :Ws, :cp_end]
    return out


# ---------------------------------------------------------------------------
# NCHW adapter (matches the PyTorch FPNBlock interface)
# ---------------------------------------------------------------------------
def fpn_block_forward(x_nchw, skip_nchw, weight, bias):
    """x: [N, Cp, Hx, Wx]; skip: [N, Cs, Hs, Ws]; weight: [Cp, Cs, 1, 1];
    bias: [Cp].  Returns [N, Cp, Hs, Ws].

    Note: the three transposes here exist only to match the PyTorch NCHW
    interface; each is a full HBM read+write comparable to the kernel's own
    traffic.  NHWC pipelines should call fpn_block_nhwc directly (and keep the
    whole decoder NHWC / channel-padded) to avoid them.
    """
    N, Cp, Hx, Wx = x_nchw.shape
    _, Cs, Hs, Ws = skip_nchw.shape
    assert Hs == 2 * Hx and Ws == 2 * Wx

    x = jnp.transpose(x_nchw, (0, 2, 3, 1))        # [N, Hx, Wx, Cp]
    skip = jnp.transpose(skip_nchw, (0, 2, 3, 1))  # [N, Hs, Ws, Cs]
    w = jnp.transpose(weight[:, :, 0, 0], (1, 0))  # [Cs, Cp]

    out_nhwc = fpn_block_nhwc(x, skip, w, bias)
    return jnp.transpose(out_nhwc, (0, 3, 1, 2))   # back to NCHW


# ---------------------------------------------------------------------------
# Reference + demo
# ---------------------------------------------------------------------------
def _reference(x_nchw, skip_nchw, weight, bias):
    up = jnp.repeat(jnp.repeat(x_nchw, 2, axis=2), 2, axis=3)
    conv = jnp.einsum("nchw,oc->nohw", skip_nchw, weight[:, :, 0, 0],
                      precision=jax.lax.Precision.HIGHEST)
    conv = conv + bias[None, :, None, None]
    return up + conv


if __name__ == "__main__":
    key = jax.random.PRNGKey(0)
    k1, k2, k3, k4 = jax.random.split(key, 4)

    N = 2
    pyramid_channels = 8
    skip_channels = 4
    Hx = Wx = 8            # x spatial; skip spatial is 16x16

    x = jax.random.normal(k1, (N, pyramid_channels, Hx, Wx), jnp.float32)
    skip = jax.random.normal(k2, (N, skip_channels, 2 * Hx, 2 * Wx), jnp.float32)

    # deterministic Conv2d(skip_channels, pyramid_channels, 1) params
    fan_in = skip_channels  # kernel_size=1
    bound = 1.0 / (fan_in ** 0.5)
    weight = jax.random.uniform(
        k3, (pyramid_channels, skip_channels, 1, 1), jnp.float32,
        minval=-bound, maxval=bound)
    bias = jax.random.uniform(
        k4, (pyramid_channels,), jnp.float32, minval=-bound, maxval=bound)

    # f32 path: matches the PyTorch (f32) reference.
    out = fpn_block_forward(x, skip, weight, bias)
    out = jax.block_until_ready(out)
    ref = _reference(x, skip, weight, bias)
    assert out.shape == (N, pyramid_channels, 2 * Hx, 2 * Wx)
    assert jnp.allclose(out, ref, atol=1e-5, rtol=1e-5)

    # bf16 path: bf16 MXU operands, f32 accumulation, bf16 epilogue/store.
    xb, sb, wb, bb = (x.astype(jnp.bfloat16), skip.astype(jnp.bfloat16),
                      weight.astype(jnp.bfloat16), bias.astype(jnp.bfloat16))
    out_b = fpn_block_forward(xb, sb, wb, bb)
    out_b = jax.block_until_ready(out_b)
    ref_b = _reference(xb.astype(jnp.float32), sb.astype(jnp.float32),
                       wb.astype(jnp.float32), bb.astype(jnp.float32))
    assert out_b.dtype == jnp.bfloat16
    assert jnp.allclose(out_b.astype(jnp.float32), ref_b, atol=5e-2, rtol=5e-2)

    print("KERNEL_OK")
</pallas_src>

<mosaic_0001>
module attributes {stable_mosaic.version = 11 : i64} {
  func.func @fpn_block_kernel(%arg0: i32, %arg1: i32, %arg2: memref<1x8x8x8xf32, #tpu.memory_space<vmem>>, %arg3: memref<1x16x16x4xf32, #tpu.memory_space<vmem>>, %arg4: memref<4x8xf32, #tpu.memory_space<vmem>>, %arg5: memref<1x8xf32, #tpu.memory_space<vmem>>, %arg6: memref<1x16x16x8xf32, #tpu.memory_space<vmem>>) attributes {dimension_semantics = [#tpu.dimension_semantics<parallel>, #tpu.dimension_semantics<parallel>], iteration_bounds = array<i64: 2, 1>, scalar_prefetch = 0 : i64, scratch_operands = 0 : i64, tpu.core_type = #tpu.core_type<tc>, window_params = [{transform_indices = @transform_0, window_bounds = array<i64: 1, 8, 8, 8>}, {transform_indices = @transform_1, window_bounds = array<i64: 1, 16, 16, 4>}, {pipeline_mode = #tpu.pipeline_mode<synchronous>, transform_indices = @transform_2, window_bounds = array<i64: 4, 8>}, {pipeline_mode = #tpu.pipeline_mode<synchronous>, transform_indices = @transform_3, window_bounds = array<i64: 1, 8>}, {transform_indices = @transform_4, window_bounds = array<i64: 1, 16, 16, 8>}]} {
    %c0 = arith.constant 0 : index
    %c0_0 = arith.constant 0 : index
    %c0_1 = arith.constant 0 : index
    %c0_2 = arith.constant 0 : index
    %0 = vector.load %arg3[%c0, %c0_0, %c0_1, %c0_2] : memref<1x16x16x4xf32, #tpu.memory_space<vmem>>, vector<1x16x16x4xf32>
    %1 = vector.shape_cast %0 : vector<1x16x16x4xf32> to vector<16x16x4xf32>
    %2 = vector.shape_cast %1 : vector<16x16x4xf32> to vector<256x4xf32>
    %c0_3 = arith.constant 0 : index
    %c0_4 = arith.constant 0 : index
    %3 = vector.load %arg4[%c0_3, %c0_4] : memref<4x8xf32, #tpu.memory_space<vmem>>, vector<4x8xf32>
    %cst = arith.constant dense<0.000000e+00> : vector<256x8xf32>
    %4 = tpu.matmul %2, %3, %cst {dimension_numbers = #tpu.dot_dimension_numbers<[1], [0], [0], [1], [0, 0, 1, 1], [], []>, precision = #tpu.contract_precision<fp32>} : vector<256x4xf32>, vector<4x8xf32>, vector<256x8xf32> -> vector<256x8xf32>
    %c0_5 = arith.constant 0 : index
    %c0_6 = arith.constant 0 : index
    %5 = vector.load %arg5[%c0_5, %c0_6] : memref<1x8xf32, #tpu.memory_space<vmem>>, vector<1x8xf32>
    %6 = vector.broadcast %5 : vector<1x8xf32> to vector<256x8xf32>
    %7 = arith.addf %4, %6 : vector<256x8xf32>
    %8 = vector.shape_cast %7 : vector<256x8xf32> to vector<16x16x8xf32>
    %c0_7 = arith.constant 0 : index
    %c0_8 = arith.constant 0 : index
    %c0_9 = arith.constant 0 : index
    %c0_10 = arith.constant 0 : index
    %9 = vector.load %arg2[%c0_7, %c0_8, %c0_9, %c0_10] : memref<1x8x8x8xf32, #tpu.memory_space<vmem>>, vector<1x8x8x8xf32>
    %10 = vector.shape_cast %9 : vector<1x8x8x8xf32> to vector<8x8x8xf32>
    %11 = vector.shape_cast %10 : vector<8x8x8xf32> to vector<8x1x8x1x8xf32>
    %12 = vector.shape_cast %11 : vector<8x1x8x1x8xf32> to vector<8x1x8x1x8xf32>
    %13 = vector.broadcast %12 : vector<8x1x8x1x8xf32> to vector<8x2x8x2x8xf32>
    %14 = vector.shape_cast %13 : vector<8x2x8x2x8xf32> to vector<16x16x8xf32>
    %15 = arith.addf %14, %8 : vector<16x16x8xf32>
    %c0_11 = arith.constant 0 : index
    %c0_12 = arith.constant 0 : index
    %c0_13 = arith.constant 0 : index
    %c0_14 = arith.constant 0 : index
    %16 = vector.load %arg6[%c0_11, %c0_12, %c0_13, %c0_14] : memref<1x16x16x8xf32, #tpu.memory_space<vmem>>, vector<1x16x16x8xf32>
    %17 = vector.shape_cast %16 : vector<1x16x16x8xf32> to vector<16x16x8xf32>
    %18 = vector.shape_cast %15 : vector<16x16x8xf32> to vector<1x16x16x8xf32>
    tpu.vector_store %arg6[%c0_11, %c0_12, %c0_13, %c0_14], %18 {strides = array<i32>} : memref<1x16x16x8xf32, #tpu.memory_space<vmem>>, vector<1x16x16x8xf32>,
    return
  }
  func.func @transform_0(%arg0: i32, %arg1: i32) -> (i32, i32, i32, i32) {
    %c0_i32 = arith.constant 0 : i32
    %c0_i32_0 = arith.constant 0 : i32
    %c0_i32_1 = arith.constant 0 : i32
    return %arg0, %arg1, %c0_i32, %c0_i32_0 : i32, i32, i32, i32
  }
  func.func @transform_1(%arg0: i32, %arg1: i32) -> (i32, i32, i32, i32) {
    %c0_i32 = arith.constant 0 : i32
    %c0_i32_0 = arith.constant 0 : i32
    %c0_i32_1 = arith.constant 0 : i32
    return %arg0, %arg1, %c0_i32, %c0_i32_0 : i32, i32, i32, i32
  }
  func.func @transform_2(%arg0: i32, %arg1: i32) -> (i32, i32) {
    %c0_i32 = arith.constant 0 : i32
    %c0_i32_0 = arith.constant 0 : i32
    %c0_i32_1 = arith.constant 0 : i32
    return %c0_i32, %c0_i32_0 : i32, i32
  }
  func.func @transform_3(%arg0: i32, %arg1: i32) -> (i32, i32) {
    %c0_i32 = arith.constant 0 : i32
    %c0_i32_0 = arith.constant 0 : i32
    %c0_i32_1 = arith.constant 0 : i32
    return %c0_i32, %c0_i32_0 : i32, i32
  }
  func.func @transform_4(%arg0: i32, %arg1: i32) -> (i32, i32, i32, i32) {
    %c0_i32 = arith.constant 0 : i32
    %c0_i32_0 = arith.constant 0 : i32
    %c0_i32_1 = arith.constant 0 : i32
    return %arg0, %arg1, %c0_i32, %c0_i32_0 : i32, i32, i32, i32
  }
}

module attributes {stable_mosaic.version = 11 : i64} {
  func.func @fpn_block_kernel(%arg0: i32, %arg1: i32, %arg2: memref<1x8x8x8xf32, #tpu.memory_space<vmem>>, %arg3: memref<1x16x16x4xf32, #tpu.memory_space<vmem>>, %arg4: memref<4x8xf32, #tpu.memory_space<vmem>>, %arg5: memref<1x8xf32, #tpu.memory_space<vmem>>, %arg6: memref<1x16x16x8xf32, #tpu.memory_space<vmem>>) attributes {dimension_semantics = [#tpu.dimension_semantics<parallel>, #tpu.dimension_semantics<parallel>], iteration_bounds = array<i64: 2, 1>, scalar_prefetch = 0 : i64, scratch_operands = 0 : i64, tpu.core_type = #tpu.core_type<tc>, window_params = [{transform_indices = @transform_0, window_bounds = array<i64: 1, 8, 8, 8>}, {transform_indices = @transform_1, window_bounds = array<i64: 1, 16, 16, 4>}, {pipeline_mode = #tpu.pipeline_mode<synchronous>, transform_indices = @transform_2, window_bounds = array<i64: 4, 8>}, {pipeline_mode = #tpu.pipeline_mode<synchronous>, transform_indices = @transform_3, window_bounds = array<i64: 1, 8>}, {transform_indices = @transform_4, window_bounds = array<i64: 1, 16, 16, 8>}]} {
    %c0 = arith.constant 0 : index
    %c0_0 = arith.constant 0 : index
    %c0_1 = arith.constant 0 : index
    %c0_2 = arith.constant 0 : index
    %0 = vector.load %arg3[%c0, %c0_0, %c0_1, %c0_2] : memref<1x16x16x4xf32, #tpu.memory_space<vmem>>, vector<1x16x16x4xf32>
    %1 = vector.shape_cast %0 : vector<1x16x16x4xf32> to vector<16x16x4xf32>
    %2 = vector.shape_cast %1 : vector<16x16x4xf32> to vector<256x4xf32>
    %c0_3 = arith.constant 0 : index
    %c0_4 = arith.constant 0 : index
    %3 = vector.load %arg4[%c0_3, %c0_4] : memref<4x8xf32, #tpu.memory_space<vmem>>, vector<4x8xf32>
    %cst = arith.constant dense<0.000000e+00> : vector<256x8xf32>
    %4 = tpu.matmul %2, %3, %cst {dimension_numbers = #tpu.dot_dimension_numbers<[1], [0], [0], [1], [0, 0, 1, 1], [], []>, precision = #tpu.contract_precision<fp32>} : vector<256x4xf32>, vector<4x8xf32>, vector<256x8xf32> -> vector<256x8xf32>
    %c0_5 = arith.constant 0 : index
    %c0_6 = arith.constant 0 : index
    %5 = vector.load %arg5[%c0_5, %c0_6] : memref<1x8xf32, #tpu.memory_space<vmem>>, vector<1x8xf32>
    %6 = vector.broadcast %5 : vector<1x8xf32> to vector<256x8xf32>
    %7 = arith.addf %4, %6 : vector<256x8xf32>
    %8 = vector.shape_cast %7 : vector<256x8xf32> to vector<16x16x8xf32>
    %c0_7 = arith.constant 0 : index
    %c0_8 = arith.constant 0 : index
    %c0_9 = arith.constant 0 : index
    %c0_10 = arith.constant 0 : index
    %9 = vector.load %arg2[%c0_7, %c0_8, %c0_9, %c0_10] : memref<1x8x8x8xf32, #tpu.memory_space<vmem>>, vector<1x8x8x8xf32>
    %10 = vector.shape_cast %9 : vector<1x8x8x8xf32> to vector<8x8x8xf32>
    %11 = vector.shape_cast %10 : vector<8x8x8xf32> to vector<8x1x8x1x8xf32>
    %12 = vector.shape_cast %11 : vector<8x1x8x1x8xf32> to vector<8x1x8x1x8xf32>
    %13 = vector.broadcast %12 : vector<8x1x8x1x8xf32> to vector<8x2x8x2x8xf32>
    %14 = vector.shape_cast %13 : vector<8x2x8x2x8xf32> to vector<16x16x8xf32>
    %15 = arith.addf %14, %8 : vector<16x16x8xf32>
    %c0_11 = arith.constant 0 : index
    %c0_12 = arith.constant 0 : index
    %c0_13 = arith.constant 0 : index
    %c0_14 = arith.constant 0 : index
    %16 = vector.load %arg6[%c0_11, %c0_12, %c0_13, %c0_14] : memref<1x16x16x8xf32, #tpu.memory_space<vmem>>, vector<1x16x16x8xf32>
    %17 = vector.shape_cast %16 : vector<1x16x16x8xf32> to vector<16x16x8xf32>
    %18 = vector.shape_cast %15 : vector<16x16x8xf32> to vector<1x16x16x8xf32>
    tpu.vector_store %arg6[%c0_11, %c0_12, %c0_13, %c0_14], %18 {strides = array<i32>} : memref<1x16x16x8xf32, #tpu.memory_space<vmem>>, vector<1x16x16x8xf32>,
    return
  }
  func.func @transform_0(%arg0: i32, %arg1: i32) -> (i32, i32, i32, i32) {
    %c0_i32 = arith.constant 0 : i32
    %c0_i32_0 = arith.constant 0 : i32
    %c0_i32_1 = arith.constant 0 : i32
    return %arg0, %arg1, %c0_i32, %c0_i32_0 : i32, i32, i32, i32
  }
  func.func @transform_1(%arg0: i32, %arg1: i32) -> (i32, i32, i32, i32) {
    %c0_i32 = arith.constant 0 : i32
    %c0_i32_0 = arith.constant 0 : i32
    %c0_i32_1 = arith.constant 0 : i32
    return %arg0, %arg1, %c0_i32, %c0_i32_0 : i32, i32, i32, i32
  }
  func.func @transform_2(%arg0: i32, %arg1: i32) -> (i32, i32) {
    %c0_i32 = arith.constant 0 : i32
    %c0_i32_0 = arith.constant 0 : i32
    %c0_i32_1 = arith.constant 0 : i32
    return %c0_i32, %c0_i32_0 : i32, i32
  }
  func.func @transform_3(%arg0: i32, %arg1: i32) -> (i32, i32) {
    %c0_i32 = arith.constant 0 : i32
    %c0_i32_0 = arith.constant 0 : i32
    %c0_i32_1 = arith.constant 0 : i32
    return %c0_i32, %c0_i32_0 : i32, i32
  }
  func.func @transform_4(%arg0: i32, %arg1: i32) -> (i32, i32, i32, i32) {
    %c0_i32 = arith.constant 0 : i32
    %c0_i32_0 = arith.constant 0 : i32
    %c0_i32_1 = arith.constant 0 : i32
    return %arg0, %arg1, %c0_i32, %c0_i32_0 : i32, i32, i32, i32
  }
}

module attributes {stable_mosaic.version = 11 : i64} {
  func.func @fpn_block_kernel(%arg0: i32, %arg1: i32, %arg2: memref<1x8x8x8xf32, #tpu.memory_space<vmem>>, %arg3: memref<1x16x16x4xf32, #tpu.memory_space<vmem>>, %arg4: memref<4x8xf32, #tpu.memory_space<vmem>>, %arg5: memref<1x8xf32, #tpu.memory_space<vmem>>, %arg6: memref<1x16x16x8xf32, #tpu.memory_space<vmem>>) attributes {dimension_semantics = [#tpu.dimension_semantics<parallel>, #tpu.dimension_semantics<parallel>], iteration_bounds = array<i64: 2, 1>, scalar_prefetch = 0 : i64, scratch_operands = 0 : i64, tpu.core_type = #tpu.core_type<tc>, window_params = [{transform_indices = @transform_0, window_bounds = array<i64: 1, 8, 8, 8>}, {transform_indices = @transform_1, window_bounds = array<i64: 1, 16, 16, 4>}, {pipeline_mode = #tpu.pipeline_mode<synchronous>, transform_indices = @transform_2, window_bounds = array<i64: 4, 8>}, {pipeline_mode = #tpu.pipeline_mode<synchronous>, transform_indices = @transform_3, window_bounds = array<i64: 1, 8>}, {transform_indices = @transform_4, window_bounds = array<i64: 1, 16, 16, 8>}]} {
    %c0 = arith.constant 0 : index
    %c0_0 = arith.constant 0 : index
    %c0_1 = arith.constant 0 : index
    %c0_2 = arith.constant 0 : index
    %0 = vector.load %arg3[%c0, %c0_0, %c0_1, %c0_2] : memref<1x16x16x4xf32, #tpu.memory_space<vmem>>, vector<1x16x16x4xf32>
    %1 = vector.shape_cast %0 : vector<1x16x16x4xf32> to vector<16x16x4xf32>
    %2 = vector.shape_cast %1 : vector<16x16x4xf32> to vector<256x4xf32>
    %c0_3 = arith.constant 0 : index
    %c0_4 = arith.constant 0 : index
    %3 = vector.load %arg4[%c0_3, %c0_4] : memref<4x8xf32, #tpu.memory_space<vmem>>, vector<4x8xf32>
    %cst = arith.constant dense<0.000000e+00> : vector<256x8xf32>
    %4 = tpu.matmul %2, %3, %cst {dimension_numbers = #tpu.dot_dimension_numbers<[1], [0], [0], [1], [0, 0, 1, 1], [], []>} : vector<256x4xf32>, vector<4x8xf32>, vector<256x8xf32> -> vector<256x8xf32>
    %c0_5 = arith.constant 0 : index
    %c0_6 = arith.constant 0 : index
    %5 = vector.load %arg5[%c0_5, %c0_6] : memref<1x8xf32, #tpu.memory_space<vmem>>, vector<1x8xf32>
    %6 = vector.broadcast %5 : vector<1x8xf32> to vector<256x8xf32>
    %7 = arith.addf %4, %6 : vector<256x8xf32>
    %8 = vector.shape_cast %7 : vector<256x8xf32> to vector<16x16x8xf32>
    %c0_7 = arith.constant 0 : index
    %c0_8 = arith.constant 0 : index
    %c0_9 = arith.constant 0 : index
    %c0_10 = arith.constant 0 : index
    %9 = vector.load %arg2[%c0_7, %c0_8, %c0_9, %c0_10] : memref<1x8x8x8xf32, #tpu.memory_space<vmem>>, vector<1x8x8x8xf32>
    %10 = vector.shape_cast %9 : vector<1x8x8x8xf32> to vector<8x8x8xf32>
    %11 = vector.shape_cast %10 : vector<8x8x8xf32> to vector<8x1x8x1x8xf32>
    %12 = vector.shape_cast %11 : vector<8x1x8x1x8xf32> to vector<8x1x8x1x8xf32>
    %13 = vector.broadcast %12 : vector<8x1x8x1x8xf32> to vector<8x2x8x2x8xf32>
    %14 = vector.shape_cast %13 : vector<8x2x8x2x8xf32> to vector<16x16x8xf32>
    %15 = arith.addf %14, %8 : vector<16x16x8xf32>
    %c0_11 = arith.constant 0 : index
    %c0_12 = arith.constant 0 : index
    %c0_13 = arith.constant 0 : index
    %c0_14 = arith.constant 0 : index
    %16 = vector.load %arg6[%c0_11, %c0_12, %c0_13, %c0_14] : memref<1x16x16x8xf32, #tpu.memory_space<vmem>>, vector<1x16x16x8xf32>
    %17 = vector.shape_cast %16 : vector<1x16x16x8xf32> to vector<16x16x8xf32>
    %18 = vector.shape_cast %15 : vector<16x16x8xf32> to vector<1x16x16x8xf32>
    tpu.vector_store %arg6[%c0_11, %c0_12, %c0_13, %c0_14], %18 {strides = array<i32>} : memref<1x16x16x8xf32, #tpu.memory_space<vmem>>, vector<1x16x16x8xf32>,
    return
  }
  func.func @transform_0(%arg0: i32, %arg1: i32) -> (i32, i32, i32, i32) {
    %c0_i32 = arith.constant 0 : i32
    %c0_i32_0 = arith.constant 0 : i32
    %c0_i32_1 = arith.constant 0 : i32
    return %arg0, %arg1, %c0_i32, %c0_i32_0 : i32, i32, i32, i32
  }
  func.func @transform_1(%arg0: i32, %arg1: i32) -> (i32, i32, i32, i32) {
    %c0_i32 = arith.constant 0 : i32
    %c0_i32_0 = arith.constant 0 : i32
    %c0_i32_1 = arith.constant 0 : i32
    return %arg0, %arg1, %c0_i32, %c0_i32_0 : i32, i32, i32, i32
  }
  func.func @transform_2(%arg0: i32, %arg1: i32) -> (i32, i32) {
    %c0_i32 = arith.constant 0 : i32
    %c0_i32_0 = arith.constant 0 : i32
    %c0_i32_1 = arith.constant 0 : i32
    return %c0_i32, %c0_i32_0 : i32, i32
  }
  func.func @transform_3(%arg0: i32, %arg1: i32) -> (i32, i32) {
    %c0_i32 = arith.constant 0 : i32
    %c0_i32_0 = arith.constant 0 : i32
    %c0_i32_1 = arith.constant 0 : i32
    return %c0_i32, %c0_i32_0 : i32, i32
  }
  func.func @transform_4(%arg0: i32, %arg1: i32) -> (i32, i32, i32, i32) {
    %c0_i32 = arith.constant 0 : i32
    %c0_i32_0 = arith.constant 0 : i32
    %c0_i32_1 = arith.constant 0 : i32
    return %arg0, %arg1, %c0_i32, %c0_i32_0 : i32, i32, i32, i32
  }
}

</mosaic_0001>

<bundles_post_ra>
// kernel: tpu_custom_call.1
= control target key start
LH: loop header
LB: loop body
LE: loop exit
PB: predicated region body
PF: predicated region fallthrough
CT: control target
= control target key end

     0   :  { %s2642_s15 = smov 0   ;;  %s2644_s16 = smov 0   ;;  %s3756_s0 = inlined_call_operand.vmem [shape: f32[2,8,8,8], index: 0, kind: input, shape index: {}]   ;;  %s3757_s1 = inlined_call_operand.vmem [shape: f32[2,16,16,4], index: 1, kind: input, shape index: {}]   ;;  %s3758_s2 = inlined_call_operand.vmem [shape: f32[4,8], index: 2, kind: input, shape index: {}]   ;;  %s3759_s3 = inlined_call_operand.vmem [shape: f32[1,8], index: 3, kind: input, shape index: {}]   ;;  %s3760_s4 = inlined_call_operand.vmem [shape: f32[2,16,16,8], index: 4, kind: output, shape index: {}]  }
   0x1   :  { %s2646_s17 = smov 0  }
   0x2 LB: > { %s26_s18 = sadd.s32 1, %s2611_s16  ;;  %p2553_p0 = scmp.ge.s32.totalorder %s2615_s17, 1  ;;  %s2615_s17 = sphi %s2646_s17, %s14_s17   ;;  %s2611_s16 = sphi %s2644_s16, %s3924_s16   ;;  %s2607_s15 = sphi %s2642_s15, %s3923_s15  }
   0x3   : > { %p28_p1 = scmp.ge.s32.totalorder %s26_s18, 2  ;;  %p201_p2 = scmp.lt.s32.totalorder %s2615_s17, 3 }
   0x5   : > { %s3926_s18 = smov (%p28_p1, %s26_s18), 0  ;;  %p202_p3 = pnand %p2553_p0, %p201_p2 }
   0x7   : > { %205 = sbr.rel (%p202_p3) target bundleno = 562 (0x232), region = 36 }
   0xc   : > { %v310_v0 = vld [vmem:[%s3758_s2] sm:$0xf]  ;;  %vm412_vm0 = vcmask 1043456   ;;  %p247_p4 = scmp.lt.s32.totalorder %s2607_s15, 1  ;;  %vm315_vm1 = vcmask 31744   ;;  %vm2402_vm2 = vcmask 64512  }
   0xd   : > { %v414_v1 = vsel %vm412_vm0, %v310_v0, 0 }
   0xe   : > { %v431_v2 = vand.u32 4294901760, %v414_v1  ;;  %s3928_s15 = smov (!%p247_p4, %s2607_s15), 1 }
   0xf   : > { %s2563_s21 = sshll.u32 %s3928_s15, 8  ;;  %s2562_s27 = sshll.u32 %s3928_s15, 6 }
  0x10   : > { %2565 = vmatpush.msra.mxu2 %v431_v2  ;;  %v706_v3 = vsub.f32 %v414_v1, %v431_v2  ;;  %432 = vmatpush.msra.mxu0 %v431_v2  ;;  %s2671_s24 = scalar_lea.vmem %s3757_s1, %s2563_s21  ;;  %s3264_s30 = scalar_lea.vmem %s3756_s0, %s2562_s27 }
  0x11   : > { %v294_v4 = vld [vmem:[%s2671_s24 + $0x80] sm:$0xff]  ;;  %v295_v6 = vld [vmem:[%s2671_s24 + $0x88] sm:$0xff]  ;;  %v296_v11 = vld [vmem:[%s2671_s24 + $0x90] sm:$0xff]  ;;  %s3336_s7 = scalar_lea.vmem %s3760_s4, %s2563_s21 }
  0x12   : > { %857 = vmatpush.msrb.mxu2 %v706_v3  ;;  %v707_v5 = vand.u32 4294901760, %v706_v3  ;;  %v278_v7 = vld [vmem:[%s2671_s24] sm:$0xff]  ;;  %v365_v8 = vsel %vm315_vm1, %v294_v4, 0  ;;  %v368_v9 = vsel %vm315_vm1, %v295_v6, 0  ;;  %v279_v12 = vld [vmem:[%s2671_s24 + $0x8] sm:$0xff]  ;;  %v280_v17 = vld [vmem:[%s2671_s24 + $0x10] sm:$0xff] }
  0x13   : > { %v317_v10 = vsel %vm315_vm1, %v278_v7, 0  ;;  %v2681_v13 = vand.u32 4294901760, %v365_v8  ;;  %v2683_v15 = vand.u32 4294901760, %v368_v9  ;;  %v371_v18 = vsel %vm315_vm1, %v296_v11, 0  ;;  %v297_v35 = vld [vmem:[%s2671_s24 + $0x98] sm:$0xff]  ;;  %v298_v51 = vld [vmem:[%s2671_s24 + $0xa0] sm:$0xff] }
  0x14   : > { %v708_v14 = vsub.f32 %v706_v3, %v707_v5  ;;  %v2685_v16 = vand.u32 4294901760, %v317_v10  ;;  %1247 = vmatpush.msrb.mxu0 %v707_v5  ;;  %v320_v19 = vsel %vm315_vm1, %v279_v12, 0  ;;  %v323_v25 = vsel %vm315_vm1, %v280_v17, 0  ;;  %v281_v38 = vld [vmem:[%s2671_s24 + $0x18] sm:$0xff]  ;;  %v282_v52 = vld [vmem:[%s2671_s24 + $0x20] sm:$0xff]  ;;  %v299_v1 = vld [vmem:[%s2671_s24 + $0xa8] sm:$0xff] }
  0x15   : > { %v2691_v20 = vsub.f32 %v365_v8, %v2681_v13  ;;  %v2694_v22 = vsub.f32 %v368_v9, %v2683_v15  ;;  %v2699_v24 = vand.u32 4294901760, %v320_v19  ;;  %v2706_v28 = vand.u32 4294901760, %v371_v18 }
  0x16   : > { %v709_v21 = vand.u32 4294901760, %v708_v14  ;;  %v2697_v23 = vsub.f32 %v317_v10, %v2685_v16  ;;  %v2718_v33 = vand.u32 4294901760, %v323_v25  ;;  %v374_v42 = vsel %vm315_vm1, %v297_v35, 0 }
  0x17   : > { %v3769_v26 = vand.u32 4294901760, %v2691_v20  ;;  %v2709_v29 = vsub.f32 %v320_v19, %v2699_v24  ;;  %v3768_v31 = vand.u32 4294901760, %v2694_v22  ;;  %v2724_v39 = vsub.f32 %v371_v18, %v2706_v28  ;;  %v300_v18 = vld [vmem:[%s2671_s24 + $0xb0] sm:$0xff] }
  0x18   : > { %2566 = vmatpush.msra.mxu3 %v709_v21  ;;  %v3782_v27 = vand.u32 4294901760, %v2697_v23  ;;  %710 = vmatpush.msra.mxu1 %v709_v21  ;;  %v2734_v43 = vsub.f32 %v323_v25, %v2718_v33  ;;  %v326_v44 = vsel %vm315_vm1, %v281_v38, 0  ;;  %v2740_v46 = vand.u32 4294901760, %v374_v42  ;;  %v284_v19 = vld [vmem:[%s2671_s24 + $0x30] sm:$0xff] }
  0x19   : > { %776 = vmatmul.f32.vlgmr.msra.gmra.mxu3 %v2681_v13  ;;  %712 = vmatmul.f32.vlgmr.msra.gmra.mxu1 %v2685_v16  ;;  %v564_v30 = vsub.f32 %v2691_v20, %v3769_v26  ;;  %v3781_v34 = vand.u32 4294901760, %v2709_v29  ;;  %v572_v40 = vsub.f32 %v2694_v22, %v3768_v31  ;;  %v3767_v45 = vand.u32 4294901760, %v2724_v39  ;;  %v289_v31 = vld [vmem:[%s2671_s24 + $0x58] sm:$0xff] }
  0x1a   : > { %1035 = vmatpush.msrb.mxu3 %v431_v2  ;;  %v436_v32 = vsub.f32 %v2697_v23, %v3782_v27  ;;  %1393 = vmatpush.msrb.mxu1 %v431_v2  ;;  %v3780_v49 = vand.u32 4294901760, %v2734_v43  ;;  %v2743_v50 = vand.u32 4294901760, %v326_v44  ;;  %v2748_v53 = vsub.f32 %v374_v42, %v2740_v46  ;;  %v283_v2 = vld [vmem:[%s2671_s24 + $0x28] sm:$0xff] }
  0x1b   : > { %v565_v36 = vand.u32 4294901760, %v564_v30  ;;  %v444_v41 = vsub.f32 %v2709_v29, %v3781_v34  ;;  %v573_v47 = vand.u32 4294901760, %v572_v40  ;;  %v580_v54 = vsub.f32 %v2724_v39, %v3767_v45 }
  0x1c   : > { %v437_v37 = vand.u32 4294901760, %v436_v32  ;;  %v452_v55 = vsub.f32 %v2734_v43, %v3780_v49  ;;  %v377_v56 = vsel %vm315_vm1, %v298_v51, 0  ;;  %v2758_v57 = vsub.f32 %v326_v44, %v2743_v50  ;;  %v291_v49 = vld [vmem:[%s2671_s24 + $0x68] sm:$0xff] }
  0x1d   : > { %566 = vmatmul.f32.vlgmr.msra.gmra.mxu2 %v565_v36  ;;  %v445_v48 = vand.u32 4294901760, %v444_v41  ;;  %v329_v58 = vsel %vm315_vm1, %v282_v52, 0  ;;  %v3765_v59 = vand.u32 4294901760, %v2748_v53  ;;  %v2764_v60 = vand.u32 4294901760, %v377_v56 }
  0x1e   : > { %438 = vmatmul.f32.vlgmr.msra.gmra.mxu0 %v437_v37  ;;  %v581_v61 = vand.u32 4294901760, %v580_v54  ;;  %v453_v62 = vand.u32 4294901760, %v452_v55  ;;  %v3777_v63 = vand.u32 4294901760, %v2758_v57  ;;  %v2767_v0 = vand.u32 4294901760, %v329_v58 }
  0x1f   : > { %v2772_v3 = vsub.f32 %v377_v56, %v2764_v60  ;;  %v588_v4 = vsub.f32 %v2748_v53, %v3765_v59  ;;  %v380_v6 = vsel %vm315_vm1, %v299_v1, 0  ;;  %v332_v8 = vsel %vm315_vm1, %v283_v2, 0 }
  0x20   : > { %v460_v5 = vsub.f32 %v2758_v57, %v3777_v63  ;;  %v2782_v7 = vsub.f32 %v329_v58, %v2767_v0  ;;  %v2788_v10 = vand.u32 4294901760, %v380_v6  ;;  %v2791_v17 = vand.u32 4294901760, %v332_v8 }
  0x21   : > { %780 = vmatmul.f32.gmra.mxu3 %v2683_v15  ;;  %716 = vmatmul.f32.gmra.mxu1 %v2699_v24  ;;  %v3764_v9 = vand.u32 4294901760, %v2772_v3  ;;  %v589_v11 = vand.u32 4294901760, %v588_v4  ;;  %v383_v35 = vsel %vm315_vm1, %v300_v18, 0  ;;  %v335_v36 = vsel %vm315_vm1, %v284_v19, 0 }
  0x22   : > { %v461_v12 = vand.u32 4294901760, %v460_v5  ;;  %v3776_v14 = vand.u32 4294901760, %v2782_v7  ;;  %v2799_v25 = vsub.f32 %v380_v6, %v2788_v10  ;;  %v2805_v32 = vsub.f32 %v332_v8, %v2791_v17  ;;  %v302_v6 = vld [vmem:[%s2671_s24 + $0xc0] sm:$0xff] }
  0x23   : > { %v596_v21 = vsub.f32 %v2772_v3, %v3764_v9  ;;  %v2812_v41 = vand.u32 4294901760, %v383_v35  ;;  %v2815_v44 = vand.u32 4294901760, %v335_v36  ;;  %v286_v8 = vld [vmem:[%s2671_s24 + $0x40] sm:$0xff]  ;;  %v389_v19 = vsel %vm315_vm1, %v302_v6, 0 }
  0x24   : > { %v468_v30 = vsub.f32 %v2782_v7, %v3776_v14  ;;  %v3763_v38 = vand.u32 4294901760, %v2799_v25  ;;  %v3775_v42 = vand.u32 4294901760, %v2805_v32  ;;  %v356_v27 = vsel %vm315_vm1, %v291_v49, 0 }
  0x25   : > { %574 = vmatmul.f32.gmra.mxu2 %v573_v47  ;;  %v597_v37 = vand.u32 4294901760, %v596_v21  ;;  %v301_v47 = vld [vmem:[%s2671_s24 + $0xb8] sm:$0xff]  ;;  %v2823_v52 = vsub.f32 %v383_v35, %v2812_v41  ;;  %v2830_v56 = vsub.f32 %v335_v36, %v2815_v44  ;;  %v2860_v36 = vand.u32 4294901760, %v389_v19 }
  0x26   : > { %446 = vmatmul.f32.gmra.mxu0 %v445_v48  ;;  %v469_v40 = vand.u32 4294901760, %v468_v30  ;;  %v285_v48 = vld [vmem:[%s2671_s24 + $0x38] sm:$0xff]  ;;  %v604_v51 = vsub.f32 %v2799_v25, %v3763_v38  ;;  %v476_v54 = vsub.f32 %v2805_v32, %v3775_v42  ;;  %v386_v55 = vsel %vm315_vm1, %v301_v47, 0 }
  0x27   : > { %v338_v58 = vsel %vm315_vm1, %v285_v48, 0  ;;  %v3762_v1 = vand.u32 4294901760, %v2823_v52  ;;  %v3774_v4 = vand.u32 4294901760, %v2830_v56  ;;  %v341_v30 = vsel %vm315_vm1, %v286_v8, 0  ;;  %3821 = vst [vmem:[#allocation2_spill] sm:$0xff] %v2860_v36 }
  0x28   : > { %v477_v2 = vand.u32 4294901760, %v476_v54  ;;  %v2839_v5 = vand.u32 4294901760, %v338_v58  ;;  %v2863_v48 = vand.u32 4294901760, %v341_v30  ;;  %v287_v54 = vld [vmem:[%s2671_s24 + $0x48] sm:$0xff] }
  0x29   : > { %784 = vmatmul.f32.gmra.mxu3 %v2706_v28  ;;  %720 = vmatmul.f32.gmra.mxu1 %v2718_v33  ;;  %v484_v18 = vsub.f32 %v2830_v56, %v3774_v4  ;;  %v344_v8 = vsel %vm315_vm1, %v287_v54, 0  ;;  %v290_v4 = vld [vmem:[%s2671_s24 + $0x60] sm:$0xff] }
  0x2a   : > { %v2854_v21 = vsub.f32 %v338_v58, %v2839_v5  ;;  %v2871_v58 = vsub.f32 %v389_v19, %v2860_v36  ;;  %v353_v14 = vsel %vm315_vm1, %v290_v4, 0 }
  0x2c   : > { %v3772_v47 = vand.u32 4294901760, %v2854_v21 }
  0x2d   : > { %582 = vmatmul.f32.gmra.mxu2 %v581_v61  ;;  %v605_v61 = vand.u32 4294901760, %v604_v51  ;;  %v303_v51 = vld [vmem:[%s2671_s24 + $0xc8] sm:$0xff] }
  0x2e   : > { %454 = vmatmul.f32.gmra.mxu0 %v453_v62  ;;  %v2835_v62 = vand.u32 4294901760, %v386_v55  ;;  %v392_v6 = vsel %vm315_vm1, %v303_v51, 0 }
  0x31   : > { %788 = vmatmul.f32.gmra.mxu3 %v2740_v46  ;;  %724 = vmatmul.f32.gmra.mxu1 %v2743_v50 }
  0x35   : > { %590 = vmatmul.f32.gmra.mxu2 %v589_v11  ;;  %v2844_v11 = vsub.f32 %v386_v55, %v2835_v62 }
  0x36   : > { %462 = vmatmul.f32.gmra.mxu0 %v461_v12  ;;  %v612_v12 = vsub.f32 %v2823_v52, %v3762_v1  ;;  %v288_v1 = vld [vmem:[%s2671_s24 + $0x50] sm:$0xff] }
  0x37   : > { %v3761_v35 = vand.u32 4294901760, %v2844_v11  ;;  %v347_v9 = vsel %vm315_vm1, %v288_v1, 0 }
  0x38   : > { %v2911_v45 = vand.u32 4294901760, %v347_v9 }
  0x39   : > { %792 = vmatmul.f32.gmra.mxu3 %v2764_v60  ;;  %728 = vmatmul.f32.gmra.mxu1 %v2767_v0  ;;  %v620_v55 = vsub.f32 %v2844_v11, %v3761_v35  ;;  %v2887_v35 = vand.u32 4294901760, %v344_v8 }
  0x3a   : > { %v2926_v26 = vsub.f32 %v347_v9, %v2911_v45 }
  0x3b   : > { %v2902_v38 = vsub.f32 %v344_v8, %v2887_v35 }
  0x3d   : > { %598 = vmatmul.f32.gmra.mxu2 %v597_v37  ;;  %v613_v37 = vand.u32 4294901760, %v612_v12  ;;  %v621_v12 = vand.u32 4294901760, %v620_v55 }
  0x3e   : > { %470 = vmatmul.f32.gmra.mxu0 %v469_v40  ;;  %v485_v40 = vand.u32 4294901760, %v484_v18  ;;  %v3766_v18 = vand.u32 4294901760, %v2871_v58 }
  0x40   : > { %v628_v51 = vsub.f32 %v2871_v58, %v3766_v18  ;;  %v3773_v18 = vand.u32 4294901760, %v2902_v38 }
  0x41   : > { %796 = vmatmul.f32.gmra.mxu3 %v2788_v10  ;;  %732 = vmatmul.f32.gmra.mxu1 %v2791_v17 }
  0x42   : > { %v629_v59 = vand.u32 4294901760, %v628_v51  ;;  %v508_v51 = vsub.f32 %v2902_v38, %v3773_v18 }
  0x45   : > { %606 = vmatmul.f32.gmra.mxu2 %v605_v61  ;;  %v492_v61 = vsub.f32 %v2854_v21, %v3772_v47  ;;  %v3779_v47 = vand.u32 4294901760, %v2926_v26 }
  0x46   : > { %478 = vmatmul.f32.gmra.mxu0 %v477_v2  ;;  %v2877_v2 = vsub.f32 %v341_v30, %v2863_v48  ;;  %v304_v30 = vld [vmem:[%s2671_s24 + $0xd0] sm:$0xff] }
  0x47   : > { %v493_v19 = vand.u32 4294901760, %v492_v61  ;;  %v395_v61 = vsel %vm315_vm1, %v304_v30, 0  ;;  %v305_v30 = vld [vmem:[%s2671_s24 + $0xd8] sm:$0xff] }
  0x49   : > { %800 = vmatmul.f32.gmra.mxu3 %v2812_v41  ;;  %736 = vmatmul.f32.gmra.mxu1 %v2815_v44 }
  0x4d   : > { %614 = vmatmul.f32.gmra.mxu2 %v613_v37  ;;  %v2884_v37 = vand.u32 4294901760, %v392_v6 }
  0x4e   : > { %486 = vmatmul.f32.gmra.mxu0 %v485_v40  ;;  %v3770_v40 = vand.u32 4294901760, %v2877_v2 }
  0x4f   : > { %3822 = vst [vmem:[#allocation3_spill] sm:$0xff] %v2884_v37  ;;  %v2895_v54 = vsub.f32 %v392_v6, %v2884_v37 }
  0x50   : > { %v500_v55 = vsub.f32 %v2877_v2, %v3770_v40 }
  0x51   : > { %804 = vmatmul.f32.gmra.mxu3 %v2835_v62  ;;  %740 = vmatmul.f32.gmra.mxu1 %v2839_v5  ;;  %3823 = vst [vmem:[#allocation4_spill] sm:$0xff] %v2895_v54  ;;  %v3771_v6 = vand.u32 4294901760, %v2895_v54 }
  0x53   : > { %v636_v1 = vsub.f32 %v2895_v54, %v3771_v6  ;;  %v509_v6 = vand.u32 4294901760, %v508_v51 }
  0x55   : > { %622 = vmatmul.f32.gmra.mxu2 %v621_v12  ;;  %v2907_v12 = vand.u32 4294901760, %v395_v61 }
  0x56   : > { %494 = vmatmul.f32.gmra.mxu0 %v493_v19  ;;  %v501_v19 = vand.u32 4294901760, %v500_v55  ;;  %v398_v55 = vsel %vm315_vm1, %v305_v30, 0  ;;  %v306_v30 = vld [vmem:[%s2671_s24 + $0xe0] sm:$0xff] }
  0x57   : > { %3824 = vst [vmem:[#allocation5_spill] sm:$0xff] %v2907_v12  ;;  %v2916_v8 = vsub.f32 %v395_v61, %v2907_v12  ;;  %v350_v61 = vsel %vm315_vm1, %v289_v31, 0  ;;  %v2932_v40 = vand.u32 4294901760, %v398_v55  ;;  %v401_v42 = vsel %vm315_vm1, %v306_v30, 0 }
  0x58   : > { %v2935_v18 = vand.u32 4294901760, %v350_v61 }
  0x59   : > { %808 = vmatmul.f32.gmra.mxu3 %v2860_v36  ;;  %744 = vmatmul.f32.gmra.mxu1 %v2863_v48  ;;  %3825 = vst [vmem:[#allocation6_spill] sm:$0xff] %v2916_v8  ;;  %v2943_v9 = vsub.f32 %v398_v55, %v2932_v40 }
  0x5a   : > { %3826 = vst [vmem:[#allocation7_spill] sm:$0xff] %v2932_v40  ;;  %v2949_v51 = vsub.f32 %v350_v61, %v2935_v18  ;;  %v307_v61 = vld [vmem:[%s2671_s24 + $0xe8] sm:$0xff] }
  0x5b   : > { %3827 = vst [vmem:[#allocation8_spill] sm:$0xff] %v2943_v9  ;;  %v3785_v55 = vand.u32 4294901760, %v2943_v9 }
  0x5d   : > { %630 = vmatmul.f32.gmra.mxu2 %v629_v59  ;;  %v3778_v59 = vand.u32 4294901760, %v2916_v8  ;;  %v652_v4 = vsub.f32 %v2943_v9, %v3785_v55  ;;  %v292_v9 = vld [vmem:[%s2671_s24 + $0x70] sm:$0xff] }
  0x5e   : > { %502 = vmatmul.f32.gmra.mxu0 %v501_v19  ;;  %v637_v19 = vand.u32 4294901760, %v636_v1  ;;  %v516_v1 = vsub.f32 %v2926_v26, %v3779_v47  ;;  %v2959_v47 = vand.u32 4294901760, %v353_v14 }
  0x5f   : > { %v644_v31 = vsub.f32 %v2916_v8, %v3778_v59  ;;  %v3786_v59 = vand.u32 4294901760, %v2949_v51 }
  0x60   : > { %v2974_v34 = vsub.f32 %v353_v14, %v2959_v47 }
  0x61   : > { %812 = vmatmul.f32.gmra.mxu3 %v2884_v37  ;;  %748 = vmatmul.f32.gmra.mxu1 %v2887_v35  ;;  %v645_v63 = vand.u32 4294901760, %v644_v31  ;;  %v524_v31 = vsub.f32 %v2949_v51, %v3786_v59  ;;  %v2983_v59 = vand.u32 4294901760, %v356_v27  ;;  %v293_v37 = vld [vmem:[%s2671_s24 + $0x78] sm:$0xff] }
  0x62   : > { %v3796_v55 = vand.u32 4294901760, %v2974_v34  ;;  %v362_v54 = vsel %vm315_vm1, %v293_v37, 0 }
  0x65   : > { %638 = vmatmul.f32.gmra.mxu2 %v637_v19  ;;  %v517_v19 = vand.u32 4294901760, %v516_v1  ;;  %v404_v1 = vsel %vm315_vm1, %v307_v61, 0  ;;  %v308_v61 = vld [vmem:[%s2671_s24 + $0xf0] sm:$0xff] }
  0x66   : > { %510 = vmatmul.f32.gmra.mxu0 %v509_v6  ;;  %v2956_v6 = vand.u32 4294901760, %v401_v42 }
  0x68   : > { %3828 = vst [vmem:[#allocation9_spill] sm:$0xff] %v2956_v6  ;;  %v2967_v30 = vsub.f32 %v401_v42, %v2956_v6 }
  0x69   : > { %816 = vmatmul.f32.gmra.mxu3 %v2907_v12  ;;  %752 = vmatmul.f32.gmra.mxu1 %v2911_v45  ;;  %v653_v12 = vand.u32 4294901760, %v652_v4  ;;  %v532_v4 = vsub.f32 %v2974_v34, %v3796_v55 }
  0x6a   : > { %3829 = vst [vmem:[#allocation10_spill] sm:$0xff] %v2967_v30  ;;  %v3793_v42 = vand.u32 4294901760, %v2967_v30 }
  0x6c   : > { %v660_v49 = vsub.f32 %v2967_v30, %v3793_v42  ;;  %v533_v42 = vand.u32 4294901760, %v532_v4 }
  0x6d   : > { %646 = vmatmul.f32.gmra.mxu2 %v645_v63  ;;  %v2979_v63 = vand.u32 4294901760, %v404_v1 }
  0x6e   : > { %518 = vmatmul.f32.gmra.mxu0 %v517_v19  ;;  %v525_v19 = vand.u32 4294901760, %v524_v31  ;;  %v407_v31 = vsel %vm315_vm1, %v308_v61, 0  ;;  %v309_v61 = vld [vmem:[%s2671_s24 + $0xf8] sm:$0xff] }
  0x6f   : > { %3830 = vst [vmem:[#allocation11_spill] sm:$0xff] %v2979_v63  ;;  %v2988_v14 = vsub.f32 %v404_v1, %v2979_v63  ;;  %v359_v1 = vsel %vm315_vm1, %v292_v9, 0  ;;  %v3004_v8 = vand.u32 4294901760, %v407_v31 }
  0x70   : > { %v3007_v55 = vand.u32 4294901760, %v359_v1 }
  0x71   : > { %820 = vmatmul.f32.gmra.mxu3 %v2932_v40  ;;  %756 = vmatmul.f32.gmra.mxu1 %v2935_v18  ;;  %v2998_v40 = vsub.f32 %v356_v27, %v2983_v59  ;;  %3831 = vst [vmem:[#allocation12_spill] sm:$0xff] %v3004_v8  ;;  %v3015_v9 = vsub.f32 %v407_v31, %v3004_v8 }
  0x72   : > { %v3021_v4 = vsub.f32 %v359_v1, %v3007_v55 }
  0x73   : > { %v3806_v30 = vand.u32 4294901760, %v2998_v40  ;;  %3832 = vst [vmem:[#allocation13_spill] sm:$0xff] %v3015_v9 }
  0x75   : > { %654 = vmatmul.f32.gmra.mxu2 %v653_v12  ;;  %v3805_v12 = vand.u32 4294901760, %v2988_v14 }
  0x76   : > { %526 = vmatmul.f32.gmra.mxu0 %v525_v19  ;;  %v661_v19 = vand.u32 4294901760, %v660_v49  ;;  %v540_v49 = vsub.f32 %v2998_v40, %v3806_v30  ;;  %v3031_v30 = vand.u32 4294901760, %v362_v54 }
  0x77   : > { %v668_v27 = vsub.f32 %v2988_v14, %v3805_v12  ;;  %v3809_v12 = vand.u32 4294901760, %v3015_v9 }
  0x78   : > { %v541_v31 = vand.u32 4294901760, %v540_v49 }
  0x79   : > { %824 = vmatmul.f32.gmra.mxu3 %v2956_v6  ;;  %760 = vmatmul.f32.gmra.mxu1 %v2959_v47  ;;  %v410_v6 = vsel %vm315_vm1, %v309_v61, 0  ;;  %v669_v36 = vand.u32 4294901760, %v668_v27  ;;  %v676_v1 = vsub.f32 %v3015_v9, %v3809_v12  ;;  %v3043_v27 = vsub.f32 %v362_v54, %v3031_v30 }
  0x7b   : > { %v677_v49 = vand.u32 4294901760, %v676_v1 }
  0x7d   : > { %662 = vmatmul.f32.gmra.mxu2 %v661_v19  ;;  %v3812_v19 = vand.u32 4294901760, %v3021_v4 }
  0x7e   : > { %534 = vmatmul.f32.gmra.mxu0 %v533_v42  ;;  %v3028_v42 = vand.u32 4294901760, %v410_v6 }
  0x7f   : > { %v548_v61 = vsub.f32 %v3021_v4, %v3812_v19 }
  0x80   : > { %3833 = vst [vmem:[#allocation14_spill] sm:$0xff] %v3028_v42  ;;  %v3037_v37 = vsub.f32 %v410_v6, %v3028_v42 }
  0x81   : > { %828 = vmatmul.f32.gmra.mxu3 %v2979_v63  ;;  %764 = vmatmul.f32.gmra.mxu1 %v2983_v59  ;;  %v549_v12 = vand.u32 4294901760, %v548_v61 }
  0x82   : > { %3834 = vst [vmem:[#allocation15_spill] sm:$0xff] %v3037_v37  ;;  %v3810_v63 = vand.u32 4294901760, %v3037_v37 }
  0x84   : > { %v684_v6 = vsub.f32 %v3037_v37, %v3810_v63  ;;  %v3838_v37 = vand.u32 4294901760, %v2734_v43 }
  0x85   : > { %670 = vmatmul.f32.gmra.mxu2 %v669_v36  ;;  %v3811_v36 = vand.u32 4294901760, %v3043_v27 }
  0x86   : > { %542 = vmatmul.f32.gmra.mxu0 %v541_v31  ;;  %v685_v31 = vand.u32 4294901760, %v684_v6 }
  0x87   : > { %v556_v54 = vsub.f32 %v3043_v27, %v3811_v36  ;;  %v3068_v36 = vld [vmem:[%s3759_s3] ss:$0 sm:$0xff] }
  0x89   : > { %832 = vmatmul.f32.gmra.mxu3 %v3004_v8  ;;  %768 = vmatmul.f32.gmra.mxu1 %v3007_v55  ;;  %v557_v1 = vand.u32 4294901760, %v556_v54 }
  0x8d   : > { %678 = vmatmul.f32.gmra.mxu2 %v677_v49  ;;  %v3835_v49 = vand.u32 4294901760, %v2697_v23 }
  0x8e   : > { %550 = vmatmul.f32.gmra.mxu0 %v549_v12 }
  0x91   : > { %836 = vmatmul.f32.gmra.mxu3 %v3028_v42  ;;  %772 = vmatmul.f32.gmra.mxu1 %v3031_v30 }
  0x95   : > { %686 = vmatmul.f32.gmra.mxu2 %v685_v31  ;;  %v3836_v31 = vand.u32 4294901760, %v2709_v29 }
  0x96   : > { %558 = vmatmul.f32.gmra.mxu0 %v557_v1  ;;  %v3057_v61 = vpop.f32.mrf.mxu1 }
  0x99   : > { %1039 = vmatmul.f32.vlgmr.msrb.gmra.mxu3 %v3835_v49  ;;  %1395 = vmatmul.f32.vlgmr.msrb.gmra.mxu1 %v2685_v16 }
  0x9b   : > { %v3062_v12 = vpop.f32.mrf.mxu0 }
  0x9c   : > { %v777_v63 = vpop.f32.mrf.mxu3 }
  0x9d   : > { %860 = vmatmul.f32.vlgmr.msrb.gmra.mxu2 %v2697_v23 }
  0x9e   : > { %1249 = vmatmul.f32.vlgmr.msrb.gmra.mxu0 %v2685_v16  ;;  %v3071_v6 = vpop.f32.mrf.mxu1 }
  0xa0   : > { %v567_v54 = vpop.f32.mrf.mxu2 }
  0xa1   : > { %1045 = vmatmul.f32.gmra.mxu3 %v3836_v31  ;;  %1399 = vmatmul.f32.gmra.mxu1 %v2699_v24  ;;  %v568_v1 = vadd.f32 %v3068_v36, %v567_v54 }
  0xa3   : > { %v3077_v49 = vpop.f32.mrf.mxu0  ;;  %v3079_v23 = vadd.f32 %v777_v63, %v568_v1  ;;  %v3840_v1 = vand.u32 4294901760, %v2758_v57 }
  0xa4   : > { %v781_v19 = vpop.f32.mrf.mxu3 }
  0xa5   : > { %3837 = vst [vmem:[#allocation16_spill] sm:$0xff] %v3079_v23  ;;  %865 = vmatmul.f32.gmra.mxu2 %v2709_v29 }
  0xa6   : > { %1253 = vmatmul.f32.gmra.mxu0 %v2699_v24  ;;  %v3083_v16 = vpop.f32.mrf.mxu1 }
  0xa8   : > { %v575_v42 = vpop.f32.mrf.mxu2 }
  0xa9   : > { %1051 = vmatmul.f32.gmra.mxu3 %v3838_v37  ;;  %1403 = vmatmul.f32.gmra.mxu1 %v2718_v33  ;;  %v576_v31 = vadd.f32 %v3068_v36, %v575_v42 }
  0xab   : > { %v3089_v54 = vpop.f32.mrf.mxu0  ;;  %v3091_v8 = vadd.f32 %v781_v19, %v576_v31  ;;  %v3842_v31 = vand.u32 4294901760, %v2782_v7 }
  0xac   : > { %v785_v63 = vpop.f32.mrf.mxu3 }
  0xad   : > { %3839 = vst [vmem:[#allocation17_spill] sm:$0xff] %v3091_v8  ;;  %870 = vmatmul.f32.gmra.mxu2 %v2734_v43 }
  0xae   : > { %1257 = vmatmul.f32.gmra.mxu0 %v2718_v33  ;;  %v3095_v24 = vpop.f32.mrf.mxu1 }
  0xb0   : > { %v583_v29 = vpop.f32.mrf.mxu2 }
  0xb1   : > { %1057 = vmatmul.f32.gmra.mxu3 %v3840_v1  ;;  %1407 = vmatmul.f32.gmra.mxu1 %v2743_v50  ;;  %v584_v37 = vadd.f32 %v3068_v36, %v583_v29 }
  0xb3   : > { %v3101_v42 = vpop.f32.mrf.mxu0  ;;  %v3103_v23 = vadd.f32 %v785_v63, %v584_v37  ;;  %v3844_v37 = vand.u32 4294901760, %v2805_v32 }
  0xb4   : > { %v789_v19 = vpop.f32.mrf.mxu3 }
  0xb5   : > { %3841 = vst [vmem:[#allocation18_spill] sm:$0xff] %v3103_v23  ;;  %875 = vmatmul.f32.gmra.mxu2 %v2758_v57 }
  0xb6   : > { %1261 = vmatmul.f32.gmra.mxu0 %v2743_v50  ;;  %v3107_v33 = vpop.f32.mrf.mxu1 }
  0xb8   : > { %v591_v43 = vpop.f32.mrf.mxu2 }
  0xb9   : > { %1063 = vmatmul.f32.gmra.mxu3 %v3842_v31  ;;  %1411 = vmatmul.f32.gmra.mxu1 %v2767_v0  ;;  %v592_v1 = vadd.f32 %v3068_v36, %v591_v43 }
  0xbb   : > { %v3113_v29 = vpop.f32.mrf.mxu0  ;;  %v3115_v8 = vadd.f32 %v789_v19, %v592_v1  ;;  %v3846_v1 = vand.u32 4294901760, %v2830_v56 }
  0xbc   : > { %v793_v63 = vpop.f32.mrf.mxu3 }
  0xbd   : > { %3843 = vst [vmem:[#allocation19_spill] sm:$0xff] %v3115_v8  ;;  %880 = vmatmul.f32.gmra.mxu2 %v2782_v7 }
  0xbe   : > { %1265 = vmatmul.f32.gmra.mxu0 %v2767_v0  ;;  %v3119_v50 = vpop.f32.mrf.mxu1 }
  0xc0   : > { %v599_v57 = vpop.f32.mrf.mxu2 }
  0xc1   : > { %1069 = vmatmul.f32.gmra.mxu3 %v3844_v37  ;;  %1415 = vmatmul.f32.gmra.mxu1 %v2791_v17  ;;  %v600_v31 = vadd.f32 %v3068_v36, %v599_v57 }
  0xc3   : > { %v3125_v43 = vpop.f32.mrf.mxu0  ;;  %v3127_v23 = vadd.f32 %v793_v63, %v600_v31  ;;  %v3848_v31 = vand.u32 4294901760, %v2854_v21 }
  0xc4   : > { %v797_v19 = vpop.f32.mrf.mxu3 }
  0xc5   : > { %3845 = vst [vmem:[#allocation20_spill] sm:$0xff] %v3127_v23  ;;  %885 = vmatmul.f32.gmra.mxu2 %v2805_v32 }
  0xc6   : > { %1269 = vmatmul.f32.gmra.mxu0 %v2791_v17  ;;  %v3131_v0 = vpop.f32.mrf.mxu1 }
  0xc8   : > { %v607_v7 = vpop.f32.mrf.mxu2 }
  0xc9   : > { %1075 = vmatmul.f32.gmra.mxu3 %v3846_v1  ;;  %1419 = vmatmul.f32.gmra.mxu1 %v2815_v44  ;;  %v608_v37 = vadd.f32 %v3068_v36, %v607_v7 }
  0xcb   : > { %v3137_v57 = vpop.f32.mrf.mxu0  ;;  %v3139_v8 = vadd.f32 %v797_v19, %v608_v37  ;;  %v3850_v37 = vand.u32 4294901760, %v2877_v2 }
  0xcc   : > { %v801_v63 = vpop.f32.mrf.mxu3 }
  0xcd   : > { %3847 = vst [vmem:[#allocation21_spill] sm:$0xff] %v3139_v8  ;;  %890 = vmatmul.f32.gmra.mxu2 %v2830_v56 }
  0xce   : > { %1273 = vmatmul.f32.gmra.mxu0 %v2815_v44  ;;  %v3143_v17 = vpop.f32.mrf.mxu1 }
  0xd0   : > { %v615_v32 = vpop.f32.mrf.mxu2 }
  0xd1   : > { %1081 = vmatmul.f32.gmra.mxu3 %v3848_v31  ;;  %1423 = vmatmul.f32.gmra.mxu1 %v2839_v5  ;;  %v616_v1 = vadd.f32 %v3068_v36, %v615_v32 }
  0xd3   : > { %v3149_v7 = vpop.f32.mrf.mxu0  ;;  %v3151_v23 = vadd.f32 %v801_v63, %v616_v1  ;;  %v3852_v1 = vand.u32 4294901760, %v2902_v38 }
  0xd4   : > { %v805_v19 = vpop.f32.mrf.mxu3 }
  0xd5   : > { %3849 = vst [vmem:[#allocation22_spill] sm:$0xff] %v3151_v23  ;;  %895 = vmatmul.f32.gmra.mxu2 %v2854_v21 }
  0xd6   : > { %1277 = vmatmul.f32.gmra.mxu0 %v2839_v5  ;;  %v3155_v44 = vpop.f32.mrf.mxu1 }
  0xd8   : > { %v623_v56 = vpop.f32.mrf.mxu2 }
  0xd9   : > { %1087 = vmatmul.f32.gmra.mxu3 %v3850_v37  ;;  %1427 = vmatmul.f32.gmra.mxu1 %v2863_v48  ;;  %v624_v31 = vadd.f32 %v3068_v36, %v623_v56 }
  0xdb   : > { %v3161_v32 = vpop.f32.mrf.mxu0  ;;  %v3163_v8 = vadd.f32 %v805_v19, %v624_v31  ;;  %v3854_v31 = vand.u32 4294901760, %v2926_v26 }
  0xdc   : > { %v809_v63 = vpop.f32.mrf.mxu3 }
  0xdd   : > { %3851 = vst [vmem:[#allocation23_spill] sm:$0xff] %v3163_v8  ;;  %900 = vmatmul.f32.gmra.mxu2 %v2877_v2 }
  0xde   : > { %1281 = vmatmul.f32.gmra.mxu0 %v2863_v48  ;;  %v3167_v5 = vpop.f32.mrf.mxu1 }
  0xe0   : > { %v631_v21 = vpop.f32.mrf.mxu2 }
  0xe1   : > { %1093 = vmatmul.f32.gmra.mxu3 %v3852_v1  ;;  %1431 = vmatmul.f32.gmra.mxu1 %v2887_v35  ;;  %v632_v37 = vadd.f32 %v3068_v36, %v631_v21 }
  0xe3   : > { %v3173_v56 = vpop.f32.mrf.mxu0  ;;  %v3175_v23 = vadd.f32 %v809_v63, %v632_v37  ;;  %v3856_v37 = vand.u32 4294901760, %v2949_v51 }
  0xe4   : > { %v813_v19 = vpop.f32.mrf.mxu3 }
  0xe5   : > { %3853 = vst [vmem:[#allocation24_spill] sm:$0xff] %v3175_v23  ;;  %905 = vmatmul.f32.gmra.mxu2 %v2902_v38 }
  0xe6   : > { %1285 = vmatmul.f32.gmra.mxu0 %v2887_v35  ;;  %v3179_v48 = vpop.f32.mrf.mxu1 }
  0xe8   : > { %v639_v2 = vpop.f32.mrf.mxu2 }
  0xe9   : > { %1099 = vmatmul.f32.gmra.mxu3 %v3854_v31  ;;  %1435 = vmatmul.f32.gmra.mxu1 %v2911_v45  ;;  %v640_v1 = vadd.f32 %v3068_v36, %v639_v2 }
  0xeb   : > { %v3185_v21 = vpop.f32.mrf.mxu0  ;;  %v3187_v8 = vadd.f32 %v813_v19, %v640_v1  ;;  %v3858_v1 = vand.u32 4294901760, %v2974_v34 }
  0xec   : > { %v817_v63 = vpop.f32.mrf.mxu3 }
  0xed   : > { %3855 = vst [vmem:[#allocation25_spill] sm:$0xff] %v3187_v8  ;;  %910 = vmatmul.f32.gmra.mxu2 %v2926_v26 }
  0xee   : > { %1289 = vmatmul.f32.gmra.mxu0 %v2911_v45  ;;  %v3191_v38 = vpop.f32.mrf.mxu1 }
  0xf0   : > { %v647_v35 = vpop.f32.mrf.mxu2 }
  0xf1   : > { %1105 = vmatmul.f32.gmra.mxu3 %v3856_v37  ;;  %1439 = vmatmul.f32.gmra.mxu1 %v2935_v18  ;;  %v648_v31 = vadd.f32 %v3068_v36, %v647_v35 }
  0xf3   : > { %v3197_v2 = vpop.f32.mrf.mxu0  ;;  %v3199_v23 = vadd.f32 %v817_v63, %v648_v31  ;;  %v3861_v31 = vand.u32 4294901760, %v2998_v40 }
  0xf4   : > { %v821_v19 = vpop.f32.mrf.mxu3 }
  0xf5   : > { %3857 = vst [vmem:[#allocation26_spill] sm:$0xff] %v3199_v23  ;;  %915 = vmatmul.f32.gmra.mxu2 %v2949_v51 }
  0xf6   : > { %1293 = vmatmul.f32.gmra.mxu0 %v2935_v18  ;;  %v3203_v26 = vpop.f32.mrf.mxu1 }
  0xf8   : > { %v655_v45 = vpop.f32.mrf.mxu2 }
  0xf9   : > { %1111 = vmatmul.f32.gmra.mxu3 %v3858_v1  ;;  %1443 = vmatmul.f32.gmra.mxu1 %v2959_v47  ;;  %v656_v37 = vadd.f32 %v3068_v36, %v655_v45 }
  0xfb   : > { %v3209_v35 = vpop.f32.mrf.mxu0  ;;  %v3211_v8 = vadd.f32 %v821_v19, %v656_v37  ;;  %v3864_v37 = vand.u32 4294901760, %v3021_v4 }
  0xfc   : > { %v825_v63 = vpop.f32.mrf.mxu3 }
  0xfd   : > { %3859 = vst [vmem:[#allocation27_spill] sm:$0xff] %v3211_v8  ;;  %920 = vmatmul.f32.gmra.mxu2 %v2974_v34 }
  0xfe   : > { %1297 = vmatmul.f32.gmra.mxu0 %v2959_v47  ;;  %v3215_v18 = vpop.f32.mrf.mxu1 }
  0xff   : > { %3860 = vst [vmem:[#allocation28_spill] sm:$0xff] %v3215_v18 }
 0x100   : > { %v663_v51 = vpop.f32.mrf.mxu2 }
 0x101   : > { %1117 = vmatmul.f32.gmra.mxu3 %v3861_v31  ;;  %1447 = vmatmul.f32.gmra.mxu1 %v2983_v59  ;;  %v664_v1 = vadd.f32 %v3068_v36, %v663_v51 }
 0x103   : > { %v3221_v45 = vpop.f32.mrf.mxu0  ;;  %v3223_v23 = vadd.f32 %v825_v63, %v664_v1  ;;  %v3868_v1 = vand.u32 4294901760, %v3043_v27 }
 0x104   : > { %v829_v19 = vpop.f32.mrf.mxu3 }
 0x105   : > { %3862 = vst [vmem:[#allocation29_spill] sm:$0xff] %v3223_v23  ;;  %925 = vmatmul.f32.gmra.mxu2 %v2998_v40 }
 0x106   : > { %1301 = vmatmul.f32.gmra.mxu0 %v2983_v59  ;;  %v3227_v34 = vpop.f32.mrf.mxu1 }
 0x107   : > { %3863 = vst [vmem:[#allocation30_spill] sm:$0xff] %v3227_v34 }
 0x108   : > { %v671_v47 = vpop.f32.mrf.mxu2 }
 0x109   : > { %1123 = vmatmul.f32.gmra.mxu3 %v3864_v37  ;;  %1451 = vmatmul.f32.gmra.mxu1 %v3007_v55  ;;  %v672_v31 = vadd.f32 %v3068_v36, %v671_v47 }
 0x10b   : > { %v3233_v51 = vpop.f32.mrf.mxu0  ;;  %v3235_v8 = vadd.f32 %v829_v19, %v672_v31 }
 0x10c   : > { %3865 = vst [vmem:[#allocation31_spill] sm:$0xff] %v3233_v51  ;;  %v833_v63 = vpop.f32.mrf.mxu3 }
 0x10d   : > { %3866 = vst [vmem:[#allocation32_spill] sm:$0xff] %v3235_v8  ;;  %930 = vmatmul.f32.gmra.mxu2 %v3021_v4  ;;  %v3871_v8 = vand.u32 4294901760, %v2691_v20 }
 0x10e   : > { %1305 = vmatmul.f32.gmra.mxu0 %v3007_v55  ;;  %v3239_v40 = vpop.f32.mrf.mxu1 }
 0x10f   : > { %3867 = vst [vmem:[#allocation33_spill] sm:$0xff] %v3239_v40 }
 0x110   : > { %v679_v59 = vpop.f32.mrf.mxu2 }
 0x111   : > { %1129 = vmatmul.f32.gmra.mxu3 %v3868_v1  ;;  %1455 = vmatmul.f32.gmra.mxu1 %v3031_v30  ;;  %v680_v47 = vadd.f32 %v3068_v36, %v679_v59 }
 0x113   : > { %v3245_v37 = vpop.f32.mrf.mxu0  ;;  %v3247_v19 = vadd.f32 %v833_v63, %v680_v47  ;;  %v440_v63 = vadd.f32 %v3068_v36, %v3062_v12  ;;  %v3873_v12 = vand.u32 4294901760, %v2694_v22 }
 0x114   : > { %3869 = vst [vmem:[#allocation34_spill] sm:$0xff] %v3245_v37  ;;  %v837_v31 = vpop.f32.mrf.mxu3 }
 0x115   : > { %3870 = vst [vmem:[#allocation35_spill] sm:$0xff] %v3247_v19  ;;  %935 = vmatmul.f32.gmra.mxu2 %v3043_v27 }
 0x116   : > { %1309 = vmatmul.f32.gmra.mxu0 %v3031_v30  ;;  %v1396_v55 = vpop.f32.mrf.mxu1  ;;  %v714_v30 = vadd.f32 %v3057_v61, %v440_v63  ;;  %v448_v61 = vadd.f32 %v3068_v36, %v3077_v49  ;;  %v3874_v49 = vand.u32 4294901760, %v2724_v39 }
 0x118   : > { %v687_v4 = vpop.f32.mrf.mxu2  ;;  %v718_v34 = vadd.f32 %v3071_v6, %v448_v61 }
 0x119   : > { %1135 = vmatmul.f32.gmra.mxu3 %v3871_v8  ;;  %1459 = vmatmul.f32.gmra.mxu1 %v2681_v13  ;;  %v688_v1 = vadd.f32 %v3068_v36, %v687_v4  ;;  %v3269_v4 = vld [vmem:[%s3264_s30] sm:$0xff] }
 0x11a   : > { %v1540_v19 = vrot.slane %v3269_v4, 2  ;;  %v1543_v18 = vrot.slane %v3269_v4, 5 }
 0x11b   : > { %v1250_v23 = vpop.f32.mrf.mxu0  ;;  %v3258_v59 = vadd.f32 %v837_v31, %v688_v1 }
 0x11c   : > { %v1040_v47 = vpop.f32.mrf.mxu3 }
 0x11d   : > { %3872 = vst [vmem:[#allocation36_spill] sm:$0xff] %v3258_v59  ;;  %940 = vmatmul.f32.gmra.mxu2 %v2691_v20  ;;  %v1539_v59 = vrot.slane %v3269_v4, 1 }
 0x11e   : > { %1313 = vmatmul.f32.gmra.mxu0 %v2681_v13  ;;  %v1400_v8 = vpop.f32.mrf.mxu1  ;;  %v1541_v13 = vrot.slane %v3269_v4, 3 }
 0x120   : > { %v861_v27 = vpop.f32.mrf.mxu2  ;;  %v3288_v37 = vperm.slane %v1541_v13, 0  ;;  %v456_v13 = vadd.f32 %v3068_v36, %v3089_v54 }
 0x121   : > { %1141 = vmatmul.f32.gmra.mxu3 %v3873_v12  ;;  %1463 = vmatmul.f32.gmra.mxu1 %v2683_v15  ;;  %v862_v20 = vadd.f32 %v861_v27, %v714_v30  ;;  %v1595_v12 = vperm.slane %v3269_v4, 0  ;;  %v3284_v27 = vperm.slane %v1539_v59, 0 }
 0x123   : > { %v1254_v31 = vpop.f32.mrf.mxu0  ;;  %v1041_v1 = vadd.f32 %v1040_v47, %v862_v20  ;;  %v3286_v20 = vperm.slane %v1540_v19, 0  ;;  %v1542_v19 = vrot.slane %v3269_v4, 4 }
 0x124   : > { %v1046_v40 = vpop.f32.mrf.mxu3 }
 0x125   : > { %v1251_v63 = vadd.f32 %v1250_v23, %v1041_v1  ;;  %945 = vmatmul.f32.gmra.mxu2 %v2694_v22 }
 0x126   : > { %1317 = vmatmul.f32.gmra.mxu0 %v2683_v15  ;;  %v3282_v30 = vpop.f32.mrf.mxu1 }
 0x127   : > { %v1397_v47 = vadd.f32 %v1396_v55, %v1251_v63 }
 0x128   : > { %v866_v51 = vpop.f32.mrf.mxu2 }
 0x129   : > { %1147 = vmatmul.f32.gmra.mxu3 %v3874_v49  ;;  %1467 = vmatmul.f32.gmra.mxu1 %v2706_v28  ;;  %v1755_v22 = vrot.slane %v1397_v47, 2  ;;  %v1756_v23 = vrot.slane %v1397_v47, 4  ;;  %v1757_v15 = vrot.slane %v1397_v47, 6  ;;  %v1947_v55 = vadd.f32 %v1595_v12, %v1397_v47 }
 0x12a   : > { %v867_v59 = vadd.f32 %v866_v51, %v718_v34  ;;  %v1544_v47 = vrot.slane %v3269_v4, 6  ;;  %v1545_v34 = vrot.slane %v3269_v4, 7 }
 0x12b   : > { %v1258_v1 = vpop.f32.mrf.mxu0  ;;  %v1948_v6 = vadd.f32 %v1755_v22, %v3284_v27  ;;  %v1949_v61 = vadd.f32 %v1756_v23, %v3286_v20  ;;  %v1950_v63 = vadd.f32 %v1757_v15, %v3288_v37  ;;  %2203 = vst [vmem:[#allocation1] ss:$4 sm:$0xff] %v1947_v55  ;;  %v3309_v22 = vperm.slane %v1542_v19, 0 }
 0x12c   : > { %v1052_v49 = vpop.f32.mrf.mxu3  ;;  %v1047_v9 = vadd.f32 %v1046_v40, %v867_v59  ;;  %v722_v23 = vadd.f32 %v3083_v16, %v456_v13  ;;  %v3312_v15 = vperm.slane %v1543_v18, 0  ;;  %v3314_v55 = vperm.slane %v1544_v47, 0 }
 0x12d   : > { %2205 = vst [vmem:[#allocation1 + $0x1] ss:$4 sm:$0xff] %v1948_v6  ;;  %950 = vmatmul.f32.gmra.mxu2 %v2724_v39  ;;  %v3316_v59 = vperm.slane %v1545_v34, 0  ;;  %v3875_v39 = vand.u32 4294901760, %v2748_v53 }
 0x12e   : > { %1321 = vmatmul.f32.gmra.mxu0 %v2706_v28  ;;  %v3307_v54 = vpop.f32.mrf.mxu1  ;;  %2207 = vst [vmem:[#allocation1 + $0x2] ss:$4 sm:$0xff] %v1949_v61  ;;  %v1255_v51 = vadd.f32 %v1254_v31, %v1047_v9  ;;  %v464_v61 = vadd.f32 %v3068_v36, %v3101_v42 }
 0x12f   : > { %2209 = vst [vmem:[#allocation1 + $0x3] ss:$4 sm:$0xff] %v1950_v63 }
 0x130   : > { %v1401_v40 = vadd.f32 %v1400_v8, %v1255_v51  ;;  %v871_v6 = vpop.f32.mrf.mxu2 }
 0x131   : > { %1153 = vmatmul.f32.gmra.mxu3 %v3875_v39  ;;  %1471 = vmatmul.f32.gmra.mxu1 %v2740_v46  ;;  %v872_v28 = vadd.f32 %v871_v6, %v722_v23 }
 0x132   : > { %v1758_v9 = vrot.slane %v1401_v40, 2  ;;  %v1759_v31 = vrot.slane %v1401_v40, 4  ;;  %v1760_v19 = vrot.slane %v1401_v40, 6  ;;  %v1951_v16 = vadd.f32 %v3309_v22, %v1401_v40 }
 0x133   : > { %v1262_v8 = vpop.f32.mrf.mxu0  ;;  %v1053_v18 = vadd.f32 %v1052_v49, %v872_v28 }
 0x134   : > { %v1058_v13 = vpop.f32.mrf.mxu3  ;;  %v1952_v63 = vadd.f32 %v1758_v9, %v3312_v15  ;;  %v1953_v47 = vadd.f32 %v1759_v31, %v3314_v55  ;;  %v1954_v34 = vadd.f32 %v1760_v19, %v3316_v59  ;;  %2211 = vst [vmem:[#allocation1 + $0x20] ss:$4 sm:$0xff] %v1951_v16 }
 0x135   : > { %v1259_v51 = vadd.f32 %v1258_v1, %v1053_v18  ;;  %955 = vmatmul.f32.gmra.mxu2 %v2748_v53  ;;  %v726_v1 = vadd.f32 %v3095_v24, %v464_v61  ;;  %v472_v24 = vadd.f32 %v3068_v36, %v3113_v29 }
 0x136   : > { %1325 = vmatmul.f32.gmra.mxu0 %v2740_v46  ;;  %v3329_v23 = vpop.f32.mrf.mxu1  ;;  %v2218_v42 = vld.sshfl [vmem:[#allocation1] sm:$0xff pattern:$0x73625140]  ;;  %2213 = vst [vmem:[#allocation1 + $0x21] ss:$4 sm:$0xff] %v1952_v63  ;;  %v3876_v46 = vand.u32 4294901760, %v2772_v3 }
 0x137   : > { %2215 = vst [vmem:[#allocation1 + $0x22] ss:$4 sm:$0xff] %v1953_v47  ;;  %v1405_v49 = vadd.f32 %v3282_v30, %v1259_v51  ;;  %v3359_v63 = vld [vmem:[%s3264_s30 + $0x8] sm:$0xff] }
 0x138   : > { %2217 = vst [vmem:[#allocation1 + $0x23] ss:$4 sm:$0xff] %v1954_v34  ;;  %v876_v53 = vpop.f32.mrf.mxu2 }
 0x139   : > { %1159 = vmatmul.f32.gmra.mxu3 %v3876_v46  ;;  %1475 = vmatmul.f32.gmra.mxu1 %v2764_v60  ;;  %v1761_v40 = vrot.slane %v1405_v49, 2  ;;  %v1762_v6 = vrot.slane %v1405_v49, 4  ;;  %v1763_v39 = vrot.slane %v1405_v49, 6  ;;  %v1955_v28 = vadd.f32 %v1595_v12, %v1405_v49  ;;  %2403 = vst.msk [vmem:[%s3336_s7] sm:$0xff] %vm2402_vm2, %v2218_v42 }
 0x13a   : > { %v877_v9 = vadd.f32 %v876_v53, %v726_v1  ;;  %v730_v12 = vadd.f32 %v3107_v33, %v472_v24  ;;  %v1547_v42 = vrot.slane %v3359_v63, 2  ;;  %v1548_v49 = vrot.slane %v3359_v63, 3 }
 0x13b   : > { %v1266_v31 = vpop.f32.mrf.mxu0  ;;  %v1956_v30 = vadd.f32 %v1761_v40, %v3284_v27  ;;  %v1957_v19 = vadd.f32 %v1762_v6, %v3286_v20  ;;  %v1958_v16 = vadd.f32 %v1763_v39, %v3288_v37  ;;  %2220 = vst [vmem:[#allocation1] ss:$4 sm:$0xff] %v1955_v28  ;;  %v480_v53 = vadd.f32 %v3068_v36, %v3125_v43 }
 0x13c   : > { %v1064_v18 = vpop.f32.mrf.mxu3  ;;  %v1059_v61 = vadd.f32 %v1058_v13, %v877_v9  ;;  %v3877_v13 = vand.u32 4294901760, %v2799_v25  ;;  %v1603_v39 = vperm.slane %v3359_v63, 0 }
 0x13d   : > { %2221 = vst [vmem:[#allocation1 + $0x1] ss:$4 sm:$0xff] %v1956_v30  ;;  %960 = vmatmul.f32.gmra.mxu2 %v2772_v3 }
 0x13e   : > { %1329 = vmatmul.f32.gmra.mxu0 %v2764_v60  ;;  %v3354_v4 = vpop.f32.mrf.mxu1  ;;  %2222 = vst [vmem:[#allocation1 + $0x2] ss:$4 sm:$0xff] %v1957_v19  ;;  %v1263_v29 = vadd.f32 %v1262_v8, %v1059_v61 }
 0x13f   : > { %v2219_v27 = vld.sshfl [vmem:[#allocation1 + $0x20] sm:$0xff pattern:$0x73625140]  ;;  %2223 = vst [vmem:[#allocation1 + $0x3] ss:$4 sm:$0xff] %v1958_v16 }
 0x140   : > { %v1409_v20 = vadd.f32 %v3307_v54, %v1263_v29  ;;  %v881_v37 = vpop.f32.mrf.mxu2  ;;  %2404 = vst.msk [vmem:[%s3336_s7 + $0x8] sm:$0xff] %vm2402_vm2, %v2219_v27  ;;  %v1546_v54 = vrot.slane %v3359_v63, 1 }
 0x141   : > { %1165 = vmatmul.f32.gmra.mxu3 %v3877_v13  ;;  %1479 = vmatmul.f32.gmra.mxu1 %v2788_v10  ;;  %v882_v60 = vadd.f32 %v881_v37, %v730_v12  ;;  %v1550_v13 = vrot.slane %v3359_v63, 5 }
 0x142   : > { %v1764_v3 = vrot.slane %v1409_v20, 2  ;;  %v1765_v47 = vrot.slane %v1409_v20, 4  ;;  %v1766_v8 = vrot.slane %v1409_v20, 6  ;;  %v1959_v33 = vadd.f32 %v3309_v22, %v1409_v20 }
 0x143   : > { %v1270_v34 = vpop.f32.mrf.mxu0  ;;  %v1065_v51 = vadd.f32 %v1064_v18, %v882_v60  ;;  %v1549_v18 = vrot.slane %v3359_v63, 4  ;;  %v1551_v60 = vrot.slane %v3359_v63, 6 }
 0x144   : > { %v1070_v1 = vpop.f32.mrf.mxu3  ;;  %v1960_v46 = vadd.f32 %v1764_v3, %v3312_v15  ;;  %v1961_v40 = vadd.f32 %v1765_v47, %v3314_v55  ;;  %v1962_v6 = vadd.f32 %v1766_v8, %v3316_v59  ;;  %2224 = vst [vmem:[#allocation1 + $0x20] ss:$4 sm:$0xff] %v1959_v33  ;;  %v3381_v15 = vperm.slane %v1546_v54, 0 }
 0x145   : > { %v1267_v22 = vadd.f32 %v1266_v31, %v1065_v51  ;;  %965 = vmatmul.f32.gmra.mxu2 %v2799_v25  ;;  %v3383_v55 = vperm.slane %v1547_v42, 0  ;;  %v3385_v59 = vperm.slane %v1548_v49, 0  ;;  %v734_v25 = vadd.f32 %v3119_v50, %v480_v53 }
 0x146   : > { %1333 = vmatmul.f32.gmra.mxu0 %v2788_v10  ;;  %v3378_v28 = vpop.f32.mrf.mxu1  ;;  %v2228_v9 = vld.sshfl [vmem:[#allocation1] sm:$0xff pattern:$0x73625140]  ;;  %2225 = vst [vmem:[#allocation1 + $0x21] ss:$4 sm:$0xff] %v1960_v46  ;;  %v3878_v10 = vand.u32 4294901760, %v2823_v52  ;;  %v488_v50 = vadd.f32 %v3068_v36, %v3137_v57 }
 0x147   : > { %2226 = vst [vmem:[#allocation1 + $0x22] ss:$4 sm:$0xff] %v1961_v40  ;;  %v1413_v43 = vadd.f32 %v3329_v23, %v1267_v22  ;;  %v1552_v3 = vrot.slane %v3359_v63, 7  ;;  %v3408_v8 = vperm.slane %v1549_v18, 0  ;;  %v3412_v42 = vperm.slane %v1550_v13, 0  ;;  %v3881_v18 = vld [vmem:[#allocation2_spill] sm:$0xff] }
 0x148   : > { %2227 = vst [vmem:[#allocation1 + $0x23] ss:$4 sm:$0xff] %v1962_v6  ;;  %v886_v31 = vpop.f32.mrf.mxu2  ;;  %v738_v33 = vadd.f32 %v3131_v0, %v488_v50  ;;  %v3414_v49 = vperm.slane %v1551_v60, 0  ;;  %v3454_v60 = vld [vmem:[%s3264_s30 + $0x10] sm:$0xff] }
 0x149   : > { %1171 = vmatmul.f32.gmra.mxu3 %v3878_v10  ;;  %1483 = vmatmul.f32.gmra.mxu1 %v2812_v41  ;;  %v1767_v24 = vrot.slane %v1413_v43, 2  ;;  %v1768_v30 = vrot.slane %v1413_v43, 4  ;;  %v1769_v19 = vrot.slane %v1413_v43, 6  ;;  %v1963_v23 = vadd.f32 %v1603_v39, %v1413_v43  ;;  %2405 = vst.msk [vmem:[%s3336_s7 + $0x10] sm:$0xff] %vm2402_vm2, %v2228_v9 }
 0x14a   : > { %v887_v16 = vadd.f32 %v886_v31, %v734_v25  ;;  %v496_v9 = vadd.f32 %v3068_v36, %v3149_v7 }
 0x14b   : > { %v1274_v61 = vpop.f32.mrf.mxu0  ;;  %v1964_v29 = vadd.f32 %v1767_v24, %v3381_v15  ;;  %v1965_v12 = vadd.f32 %v1768_v30, %v3383_v55  ;;  %v1966_v27 = vadd.f32 %v1769_v19, %v3385_v59  ;;  %2230 = vst [vmem:[#allocation1] ss:$4 sm:$0xff] %v1963_v23 }
 0x14c   : > { %v1076_v20 = vpop.f32.mrf.mxu3  ;;  %v1071_v37 = vadd.f32 %v1070_v1, %v887_v16  ;;  %v742_v19 = vadd.f32 %v3143_v17, %v496_v9  ;;  %v3880_v16 = vand.u32 4294901760, %v2871_v58  ;;  %v504_v17 = vadd.f32 %v3068_v36, %v3161_v32 }
 0x14d   : > { %2231 = vst [vmem:[#allocation1 + $0x1] ss:$4 sm:$0xff] %v1964_v29  ;;  %970 = vmatmul.f32.gmra.mxu2 %v2823_v52  ;;  %v3416_v52 = vperm.slane %v1552_v3, 0  ;;  %v3882_v3 = vld [vmem:[#allocation4_spill] sm:$0xff]  ;;  %v1611_v9 = vperm.slane %v3454_v60, 0 }
 0x14e   : > { %1337 = vmatmul.f32.gmra.mxu0 %v2812_v41  ;;  %v3406_v57 = vpop.f32.mrf.mxu1  ;;  %2232 = vst [vmem:[#allocation1 + $0x2] ss:$4 sm:$0xff] %v1965_v12  ;;  %v1271_v47 = vadd.f32 %v1270_v34, %v1071_v37  ;;  %v3879_v41 = vand.u32 4294901760, %v2844_v11 }
 0x14f   : > { %v2229_v51 = vld.sshfl [vmem:[#allocation1 + $0x20] sm:$0xff pattern:$0x73625140]  ;;  %2233 = vst [vmem:[#allocation1 + $0x3] ss:$4 sm:$0xff] %v1966_v27 }
 0x150   : > { %v1417_v54 = vadd.f32 %v3354_v4, %v1271_v47  ;;  %v891_v1 = vpop.f32.mrf.mxu2  ;;  %2406 = vst.msk [vmem:[%s3336_s7 + $0x18] sm:$0xff] %vm2402_vm2, %v2229_v51  ;;  %v3883_v47 = vand.u32 4294901760, %v3882_v3 }
 0x151   : > { %1177 = vmatmul.f32.gmra.mxu3 %v3879_v41  ;;  %1487 = vmatmul.f32.gmra.mxu1 %v2835_v62  ;;  %v892_v34 = vadd.f32 %v891_v1, %v738_v33  ;;  %v3884_v33 = vld [vmem:[#allocation3_spill] sm:$0xff] }
 0x152   : > { %v1770_v0 = vrot.slane %v1417_v54, 2  ;;  %v1771_v53 = vrot.slane %v1417_v54, 4  ;;  %v1772_v46 = vrot.slane %v1417_v54, 6  ;;  %v1967_v4 = vadd.f32 %v3408_v8, %v1417_v54 }
 0x153   : > { %v1278_v40 = vpop.f32.mrf.mxu0  ;;  %v1077_v6 = vadd.f32 %v1076_v20, %v892_v34 }
 0x154   : > { %v1082_v22 = vpop.f32.mrf.mxu3  ;;  %v1968_v43 = vadd.f32 %v1770_v0, %v3412_v42  ;;  %v1969_v25 = vadd.f32 %v1771_v53, %v3414_v49  ;;  %v1970_v31 = vadd.f32 %v1772_v46, %v3416_v52  ;;  %2234 = vst [vmem:[#allocation1 + $0x20] ss:$4 sm:$0xff] %v1967_v4  ;;  %v1554_v0 = vrot.slane %v3454_v60, 2 }
 0x155   : > { %v1275_v10 = vadd.f32 %v1274_v61, %v1077_v6  ;;  %975 = vmatmul.f32.gmra.mxu2 %v2844_v11  ;;  %v1555_v53 = vrot.slane %v3454_v60, 3  ;;  %v512_v4 = vadd.f32 %v3068_v36, %v3173_v56 }
 0x156   : > { %1341 = vmatmul.f32.gmra.mxu0 %v2835_v62  ;;  %v3431_v24 = vpop.f32.mrf.mxu1  ;;  %v2238_v30 = vld.sshfl [vmem:[#allocation1] sm:$0xff pattern:$0x73625140]  ;;  %2235 = vst [vmem:[#allocation1 + $0x21] ss:$4 sm:$0xff] %v1968_v43 }
 0x157   : > { %2236 = vst [vmem:[#allocation1 + $0x22] ss:$4 sm:$0xff] %v1969_v25  ;;  %v1421_v7 = vadd.f32 %v3378_v28, %v1275_v10 }
 0x158   : > { %2237 = vst [vmem:[#allocation1 + $0x23] ss:$4 sm:$0xff] %v1970_v31  ;;  %v896_v23 = vpop.f32.mrf.mxu2  ;;  %v750_v31 = vadd.f32 %v3167_v5, %v512_v4  ;;  %v520_v5 = vadd.f32 %v3068_v36, %v3185_v21 }
 0x159   : > { %1183 = vmatmul.f32.gmra.mxu3 %v3880_v16  ;;  %1491 = vmatmul.f32.gmra.mxu1 %v3881_v18  ;;  %v1773_v11 = vrot.slane %v1421_v7, 2  ;;  %v1774_v61 = vrot.slane %v1421_v7, 4  ;;  %v1775_v50 = vrot.slane %v1421_v7, 6  ;;  %v1971_v62 = vadd.f32 %v1603_v39, %v1421_v7  ;;  %2407 = vst.msk [vmem:[%s3336_s7 + $0x20] sm:$0xff] %vm2402_vm2, %v2238_v30  ;;  %v3885_v30 = vld [vmem:[#allocation6_spill] sm:$0xff] }
 0x15a   : > { %v897_v29 = vadd.f32 %v896_v23, %v742_v19  ;;  %v746_v39 = vadd.f32 %v3155_v44, %v504_v17  ;;  %v3886_v7 = vand.u32 4294901760, %v3885_v30  ;;  %v3887_v19 = vld [vmem:[#allocation5_spill] sm:$0xff] }
 0x15b   : > { %v1282_v12 = vpop.f32.mrf.mxu0  ;;  %v1972_v28 = vadd.f32 %v1773_v11, %v3381_v15  ;;  %v1973_v27 = vadd.f32 %v1774_v61, %v3383_v55  ;;  %v1974_v20 = vadd.f32 %v1775_v50, %v3385_v59  ;;  %2240 = vst [vmem:[#allocation1] ss:$4 sm:$0xff] %v1971_v62  ;;  %v1556_v61 = vrot.slane %v3454_v60, 4 }
 0x15c   : > { %v1088_v37 = vpop.f32.mrf.mxu3  ;;  %v1083_v13 = vadd.f32 %v1082_v22, %v897_v29 }
 0x15d   : > { %2241 = vst [vmem:[#allocation1 + $0x1] ss:$4 sm:$0xff] %v1972_v28  ;;  %980 = vmatmul.f32.gmra.mxu2 %v2871_v58 }
 0x15e   : > { %1345 = vmatmul.f32.gmra.mxu0 %v3881_v18  ;;  %v3449_v63 = vpop.f32.mrf.mxu1  ;;  %2242 = vst [vmem:[#allocation1 + $0x2] ss:$4 sm:$0xff] %v1973_v27  ;;  %v1279_v32 = vadd.f32 %v1278_v40, %v1083_v13  ;;  %v1557_v27 = vrot.slane %v3454_v60, 5 }
 0x15f   : > { %v2239_v15 = vld.sshfl [vmem:[#allocation1 + $0x20] sm:$0xff pattern:$0x73625140]  ;;  %2243 = vst [vmem:[#allocation1 + $0x3] ss:$4 sm:$0xff] %v1974_v20  ;;  %v1558_v20 = vrot.slane %v3454_v60, 6 }
 0x160   : > { %v1425_v55 = vadd.f32 %v3406_v57, %v1279_v32  ;;  %v901_v59 = vpop.f32.mrf.mxu2  ;;  %2408 = vst.msk [vmem:[%s3336_s7 + $0x28] sm:$0xff] %vm2402_vm2, %v2239_v15  ;;  %v1553_v57 = vrot.slane %v3454_v60, 1  ;;  %v3503_v32 = vperm.slane %v1556_v61, 0 }
 0x161   : > { %1189 = vmatmul.f32.gmra.mxu3 %v3883_v47  ;;  %1495 = vmatmul.f32.gmra.mxu1 %v3884_v33  ;;  %v902_v58 = vadd.f32 %v901_v59, %v746_v39  ;;  %v754_v39 = vadd.f32 %v3179_v48, %v520_v5  ;;  %v3507_v59 = vperm.slane %v1557_v27, 0 }
 0x162   : > { %v1776_v51 = vrot.slane %v1425_v55, 2  ;;  %v1777_v54 = vrot.slane %v1425_v55, 4  ;;  %v1778_v1 = vrot.slane %v1425_v55, 6  ;;  %v1975_v44 = vadd.f32 %v3408_v8, %v1425_v55 }
 0x163   : > { %v1286_v41 = vpop.f32.mrf.mxu0  ;;  %v1089_v34 = vadd.f32 %v1088_v37, %v902_v58  ;;  %v1559_v37 = vrot.slane %v3454_v60, 7  ;;  %v3888_v58 = vld [vmem:[#allocation8_spill] sm:$0xff] }
 0x164   : > { %v1094_v46 = vpop.f32.mrf.mxu3  ;;  %v1976_v40 = vadd.f32 %v1776_v51, %v3412_v42  ;;  %v1977_v6 = vadd.f32 %v1777_v54, %v3414_v49  ;;  %v1978_v22 = vadd.f32 %v1778_v1, %v3416_v52  ;;  %2244 = vst [vmem:[#allocation1 + $0x20] ss:$4 sm:$0xff] %v1975_v44  ;;  %v3476_v42 = vperm.slane %v1553_v57, 0  ;;  %v3890_v54 = vld [vmem:[#allocation7_spill] sm:$0xff] }
 0x165   : > { %v1283_v8 = vadd.f32 %v1282_v12, %v1089_v34  ;;  %985 = vmatmul.f32.gmra.mxu2 %v3882_v3  ;;  %v3478_v49 = vperm.slane %v1554_v0, 0  ;;  %v3480_v52 = vperm.slane %v1555_v53, 0  ;;  %v3509_v3 = vperm.slane %v1558_v20, 0 }
 0x166   : > { %1349 = vmatmul.f32.gmra.mxu0 %v3884_v33  ;;  %v3473_v43 = vpop.f32.mrf.mxu1  ;;  %v2248_v25 = vld.sshfl [vmem:[#allocation1] sm:$0xff pattern:$0x73625140]  ;;  %2245 = vst [vmem:[#allocation1 + $0x21] ss:$4 sm:$0xff] %v1976_v40  ;;  %v3511_v47 = vperm.slane %v1559_v37, 0  ;;  %v528_v53 = vadd.f32 %v3068_v36, %v3197_v2 }
 0x167   : > { %2246 = vst [vmem:[#allocation1 + $0x22] ss:$4 sm:$0xff] %v1977_v6  ;;  %v1429_v56 = vadd.f32 %v3431_v24, %v1283_v8  ;;  %v3889_v51 = vand.u32 4294901760, %v3888_v58 }
 0x168   : > { %2247 = vst [vmem:[#allocation1 + $0x23] ss:$4 sm:$0xff] %v1978_v22  ;;  %v906_v10 = vpop.f32.mrf.mxu2 }
 0x169   : > { %1195 = vmatmul.f32.gmra.mxu3 %v3886_v7  ;;  %1499 = vmatmul.f32.gmra.mxu1 %v3887_v19  ;;  %v1779_v23 = vrot.slane %v1429_v56, 2  ;;  %v1780_v16 = vrot.slane %v1429_v56, 4  ;;  %v1781_v18 = vrot.slane %v1429_v56, 6  ;;  %v1979_v24 = vadd.f32 %v1611_v9, %v1429_v56  ;;  %2409 = vst.msk [vmem:[%s3336_s7 + $0x30] sm:$0xff] %vm2402_vm2, %v2248_v25 }
 0x16a   : > { %v907_v11 = vadd.f32 %v906_v10, %v750_v31  ;;  %v758_v25 = vadd.f32 %v3191_v38, %v528_v53  ;;  %v3891_v31 = vld [vmem:[#allocation10_spill] sm:$0xff]  ;;  %v536_v38 = vadd.f32 %v3068_v36, %v3209_v35 }
 0x16b   : > { %v1290_v50 = vpop.f32.mrf.mxu0  ;;  %v1980_v62 = vadd.f32 %v1779_v23, %v3476_v42  ;;  %v1981_v29 = vadd.f32 %v1780_v16, %v3478_v49  ;;  %v1982_v12 = vadd.f32 %v1781_v18, %v3480_v52  ;;  %2250 = vst [vmem:[#allocation1] ss:$4 sm:$0xff] %v1979_v24  ;;  %v3892_v10 = vand.u32 4294901760, %v3891_v31 }
 0x16c   : > { %v1100_v17 = vpop.f32.mrf.mxu3  ;;  %v1095_v28 = vadd.f32 %v1094_v46, %v907_v11  ;;  %v762_v35 = vadd.f32 %v3203_v26, %v536_v38 }
 0x16d   : > { %2251 = vst [vmem:[#allocation1 + $0x1] ss:$4 sm:$0xff] %v1980_v62  ;;  %990 = vmatmul.f32.gmra.mxu2 %v3885_v30  ;;  %v3893_v30 = vld [vmem:[#allocation9_spill] sm:$0xff]  ;;  %v3894_v62 = vand.u32 4294901760, %v2988_v14 }
 0x16e   : > { %1353 = vmatmul.f32.gmra.mxu0 %v3887_v19  ;;  %v3501_v21 = vpop.f32.mrf.mxu1  ;;  %2252 = vst [vmem:[#allocation1 + $0x2] ss:$4 sm:$0xff] %v1981_v29  ;;  %v1287_v13 = vadd.f32 %v1286_v41, %v1095_v28  ;;  %v3895_v29 = vld [vmem:[#allocation11_spill] sm:$0xff] }
 0x16f   : > { %v2249_v15 = vld.sshfl [vmem:[#allocation1 + $0x20] sm:$0xff pattern:$0x73625140]  ;;  %2253 = vst [vmem:[#allocation1 + $0x3] ss:$4 sm:$0xff] %v1982_v12 }
 0x170   : > { %v1433_v55 = vadd.f32 %v3449_v63, %v1287_v13  ;;  %v911_v33 = vpop.f32.mrf.mxu2  ;;  %2410 = vst.msk [vmem:[%s3336_s7 + $0x38] sm:$0xff] %vm2402_vm2, %v2249_v15 }
 0x171   : > { %1201 = vmatmul.f32.gmra.mxu3 %v3889_v51  ;;  %1503 = vmatmul.f32.gmra.mxu1 %v3890_v54  ;;  %v912_v1 = vadd.f32 %v911_v33, %v754_v39 }
 0x172   : > { %v1782_v48 = vrot.slane %v1433_v55, 2  ;;  %v1783_v44 = vrot.slane %v1433_v55, 4  ;;  %v1784_v41 = vrot.slane %v1433_v55, 6  ;;  %v1983_v63 = vadd.f32 %v3503_v32, %v1433_v55  ;;  %v3563_v55 = vld [vmem:[%s3759_s3] ss:$0 sm:$0xff] }
 0x173   : > { %v1294_v34 = vpop.f32.mrf.mxu0  ;;  %v1101_v57 = vadd.f32 %v1100_v17, %v912_v1  ;;  %v544_v33 = vadd.f32 %v3563_v55, %v3221_v45 }
 0x174   : > { %v1106_v0 = vpop.f32.mrf.mxu3  ;;  %v1984_v46 = vadd.f32 %v1782_v48, %v3507_v59  ;;  %v1985_v4 = vadd.f32 %v1783_v44, %v3509_v3  ;;  %v1986_v40 = vadd.f32 %v1784_v41, %v3511_v47  ;;  %2254 = vst [vmem:[#allocation1 + $0x20] ss:$4 sm:$0xff] %v1983_v63  ;;  %v3896_v41 = vld [vmem:[#allocation28_spill] sm:$0xff] }
 0x175   : > { %v1291_v6 = vadd.f32 %v1290_v50, %v1101_v57  ;;  %995 = vmatmul.f32.gmra.mxu2 %v3888_v58 }
 0x176   : > { %1357 = vmatmul.f32.gmra.mxu0 %v3890_v54  ;;  %v3526_v22 = vpop.f32.mrf.mxu1  ;;  %v2258_v8 = vld.sshfl [vmem:[#allocation1] sm:$0xff pattern:$0x73625140]  ;;  %2255 = vst [vmem:[#allocation1 + $0x21] ss:$4 sm:$0xff] %v1984_v46 }
 0x177   : > { %2256 = vst [vmem:[#allocation1 + $0x22] ss:$4 sm:$0xff] %v1985_v4  ;;  %v1437_v2 = vadd.f32 %v3473_v43, %v1291_v6 }
 0x178   : > { %2257 = vst [vmem:[#allocation1 + $0x23] ss:$4 sm:$0xff] %v1986_v40  ;;  %v916_v56 = vpop.f32.mrf.mxu2 }
 0x179   : > { %1207 = vmatmul.f32.gmra.mxu3 %v3892_v10  ;;  %1507 = vmatmul.f32.gmra.mxu1 %v3893_v30  ;;  %v1785_v7 = vrot.slane %v1437_v2, 2  ;;  %v1786_v19 = vrot.slane %v1437_v2, 4  ;;  %v1787_v23 = vrot.slane %v1437_v2, 6  ;;  %v1987_v16 = vadd.f32 %v1611_v9, %v1437_v2  ;;  %2411 = vst.msk [vmem:[%s3336_s7 + $0x40] sm:$0xff] %vm2402_vm2, %v2258_v8  ;;  %v3900_v2 = vld [vmem:[#allocation31_spill] sm:$0xff] }
 0x17a   : > { %v917_v18 = vadd.f32 %v916_v56, %v758_v25  ;;  %v552_v25 = vadd.f32 %v3563_v55, %v3900_v2 }
 0x17b   : > { %v1298_v24 = vpop.f32.mrf.mxu0  ;;  %v1988_v43 = vadd.f32 %v1785_v7, %v3476_v42  ;;  %v1989_v11 = vadd.f32 %v1786_v19, %v3478_v49  ;;  %v1990_v61 = vadd.f32 %v1787_v23, %v3480_v52  ;;  %2260 = vst [vmem:[#allocation1] ss:$4 sm:$0xff] %v1987_v16  ;;  %v3549_v52 = vld [vmem:[%s3264_s30 + $0x18] sm:$0xff] }
 0x17c   : > { %v1112_v50 = vpop.f32.mrf.mxu3  ;;  %v1107_v5 = vadd.f32 %v1106_v0, %v917_v18  ;;  %v1561_v13 = vrot.slane %v3549_v52, 2  ;;  %v1562_v39 = vrot.slane %v3549_v52, 3  ;;  %v1619_v1 = vperm.slane %v3549_v52, 0  ;;  %v3899_v0 = vld [vmem:[#allocation12_spill] sm:$0xff] }
 0x17d   : > { %2261 = vst [vmem:[#allocation1 + $0x1] ss:$4 sm:$0xff] %v1988_v43  ;;  %1000 = vmatmul.f32.gmra.mxu2 %v3891_v31  ;;  %v1564_v19 = vrot.slane %v3549_v52, 5  ;;  %v1565_v23 = vrot.slane %v3549_v52, 6  ;;  %v1566_v16 = vrot.slane %v3549_v52, 7  ;;  %v3901_v43 = vld [vmem:[#allocation30_spill] sm:$0xff] }
 0x17e   : > { %1361 = vmatmul.f32.gmra.mxu0 %v3893_v30  ;;  %v3544_v60 = vpop.f32.mrf.mxu1  ;;  %2262 = vst [vmem:[#allocation1 + $0x2] ss:$4 sm:$0xff] %v1989_v11  ;;  %v1295_v36 = vadd.f32 %v1294_v34, %v1107_v5  ;;  %v3897_v34 = vld [vmem:[#allocation13_spill] sm:$0xff]  ;;  %v770_v11 = vadd.f32 %v3901_v43, %v552_v25 }
 0x17f   : > { %v2259_v9 = vld.sshfl [vmem:[#allocation1 + $0x20] sm:$0xff pattern:$0x73625140]  ;;  %2263 = vst [vmem:[#allocation1 + $0x3] ss:$4 sm:$0xff] %v1990_v61  ;;  %v3898_v57 = vand.u32 4294901760, %v3897_v34 }
 0x180   : > { %v1441_v42 = vadd.f32 %v3501_v21, %v1295_v36  ;;  %v921_v49 = vpop.f32.mrf.mxu2  ;;  %2412 = vst.msk [vmem:[%s3336_s7 + $0x48] sm:$0xff] %vm2402_vm2, %v2259_v9  ;;  %v1560_v21 = vrot.slane %v3549_v52, 1  ;;  %v3607_v5 = vperm.slane %v1564_v19, 0  ;;  %v3609_v36 = vperm.slane %v1565_v23, 0  ;;  %v3902_v9 = vld [vmem:[#allocation15_spill] sm:$0xff] }
 0x181   : > { %1213 = vmatmul.f32.gmra.mxu3 %v3894_v62  ;;  %1511 = vmatmul.f32.gmra.mxu1 %v3895_v29  ;;  %v922_v12 = vadd.f32 %v921_v49, %v762_v35  ;;  %v3904_v49 = vld [vmem:[#allocation14_spill] sm:$0xff]  ;;  %v1626_v62 = vperm.slane %v1566_v16, 0 }
 0x182   : > { %v1788_v17 = vrot.slane %v1441_v42, 2  ;;  %v1789_v28 = vrot.slane %v1441_v42, 4  ;;  %v1790_v27 = vrot.slane %v1441_v42, 6  ;;  %v1991_v26 = vadd.f32 %v3503_v32, %v1441_v42 }
 0x183   : > { %v1302_v20 = vpop.f32.mrf.mxu0  ;;  %v1113_v37 = vadd.f32 %v1112_v50, %v922_v12  ;;  %v3903_v42 = vand.u32 4294901760, %v3902_v9 }
 0x184   : > { %v1118_v15 = vpop.f32.mrf.mxu3  ;;  %v1992_v58 = vadd.f32 %v1788_v17, %v3507_v59  ;;  %v1993_v32 = vadd.f32 %v1789_v28, %v3509_v3  ;;  %v1994_v51 = vadd.f32 %v1790_v27, %v3511_v47  ;;  %2264 = vst [vmem:[#allocation1 + $0x20] ss:$4 sm:$0xff] %v1991_v26  ;;  %v3576_v59 = vperm.slane %v1560_v21, 0 }
 0x185   : > { %v1299_v54 = vadd.f32 %v1298_v24, %v1113_v37  ;;  %1005 = vmatmul.f32.gmra.mxu2 %v2988_v14  ;;  %v3578_v3 = vperm.slane %v1561_v13, 0  ;;  %v3580_v47 = vperm.slane %v1562_v39, 0  ;;  %v766_v14 = vadd.f32 %v3896_v41, %v544_v33  ;;  %v3905_v37 = vld [vmem:[#allocation34_spill] sm:$0xff] }
 0x186   : > { %1365 = vmatmul.f32.gmra.mxu0 %v3895_v29  ;;  %v3573_v48 = vpop.f32.mrf.mxu1  ;;  %v2268_v44 = vld.sshfl [vmem:[#allocation1] sm:$0xff pattern:$0x73625140]  ;;  %2265 = vst [vmem:[#allocation1 + $0x21] ss:$4 sm:$0xff] %v1992_v58  ;;  %v560_v21 = vadd.f32 %v3563_v55, %v3905_v37 }
 0x187   : > { %2266 = vst [vmem:[#allocation1 + $0x22] ss:$4 sm:$0xff] %v1993_v32  ;;  %v1445_v45 = vadd.f32 %v3526_v22, %v1299_v54  ;;  %v1563_v22 = vrot.slane %v3549_v52, 4  ;;  %v3906_v54 = vld [vmem:[#allocation33_spill] sm:$0xff] }
 0x188   : > { %2267 = vst [vmem:[#allocation1 + $0x23] ss:$4 sm:$0xff] %v1994_v51  ;;  %v926_v63 = vpop.f32.mrf.mxu2  ;;  %v774_v55 = vadd.f32 %v3906_v54, %v560_v21 }
 0x189   : > { %1219 = vmatmul.f32.gmra.mxu3 %v3898_v57  ;;  %1515 = vmatmul.f32.gmra.mxu1 %v3899_v0  ;;  %v1791_v53 = vrot.slane %v1445_v45, 2  ;;  %v1792_v46 = vrot.slane %v1445_v45, 4  ;;  %v1793_v4 = vrot.slane %v1445_v45, 6  ;;  %v1995_v40 = vadd.f32 %v1619_v1, %v1445_v45  ;;  %2413 = vst.msk [vmem:[%s3336_s7 + $0x50] sm:$0xff] %vm2402_vm2, %v2268_v44 }
 0x18a   : > { %v927_v6 = vadd.f32 %v926_v63, %v766_v14  ;;  %v3601_v38 = vperm.slane %v1563_v22, 0 }
 0x18b   : > { %v1306_v8 = vpop.f32.mrf.mxu0  ;;  %v1996_v56 = vadd.f32 %v1791_v53, %v3576_v59  ;;  %v1997_v31 = vadd.f32 %v1792_v46, %v3578_v3  ;;  %v1998_v10 = vadd.f32 %v1793_v4, %v3580_v47  ;;  %2270 = vst [vmem:[#allocation1] ss:$4 sm:$0xff] %v1995_v40 }
 0x18c   : > { %v1124_v30 = vpop.f32.mrf.mxu3  ;;  %v1119_v7 = vadd.f32 %v1118_v15, %v927_v6 }
 0x18d   : > { %2271 = vst [vmem:[#allocation1 + $0x1] ss:$4 sm:$0xff] %v1996_v56  ;;  %1010 = vmatmul.f32.gmra.mxu2 %v3897_v34 }
 0x18e   : > { %1369 = vmatmul.f32.gmra.mxu0 %v3899_v0  ;;  %v1456_v18 = vpop.f32.mrf.mxu1  ;;  %2272 = vst [vmem:[#allocation1 + $0x2] ss:$4 sm:$0xff] %v1997_v31  ;;  %v1303_v24 = vadd.f32 %v1302_v20, %v1119_v7 }
 0x18f   : > { %v2269_v61 = vld.sshfl [vmem:[#allocation1 + $0x20] sm:$0xff pattern:$0x73625140]  ;;  %2273 = vst [vmem:[#allocation1 + $0x3] ss:$4 sm:$0xff] %v1998_v10 }
 0x190   : > { %2414 = vst.msk [vmem:[%s3336_s7 + $0x58] sm:$0xff] %vm2402_vm2, %v2269_v61  ;;  %v1449_v50 = vadd.f32 %v3544_v60, %v1303_v24  ;;  %v931_v35 = vpop.f32.mrf.mxu2 }
 0x191   : > { %1225 = vmatmul.f32.gmra.mxu3 %v3903_v42  ;;  %1519 = vmatmul.f32.gmra.mxu1 %v3904_v49  ;;  %v932_v29 = vadd.f32 %v931_v35, %v770_v11 }
 0x192   : > { %v1794_v12 = vrot.slane %v1449_v50, 2  ;;  %v1795_v17 = vrot.slane %v1449_v50, 4  ;;  %v1796_v28 = vrot.slane %v1449_v50, 6  ;;  %v1999_v27 = vadd.f32 %v3601_v38, %v1449_v50 }
 0x193   : > { %v1310_v26 = vpop.f32.mrf.mxu0  ;;  %v1125_v60 = vadd.f32 %v1124_v30, %v932_v29 }
 0x194   : > { %v1130_v20 = vpop.f32.mrf.mxu3  ;;  %v2000_v13 = vadd.f32 %v1794_v12, %v3607_v5  ;;  %v2001_v39 = vadd.f32 %v1795_v17, %v3609_v36  ;;  %2274 = vst [vmem:[#allocation1 + $0x20] ss:$4 sm:$0xff] %v1999_v27  ;;  %v2002_v15 = vadd.f32 %v1796_v28, %v1626_v62  ;;  %v3908_v12 = vld [vmem:[#allocation17_spill] sm:$0xff] }
 0x195   : > { %v1307_v33 = vadd.f32 %v1306_v8, %v1125_v60  ;;  %1015 = vmatmul.f32.gmra.mxu2 %v3902_v9  ;;  %v3631_v8 = vld [vmem:[%s3264_s30 + $0x20] sm:$0xff] }
 0x196   : > { %1373 = vmatmul.f32.gmra.mxu0 %v3904_v49  ;;  %v1460_v58 = vpop.f32.mrf.mxu1  ;;  %v2278_v32 = vld.sshfl [vmem:[#allocation1] sm:$0xff pattern:$0x73625140]  ;;  %2275 = vst [vmem:[#allocation1 + $0x21] ss:$4 sm:$0xff] %v2000_v13  ;;  %v1567_v30 = vrot.slane %v3631_v8, 1 }
 0x197   : > { %2415 = vst.msk [vmem:[%s3336_s7 + $0x60] sm:$0xff] %vm2402_vm2, %v2278_v32  ;;  %v1453_v51 = vadd.f32 %v3573_v48, %v1307_v33  ;;  %v1568_v7 = vrot.slane %v3631_v8, 2  ;;  %v1569_v19 = vrot.slane %v3631_v8, 3  ;;  %v1627_v11 = vperm.slane %v3631_v8, 0 }
 0x198   : > { %2276 = vst [vmem:[#allocation1 + $0x22] ss:$4 sm:$0xff] %v2001_v39  ;;  %v936_v44 = vpop.f32.mrf.mxu2  ;;  %v1628_v35 = vperm.slane %v1567_v30, 0  ;;  %v1570_v28 = vrot.slane %v3631_v8, 4  ;;  %v1571_v13 = vrot.slane %v3631_v8, 5  ;;  %v1572_v39 = vrot.slane %v3631_v8, 6 }
 0x199   : > { %2277 = vst [vmem:[#allocation1 + $0x23] ss:$4 sm:$0xff] %v2002_v15  ;;  %v1797_v45 = vrot.slane %v1453_v51, 2  ;;  %v1798_v41 = vrot.slane %v1453_v51, 4  ;;  %v1799_v14 = vrot.slane %v1453_v51, 6  ;;  %v2003_v63 = vadd.f32 %v1619_v1, %v1453_v51 }
 0x19a   : > { %v937_v34 = vadd.f32 %v936_v44, %v774_v55  ;;  %v1629_v9 = vperm.slane %v1568_v7, 0  ;;  %v1630_v42 = vperm.slane %v1569_v19, 0  ;;  %v1573_v15 = vrot.slane %v3631_v8, 7 }
 0x19b   : > { %v1314_v57 = vpop.f32.mrf.mxu0  ;;  %v2004_v0 = vadd.f32 %v1797_v45, %v3576_v59  ;;  %v2005_v53 = vadd.f32 %v1798_v41, %v3578_v3  ;;  %v2006_v48 = vadd.f32 %v1799_v14, %v3580_v47  ;;  %2280 = vst [vmem:[#allocation1] ss:$4 sm:$0xff] %v2003_v63  ;;  %v3907_v59 = vld [vmem:[#allocation16_spill] sm:$0xff]  ;;  %v1631_v32 = vperm.slane %v1570_v28, 0  ;;  %v3909_v14 = vld [vmem:[#allocation18_spill] sm:$0xff] }
 0x19c   : > { %v1136_v46 = vpop.f32.mrf.mxu3  ;;  %v1131_v4 = vadd.f32 %v1130_v20, %v937_v34  ;;  %v1632_v55 = vperm.slane %v1571_v13, 0  ;;  %v1633_v44 = vperm.slane %v1572_v39, 0  ;;  %v1634_v41 = vperm.slane %v1573_v15, 0 }
 0x19d   : > { %2281 = vst [vmem:[#allocation1 + $0x1] ss:$4 sm:$0xff] %v2004_v0 }
 0x19e   : > { %v1464_v40 = vpop.f32.mrf.mxu1  ;;  %2282 = vst [vmem:[#allocation1 + $0x2] ss:$4 sm:$0xff] %v2005_v53  ;;  %v1311_v6 = vadd.f32 %v1310_v26, %v1131_v4 }
 0x19f   : > { %2283 = vst [vmem:[#allocation1 + $0x3] ss:$4 sm:$0xff] %v2006_v48 }
 0x1a0   : > { %v2279_v52 = vld.sshfl [vmem:[#allocation1 + $0x20] sm:$0xff pattern:$0x73625140]  ;;  %v1457_v1 = vadd.f32 %v1456_v18, %v1311_v6  ;;  %v941_v22 = vpop.f32.mrf.mxu2 }
 0x1a1   : > { %2416 = vst.msk [vmem:[%s3336_s7 + $0x68] sm:$0xff] %vm2402_vm2, %v2279_v52  ;;  %v942_v2 = vadd.f32 %v941_v22, %v3907_v59 }
 0x1a2   : > { %v1800_v3 = vrot.slane %v1457_v1, 2  ;;  %v1801_v25 = vrot.slane %v1457_v1, 4  ;;  %v1802_v47 = vrot.slane %v1457_v1, 6  ;;  %v2007_v56 = vadd.f32 %v3601_v38, %v1457_v1 }
 0x1a3   : > { %v1318_v31 = vpop.f32.mrf.mxu0  ;;  %v1137_v10 = vadd.f32 %v1136_v46, %v942_v2 }
 0x1a4   : > { %v1142_v23 = vpop.f32.mrf.mxu3  ;;  %v2008_v16 = vadd.f32 %v1800_v3, %v3607_v5  ;;  %v2009_v18 = vadd.f32 %v1801_v25, %v3609_v36  ;;  %2284 = vst [vmem:[#allocation1 + $0x20] ss:$4 sm:$0xff] %v2007_v56  ;;  %v2010_v24 = vadd.f32 %v1802_v47, %v1626_v62 }
 0x1a5   : > { %v1315_v43 = vadd.f32 %v1314_v57, %v1137_v10  ;;  %v3910_v10 = vld [vmem:[#allocation19_spill] sm:$0xff] }
 0x1a6   : > { %v1468_v38 = vpop.f32.mrf.mxu1  ;;  %v2288_v61 = vld.sshfl [vmem:[#allocation1] sm:$0xff pattern:$0x73625140]  ;;  %2285 = vst [vmem:[#allocation1 + $0x21] ss:$4 sm:$0xff] %v2008_v16 }
 0x1a7   : > { %2417 = vst.msk [vmem:[%s3336_s7 + $0x70] sm:$0xff] %vm2402_vm2, %v2288_v61  ;;  %v1461_v50 = vadd.f32 %v1460_v58, %v1315_v43 }
 0x1a8   : > { %2286 = vst [vmem:[#allocation1 + $0x22] ss:$4 sm:$0xff] %v2009_v18  ;;  %v946_v49 = vpop.f32.mrf.mxu2 }
 0x1a9   : > { %2287 = vst [vmem:[#allocation1 + $0x23] ss:$4 sm:$0xff] %v2010_v24  ;;  %v1803_v5 = vrot.slane %v1461_v50, 2  ;;  %v1804_v29 = vrot.slane %v1461_v50, 4  ;;  %v1805_v36 = vrot.slane %v1461_v50, 6  ;;  %v2011_v62 = vadd.f32 %v1627_v11, %v1461_v50 }
 0x1aa   : > { %v947_v17 = vadd.f32 %v946_v49, %v3908_v12  ;;  %v3911_v49 = vld [vmem:[#allocation20_spill] sm:$0xff] }
 0x1ab   : > { %v1322_v27 = vpop.f32.mrf.mxu0  ;;  %v2012_v26 = vadd.f32 %v1803_v5, %v1628_v35  ;;  %v2013_v60 = vadd.f32 %v1804_v29, %v1629_v9  ;;  %v2014_v20 = vadd.f32 %v1805_v36, %v1630_v42  ;;  %2290 = vst [vmem:[#allocation1] ss:$4 sm:$0xff] %v2011_v62 }
 0x1ac   : > { %v1148_v37 = vpop.f32.mrf.mxu3  ;;  %v1143_v21 = vadd.f32 %v1142_v23, %v947_v17 }
 0x1ad   : > { %2291 = vst [vmem:[#allocation1 + $0x1] ss:$4 sm:$0xff] %v2012_v26 }
 0x1ae   : > { %v1472_v33 = vpop.f32.mrf.mxu1  ;;  %2292 = vst [vmem:[#allocation1 + $0x2] ss:$4 sm:$0xff] %v2013_v60  ;;  %v1319_v58 = vadd.f32 %v1318_v31, %v1143_v21 }
 0x1af   : > { %2293 = vst [vmem:[#allocation1 + $0x3] ss:$4 sm:$0xff] %v2014_v20 }
 0x1b0   : > { %v2289_v51 = vld.sshfl [vmem:[#allocation1 + $0x20] sm:$0xff pattern:$0x73625140]  ;;  %v1465_v54 = vadd.f32 %v1464_v40, %v1319_v58  ;;  %v951_v45 = vpop.f32.mrf.mxu2 }
 0x1b1   : > { %2418 = vst.msk [vmem:[%s3336_s7 + $0x78] sm:$0xff] %vm2402_vm2, %v2289_v51  ;;  %v952_v63 = vadd.f32 %v951_v45, %v3909_v14 }
 0x1b2   : > { %v1806_v34 = vrot.slane %v1465_v54, 2  ;;  %v1807_v57 = vrot.slane %v1465_v54, 4  ;;  %v1808_v0 = vrot.slane %v1465_v54, 6  ;;  %v2015_v53 = vadd.f32 %v1631_v32, %v1465_v54 }
 0x1b3   : > { %v1326_v48 = vpop.f32.mrf.mxu0  ;;  %v1149_v46 = vadd.f32 %v1148_v37, %v952_v63 }
 0x1b4   : > { %v1154_v4 = vpop.f32.mrf.mxu3  ;;  %v2016_v6 = vadd.f32 %v1806_v34, %v1632_v55  ;;  %v2017_v52 = vadd.f32 %v1807_v57, %v1633_v44  ;;  %2294 = vst [vmem:[#allocation1 + $0x20] ss:$4 sm:$0xff] %v2015_v53  ;;  %v2018_v40 = vadd.f32 %v1808_v0, %v1634_v41 }
 0x1b5   : > { %v1323_v1 = vadd.f32 %v1322_v27, %v1149_v46 }
 0x1b6   : > { %v1476_v22 = vpop.f32.mrf.mxu1  ;;  %v2298_v59 = vld.sshfl [vmem:[#allocation1] sm:$0xff pattern:$0x73625140]  ;;  %2295 = vst [vmem:[#allocation1 + $0x21] ss:$4 sm:$0xff] %v2016_v6 }
 0x1b7   : > { %2419 = vst.msk [vmem:[%s3336_s7 + $0x80] sm:$0xff] %vm2402_vm2, %v2298_v59  ;;  %v1469_v2 = vadd.f32 %v1468_v38, %v1323_v1 }
 0x1b8   : > { %2296 = vst [vmem:[#allocation1 + $0x22] ss:$4 sm:$0xff] %v2017_v52  ;;  %v956_v3 = vpop.f32.mrf.mxu2 }
 0x1b9   : > { %2297 = vst [vmem:[#allocation1 + $0x23] ss:$4 sm:$0xff] %v2018_v40  ;;  %v1809_v25 = vrot.slane %v1469_v2, 2  ;;  %v1810_v47 = vrot.slane %v1469_v2, 4  ;;  %v1811_v56 = vrot.slane %v1469_v2, 6  ;;  %v2019_v31 = vadd.f32 %v1627_v11, %v1469_v2  ;;  %v3661_v11 = vld [vmem:[%s3264_s30 + $0x28] sm:$0xff] }
 0x1ba   : > { %v957_v30 = vadd.f32 %v956_v3, %v3910_v10  ;;  %v1574_v12 = vrot.slane %v3661_v11, 1  ;;  %v1575_v17 = vrot.slane %v3661_v11, 2  ;;  %v1576_v28 = vrot.slane %v3661_v11, 3 }
 0x1bb   : > { %v1330_v7 = vpop.f32.mrf.mxu0  ;;  %v2020_v19 = vadd.f32 %v1809_v25, %v1628_v35  ;;  %v2021_v23 = vadd.f32 %v1810_v47, %v1629_v9  ;;  %v2022_v16 = vadd.f32 %v1811_v56, %v1630_v42  ;;  %2300 = vst [vmem:[#allocation1] ss:$4 sm:$0xff] %v2019_v31  ;;  %v1635_v21 = vperm.slane %v3661_v11, 0  ;;  %v3913_v31 = vld [vmem:[#allocation22_spill] sm:$0xff] }
 0x1bc   : > { %v1160_v18 = vpop.f32.mrf.mxu3  ;;  %v1155_v24 = vadd.f32 %v1154_v4, %v957_v30  ;;  %v1637_v58 = vperm.slane %v1575_v17, 0  ;;  %v1577_v63 = vrot.slane %v3661_v11, 4  ;;  %v1578_v4 = vrot.slane %v3661_v11, 5 }
 0x1bd   : > { %2301 = vst [vmem:[#allocation1 + $0x1] ss:$4 sm:$0xff] %v2020_v19  ;;  %v1579_v6 = vrot.slane %v3661_v11, 6  ;;  %v1580_v52 = vrot.slane %v3661_v11, 7  ;;  %v3688_v11 = vld [vmem:[%s3264_s30 + $0x30] sm:$0xff] }
 0x1be   : > { %v1480_v43 = vpop.f32.mrf.mxu1  ;;  %2302 = vst [vmem:[#allocation1 + $0x2] ss:$4 sm:$0xff] %v2021_v23  ;;  %v1327_v38 = vadd.f32 %v1326_v48, %v1155_v24  ;;  %v1640_v3 = vperm.slane %v1578_v4, 0 }
 0x1bf   : > { %2303 = vst [vmem:[#allocation1 + $0x3] ss:$4 sm:$0xff] %v2022_v16  ;;  %v1641_v25 = vperm.slane %v1579_v6, 0  ;;  %v1642_v56 = vperm.slane %v1580_v52, 0 }
 0x1c0   : > { %v2299_v61 = vld.sshfl [vmem:[#allocation1 + $0x20] sm:$0xff pattern:$0x73625140]  ;;  %v1473_v50 = vadd.f32 %v1472_v33, %v1327_v38  ;;  %v961_v8 = vpop.f32.mrf.mxu2  ;;  %v1636_v33 = vperm.slane %v1574_v12, 0 }
 0x1c1   : > { %2420 = vst.msk [vmem:[%s3336_s7 + $0x88] sm:$0xff] %vm2402_vm2, %v2299_v61  ;;  %v962_v5 = vadd.f32 %v961_v8, %v3911_v49 }
 0x1c2   : > { %v1812_v35 = vrot.slane %v1473_v50, 2  ;;  %v1813_v9 = vrot.slane %v1473_v50, 4  ;;  %v1814_v42 = vrot.slane %v1473_v50, 6  ;;  %v2023_v29 = vadd.f32 %v1631_v32, %v1473_v50 }
 0x1c3   : > { %v1334_v36 = vpop.f32.mrf.mxu0  ;;  %v1161_v62 = vadd.f32 %v1160_v18, %v962_v5  ;;  %v1638_v32 = vperm.slane %v1576_v28, 0 }
 0x1c4   : > { %v1166_v27 = vpop.f32.mrf.mxu3  ;;  %v2024_v26 = vadd.f32 %v1812_v35, %v1632_v55  ;;  %v2025_v60 = vadd.f32 %v1813_v9, %v1633_v44  ;;  %2304 = vst [vmem:[#allocation1 + $0x20] ss:$4 sm:$0xff] %v2023_v29  ;;  %v2026_v20 = vadd.f32 %v1814_v42, %v1634_v41  ;;  %v3912_v41 = vld [vmem:[#allocation21_spill] sm:$0xff] }
 0x1c5   : > { %v1331_v37 = vadd.f32 %v1330_v7, %v1161_v62  ;;  %v3914_v62 = vld [vmem:[#allocation23_spill] sm:$0xff] }
 0x1c6   : > { %v1484_v13 = vpop.f32.mrf.mxu1  ;;  %v2308_v39 = vld.sshfl [vmem:[#allocation1] sm:$0xff pattern:$0x73625140]  ;;  %2305 = vst [vmem:[#allocation1 + $0x21] ss:$4 sm:$0xff] %v2024_v26 }
 0x1c7   : > { %2421 = vst.msk [vmem:[%s3336_s7 + $0x90] sm:$0xff] %vm2402_vm2, %v2308_v39  ;;  %v1477_v15 = vadd.f32 %v1476_v22, %v1331_v37  ;;  %v1639_v22 = vperm.slane %v1577_v63, 0  ;;  %v1583_v63 = vrot.slane %v3688_v11, 3 }
 0x1c8   : > { %2306 = vst [vmem:[#allocation1 + $0x22] ss:$4 sm:$0xff] %v2025_v60  ;;  %v966_v51 = vpop.f32.mrf.mxu2 }
 0x1c9   : > { %2307 = vst [vmem:[#allocation1 + $0x23] ss:$4 sm:$0xff] %v2026_v20  ;;  %v1815_v54 = vrot.slane %v1477_v15, 2  ;;  %v1816_v55 = vrot.slane %v1477_v15, 4  ;;  %v1817_v44 = vrot.slane %v1477_v15, 6  ;;  %v2027_v45 = vadd.f32 %v1635_v21, %v1477_v15 }
 0x1ca   : > { %v967_v14 = vadd.f32 %v966_v51, %v3912_v41  ;;  %v1581_v41 = vrot.slane %v3688_v11, 1 }
 0x1cb   : > { %v1338_v34 = vpop.f32.mrf.mxu0  ;;  %v2028_v57 = vadd.f32 %v1815_v54, %v1636_v33  ;;  %v2029_v0 = vadd.f32 %v1816_v55, %v1637_v58  ;;  %v2030_v53 = vadd.f32 %v1817_v44, %v1638_v32  ;;  %2310 = vst [vmem:[#allocation1] ss:$4 sm:$0xff] %v2027_v45 }
 0x1cc   : > { %v1172_v48 = vpop.f32.mrf.mxu3  ;;  %v1167_v46 = vadd.f32 %v1166_v27, %v967_v14  ;;  %v1582_v14 = vrot.slane %v3688_v11, 2  ;;  %v1644_v52 = vperm.slane %v1581_v41, 0 }
 0x1cd   : > { %2311 = vst [vmem:[#allocation1 + $0x1] ss:$4 sm:$0xff] %v2028_v57 }
 0x1ce   : > { %v1488_v40 = vpop.f32.mrf.mxu1  ;;  %2312 = vst [vmem:[#allocation1 + $0x2] ss:$4 sm:$0xff] %v2029_v0  ;;  %v1335_v1 = vadd.f32 %v1334_v36, %v1167_v46  ;;  %v1643_v46 = vperm.slane %v3688_v11, 0 }
 0x1cf   : > { %2313 = vst [vmem:[#allocation1 + $0x3] ss:$4 sm:$0xff] %v2030_v53 }
 0x1d0   : > { %v2309_v59 = vld.sshfl [vmem:[#allocation1 + $0x20] sm:$0xff pattern:$0x73625140]  ;;  %v1481_v2 = vadd.f32 %v1480_v43, %v1335_v1  ;;  %v971_v47 = vpop.f32.mrf.mxu2  ;;  %v1646_v1 = vperm.slane %v1583_v63, 0 }
 0x1d1   : > { %2422 = vst.msk [vmem:[%s3336_s7 + $0x98] sm:$0xff] %vm2402_vm2, %v2309_v59  ;;  %v972_v10 = vadd.f32 %v971_v47, %v3913_v31  ;;  %v3916_v47 = vld [vmem:[#allocation25_spill] sm:$0xff]  ;;  %v1584_v31 = vrot.slane %v3688_v11, 4 }
 0x1d2   : > { %v1818_v30 = vrot.slane %v1481_v2, 2  ;;  %v1819_v7 = vrot.slane %v1481_v2, 4  ;;  %v1820_v19 = vrot.slane %v1481_v2, 6  ;;  %v2031_v23 = vadd.f32 %v1639_v22, %v1481_v2 }
 0x1d3   : > { %v1342_v16 = vpop.f32.mrf.mxu0  ;;  %v1173_v18 = vadd.f32 %v1172_v48, %v972_v10 }
 0x1d4   : > { %v1178_v24 = vpop.f32.mrf.mxu3  ;;  %v2032_v38 = vadd.f32 %v1818_v30, %v1640_v3  ;;  %v2033_v61 = vadd.f32 %v1819_v7, %v1641_v25  ;;  %2314 = vst [vmem:[#allocation1 + $0x20] ss:$4 sm:$0xff] %v2031_v23  ;;  %v2034_v43 = vadd.f32 %v1820_v19, %v1642_v56 }
 0x1d5   : > { %v1339_v50 = vadd.f32 %v1338_v34, %v1173_v18 }
 0x1d6   : > { %v2318_v8 = vld.sshfl [vmem:[#allocation1] sm:$0xff pattern:$0x73625140]  ;;  %2315 = vst [vmem:[#allocation1 + $0x21] ss:$4 sm:$0xff] %v2032_v38  ;;  %v1492_v5 = vpop.f32.mrf.mxu1  ;;  %v1586_v38 = vrot.slane %v3688_v11, 6 }
 0x1d7   : > { %2423 = vst.msk [vmem:[%s3336_s7 + $0xa0] sm:$0xff] %vm2402_vm2, %v2318_v8  ;;  %v1485_v49 = vadd.f32 %v1484_v13, %v1339_v50  ;;  %v1647_v50 = vperm.slane %v1584_v31, 0 }
 0x1d8   : > { %2316 = vst [vmem:[#allocation1 + $0x22] ss:$4 sm:$0xff] %v2033_v61  ;;  %v976_v35 = vpop.f32.mrf.mxu2  ;;  %v1587_v61 = vrot.slane %v3688_v11, 7 }
 0x1d9   : > { %2317 = vst [vmem:[#allocation1 + $0x23] ss:$4 sm:$0xff] %v2034_v43  ;;  %v1821_v9 = vrot.slane %v1485_v49, 2  ;;  %v1822_v42 = vrot.slane %v1485_v49, 4  ;;  %v1823_v29 = vrot.slane %v1485_v49, 6  ;;  %v2035_v36 = vadd.f32 %v1635_v21, %v1485_v49  ;;  %v3915_v21 = vld [vmem:[#allocation24_spill] sm:$0xff] }
 0x1da   : > { %v977_v12 = vadd.f32 %v976_v35, %v3914_v62  ;;  %v1649_v35 = vperm.slane %v1586_v38, 0 }
 0x1db   : > { %v1346_v17 = vpop.f32.mrf.mxu0  ;;  %v2036_v28 = vadd.f32 %v1821_v9, %v1636_v33  ;;  %v2037_v27 = vadd.f32 %v1822_v42, %v1637_v58  ;;  %v2038_v26 = vadd.f32 %v1823_v29, %v1638_v32  ;;  %2320 = vst [vmem:[#allocation1] ss:$4 sm:$0xff] %v2035_v36  ;;  %v1650_v42 = vperm.slane %v1587_v61, 0  ;;  %v3917_v29 = vld [vmem:[#allocation26_spill] sm:$0xff] }
 0x1dc   : > { %v1184_v60 = vpop.f32.mrf.mxu3  ;;  %v1179_v20 = vadd.f32 %v1178_v24, %v977_v12  ;;  %v1585_v24 = vrot.slane %v3688_v11, 5 }
 0x1dd   : > { %2321 = vst [vmem:[#allocation1 + $0x1] ss:$4 sm:$0xff] %v2036_v28 }
 0x1de   : > { %2322 = vst [vmem:[#allocation1 + $0x2] ss:$4 sm:$0xff] %v2037_v27  ;;  %v1343_v37 = vadd.f32 %v1342_v16, %v1179_v20  ;;  %v1496_v54 = vpop.f32.mrf.mxu1 }
 0x1df   : > { %2323 = vst [vmem:[#allocation1 + $0x3] ss:$4 sm:$0xff] %v2038_v26 }
 0x1e0   : > { %v2319_v13 = vld.sshfl [vmem:[#allocation1 + $0x20] sm:$0xff pattern:$0x73625140]  ;;  %v1489_v39 = vadd.f32 %v1488_v40, %v1343_v37  ;;  %v981_v15 = vpop.f32.mrf.mxu2  ;;  %v1645_v40 = vperm.slane %v1582_v14, 0 }
 0x1e1   : > { %2424 = vst.msk [vmem:[%s3336_s7 + $0xa8] sm:$0xff] %vm2402_vm2, %v2319_v13  ;;  %v982_v51 = vadd.f32 %v981_v15, %v3915_v21 }
 0x1e2   : > { %v1824_v33 = vrot.slane %v1489_v39, 2  ;;  %v1825_v58 = vrot.slane %v1489_v39, 4  ;;  %v1826_v32 = vrot.slane %v1489_v39, 6  ;;  %v2039_v55 = vadd.f32 %v1639_v22, %v1489_v39 }
 0x1e3   : > { %v1350_v44 = vpop.f32.mrf.mxu0  ;;  %v1185_v45 = vadd.f32 %v1184_v60, %v982_v51 }
 0x1e4   : > { %v1190_v34 = vpop.f32.mrf.mxu3  ;;  %v2040_v57 = vadd.f32 %v1824_v33, %v1640_v3  ;;  %v2041_v0 = vadd.f32 %v1825_v58, %v1641_v25  ;;  %2324 = vst [vmem:[#allocation1 + $0x20] ss:$4 sm:$0xff] %v2039_v55  ;;  %v2042_v53 = vadd.f32 %v1826_v32, %v1642_v56 }
 0x1e5   : > { %v1347_v48 = vadd.f32 %v1346_v17, %v1185_v45 }
 0x1e6   : > { %v2328_v4 = vld.sshfl [vmem:[#allocation1] sm:$0xff pattern:$0x73625140]  ;;  %2325 = vst [vmem:[#allocation1 + $0x21] ss:$4 sm:$0xff] %v2040_v57  ;;  %v1500_v16 = vpop.f32.mrf.mxu1 }
 0x1e7   : > { %2425 = vst.msk [vmem:[%s3336_s7 + $0xb0] sm:$0xff] %vm2402_vm2, %v2328_v4  ;;  %v1493_v6 = vadd.f32 %v1492_v5, %v1347_v48  ;;  %v1648_v5 = vperm.slane %v1585_v24, 0 }
 0x1e8   : > { %2326 = vst [vmem:[#allocation1 + $0x22] ss:$4 sm:$0xff] %v2041_v0  ;;  %v986_v22 = vpop.f32.mrf.mxu2 }
 0x1e9   : > { %2327 = vst [vmem:[#allocation1 + $0x23] ss:$4 sm:$0xff] %v2042_v53  ;;  %v1827_v59 = vrot.slane %v1493_v6, 2  ;;  %v1828_v2 = vrot.slane %v1493_v6, 4  ;;  %v1829_v3 = vrot.slane %v1493_v6, 6  ;;  %v2043_v25 = vadd.f32 %v1643_v46, %v1493_v6 }
 0x1ea   : > { %v987_v56 = vadd.f32 %v986_v22, %v3916_v47 }
 0x1eb   : > { %v1354_v10 = vpop.f32.mrf.mxu0  ;;  %v2044_v30 = vadd.f32 %v1827_v59, %v1644_v52  ;;  %v2045_v7 = vadd.f32 %v1828_v2, %v1645_v40  ;;  %v2046_v19 = vadd.f32 %v1829_v3, %v1646_v1  ;;  %2330 = vst [vmem:[#allocation1] ss:$4 sm:$0xff] %v2043_v25 }
 0x1ec   : > { %v1196_v23 = vpop.f32.mrf.mxu3  ;;  %v1191_v18 = vadd.f32 %v1190_v34, %v987_v56 }
 0x1ed   : > { %2331 = vst [vmem:[#allocation1 + $0x1] ss:$4 sm:$0xff] %v2044_v30 }
 0x1ee   : > { %2332 = vst [vmem:[#allocation1 + $0x2] ss:$4 sm:$0xff] %v2045_v7  ;;  %v1351_v43 = vadd.f32 %v1350_v44, %v1191_v18  ;;  %v1504_v15 = vpop.f32.mrf.mxu1  ;;  %v3918_v44 = vld [vmem:[#allocation27_spill] sm:$0xff] }
 0x1ef   : > { %2333 = vst [vmem:[#allocation1 + $0x3] ss:$4 sm:$0xff] %v2046_v19 }
 0x1f0   : > { %v2329_v8 = vld.sshfl [vmem:[#allocation1 + $0x20] sm:$0xff pattern:$0x73625140]  ;;  %v1497_v49 = vadd.f32 %v1496_v54, %v1351_v43  ;;  %v991_v9 = vpop.f32.mrf.mxu2 }
 0x1f1   : > { %2426 = vst.msk [vmem:[%s3336_s7 + $0xb8] sm:$0xff] %vm2402_vm2, %v2329_v8  ;;  %v992_v36 = vadd.f32 %v991_v9, %v3917_v29 }
 0x1f2   : > { %v1830_v62 = vrot.slane %v1497_v49, 2  ;;  %v1831_v12 = vrot.slane %v1497_v49, 4  ;;  %v1832_v17 = vrot.slane %v1497_v49, 6  ;;  %v2047_v28 = vadd.f32 %v1647_v50, %v1497_v49 }
 0x1f3   : > { %v1197_v27 = vadd.f32 %v1196_v23, %v992_v36  ;;  %v1358_v60 = vpop.f32.mrf.mxu0 }
 0x1f4   : > { %v1202_v26 = vpop.f32.mrf.mxu3  ;;  %v2048_v20 = vadd.f32 %v1830_v62, %v1648_v5  ;;  %v2049_v37 = vadd.f32 %v1831_v12, %v1649_v35  ;;  %2334 = vst [vmem:[#allocation1 + $0x20] ss:$4 sm:$0xff] %v2047_v28  ;;  %v2050_v13 = vadd.f32 %v1832_v17, %v1650_v42 }
 0x1f5   : > { %v1355_v39 = vadd.f32 %v1354_v10, %v1197_v27 }
 0x1f6   : > { %v2338_v21 = vld.sshfl [vmem:[#allocation1] sm:$0xff pattern:$0x73625140]  ;;  %2335 = vst [vmem:[#allocation1 + $0x21] ss:$4 sm:$0xff] %v2048_v20  ;;  %v1508_v48 = vpop.f32.mrf.mxu1 }
 0x1f7   : > { %2427 = vst.msk [vmem:[%s3336_s7 + $0xc0] sm:$0xff] %vm2402_vm2, %v2338_v21  ;;  %v1501_v51 = vadd.f32 %v1500_v16, %v1355_v39 }
 0x1f8   : > { %2336 = vst [vmem:[#allocation1 + $0x22] ss:$4 sm:$0xff] %v2049_v37  ;;  %v996_v54 = vpop.f32.mrf.mxu2 }
 0x1f9   : > { %2337 = vst [vmem:[#allocation1 + $0x23] ss:$4 sm:$0xff] %v2050_v13  ;;  %v1833_v33 = vrot.slane %v1501_v51, 2  ;;  %v1834_v58 = vrot.slane %v1501_v51, 4  ;;  %v1835_v32 = vrot.slane %v1501_v51, 6  ;;  %v2051_v55 = vadd.f32 %v1643_v46, %v1501_v51  ;;  %v3715_v46 = vld [vmem:[%s3264_s30 + $0x38] sm:$0xff] }
 0x1fa   : > { %v997_v45 = vadd.f32 %v996_v54, %v3918_v44  ;;  %v1588_v25 = vrot.slane %v3715_v46, 1  ;;  %v1589_v47 = vrot.slane %v3715_v46, 2  ;;  %v1590_v56 = vrot.slane %v3715_v46, 3 }
 0x1fb   : > { %v2052_v41 = vadd.f32 %v1833_v33, %v1644_v52  ;;  %v2053_v14 = vadd.f32 %v1834_v58, %v1645_v40  ;;  %v2054_v63 = vadd.f32 %v1835_v32, %v1646_v1  ;;  %2340 = vst [vmem:[#allocation1] ss:$4 sm:$0xff] %v2051_v55  ;;  %v1362_v0 = vpop.f32.mrf.mxu0  ;;  %v3919_v52 = vld [vmem:[#allocation29_spill] sm:$0xff]  ;;  %v1651_v19 = vperm.slane %v3715_v46, 0  ;;  %v3921_v58 = vld [vmem:[#allocation35_spill] sm:$0xff] }
 0x1fc   : > { %v1208_v34 = vpop.f32.mrf.mxu3  ;;  %v1203_v57 = vadd.f32 %v1202_v26, %v997_v45  ;;  %v1652_v24 = vperm.slane %v1588_v25, 0  ;;  %v1653_v38 = vperm.slane %v1589_v47, 0  ;;  %v1654_v61 = vperm.slane %v1590_v56, 0 }
 0x1fd   : > { %2341 = vst [vmem:[#allocation1 + $0x1] ss:$4 sm:$0xff] %v2052_v41  ;;  %v1591_v36 = vrot.slane %v3715_v46, 4  ;;  %v1592_v27 = vrot.slane %v3715_v46, 5  ;;  %v1593_v26 = vrot.slane %v3715_v46, 6 }
 0x1fe   : > { %2342 = vst [vmem:[#allocation1 + $0x2] ss:$4 sm:$0xff] %v2053_v14  ;;  %v1359_v53 = vadd.f32 %v1358_v60, %v1203_v57  ;;  %v1512_v9 = vpop.f32.mrf.mxu1  ;;  %v1594_v60 = vrot.slane %v3715_v46, 7 }
 0x1ff   : > { %2343 = vst [vmem:[#allocation1 + $0x3] ss:$4 sm:$0xff] %v2054_v63  ;;  %v1655_v37 = vperm.slane %v1591_v36, 0  ;;  %v1656_v21 = vperm.slane %v1592_v27, 0  ;;  %v1657_v51 = vperm.slane %v1593_v26, 0 }
 0x200   : > { %v2339_v4 = vld.sshfl [vmem:[#allocation1 + $0x20] sm:$0xff pattern:$0x73625140]  ;;  %v1505_v6 = vadd.f32 %v1504_v15, %v1359_v53  ;;  %v1001_v11 = vpop.f32.mrf.mxu2  ;;  %v1658_v33 = vperm.slane %v1594_v60, 0 }
 0x201   : > { %2428 = vst.msk [vmem:[%s3336_s7 + $0xc8] sm:$0xff] %vm2402_vm2, %v2339_v4  ;;  %v1002_v22 = vadd.f32 %v1001_v11, %v3919_v52 }
 0x202   : > { %v1836_v40 = vrot.slane %v1505_v6, 2  ;;  %v1837_v1 = vrot.slane %v1505_v6, 4  ;;  %v1838_v59 = vrot.slane %v1505_v6, 6  ;;  %v2055_v2 = vadd.f32 %v1647_v50, %v1505_v6 }
 0x203   : > { %v1209_v3 = vadd.f32 %v1208_v34, %v1002_v22  ;;  %v1366_v43 = vpop.f32.mrf.mxu0 }
 0x204   : > { %v2056_v31 = vadd.f32 %v1836_v40, %v1648_v5  ;;  %v2057_v10 = vadd.f32 %v1837_v1, %v1649_v35  ;;  %2344 = vst [vmem:[#allocation1 + $0x20] ss:$4 sm:$0xff] %v2055_v2  ;;  %v2058_v30 = vadd.f32 %v1838_v59, %v1650_v42  ;;  %v1214_v23 = vpop.f32.mrf.mxu3  ;;  %v3920_v42 = vld [vmem:[#allocation32_spill] sm:$0xff] }
 0x205   : > { %v1363_v7 = vadd.f32 %v1362_v0, %v1209_v3  ;;  %v3922_v2 = vld [vmem:[#allocation36_spill] sm:$0xff] }
 0x206   : > { %v2348_v16 = vld.sshfl [vmem:[#allocation1] sm:$0xff pattern:$0x73625140]  ;;  %2345 = vst [vmem:[#allocation1 + $0x21] ss:$4 sm:$0xff] %v2056_v31  ;;  %v1516_v34 = vpop.f32.mrf.mxu1 }
 0x207   : > { %2429 = vst.msk [vmem:[%s3336_s7 + $0xd0] sm:$0xff] %vm2402_vm2, %v2348_v16  ;;  %v1509_v18 = vadd.f32 %v1508_v48, %v1363_v7 }
 0x208   : > { %2346 = vst [vmem:[#allocation1 + $0x22] ss:$4 sm:$0xff] %v2057_v10  ;;  %v1006_v50 = vpop.f32.mrf.mxu2 }
 0x209   : > { %2347 = vst [vmem:[#allocation1 + $0x23] ss:$4 sm:$0xff] %v2058_v30  ;;  %v1839_v8 = vrot.slane %v1509_v18, 2  ;;  %v1840_v49 = vrot.slane %v1509_v18, 4  ;;  %v1841_v5 = vrot.slane %v1509_v18, 6  ;;  %v2059_v35 = vadd.f32 %v1651_v19, %v1509_v18 }
 0x20a   : > { %v1007_v29 = vadd.f32 %v1006_v50, %v3920_v42 }
 0x20b   : > { %v2060_v62 = vadd.f32 %v1839_v8, %v1652_v24  ;;  %v2061_v12 = vadd.f32 %v1840_v49, %v1653_v38  ;;  %v2062_v17 = vadd.f32 %v1841_v5, %v1654_v61  ;;  %2350 = vst [vmem:[#allocation1] ss:$4 sm:$0xff] %v2059_v35  ;;  %v1370_v55 = vpop.f32.mrf.mxu0 }
 0x20c   : > { %v1215_v28 = vadd.f32 %v1214_v23, %v1007_v29  ;;  %v1220_v13 = vpop.f32.mrf.mxu3 }
 0x20d   : > { %2351 = vst [vmem:[#allocation1 + $0x1] ss:$4 sm:$0xff] %v2060_v62 }
 0x20e   : > { %2352 = vst [vmem:[#allocation1 + $0x2] ss:$4 sm:$0xff] %v2061_v12  ;;  %v1367_v20 = vadd.f32 %v1366_v43, %v1215_v28  ;;  %v1520_v30 = vpop.f32.mrf.mxu1 }
 0x20f   : > { %2353 = vst [vmem:[#allocation1 + $0x3] ss:$4 sm:$0xff] %v2062_v17 }
 0x210   : > { %v2349_v39 = vld.sshfl [vmem:[#allocation1 + $0x20] sm:$0xff pattern:$0x73625140]  ;;  %v1513_v15 = vadd.f32 %v1512_v9, %v1367_v20  ;;  %v1011_v54 = vpop.f32.mrf.mxu2 }
 0x211   : > { %2430 = vst.msk [vmem:[%s3336_s7 + $0xd8] sm:$0xff] %vm2402_vm2, %v2349_v39  ;;  %v1012_v32 = vadd.f32 %v1011_v54, %v3921_v58 }
 0x212   : > { %v1842_v44 = vrot.slane %v1513_v15, 2  ;;  %v1843_v45 = vrot.slane %v1513_v15, 4  ;;  %v1844_v41 = vrot.slane %v1513_v15, 6  ;;  %v2063_v14 = vadd.f32 %v1655_v37, %v1513_v15 }
 0x213   : > { %v1221_v63 = vadd.f32 %v1220_v13, %v1012_v32  ;;  %v1374_v31 = vpop.f32.mrf.mxu0 }
 0x214   : > { %v2064_v57 = vadd.f32 %v1842_v44, %v1656_v21  ;;  %v2065_v0 = vadd.f32 %v1843_v45, %v1657_v51  ;;  %2354 = vst [vmem:[#allocation1 + $0x20] ss:$4 sm:$0xff] %v2063_v14  ;;  %v2066_v53 = vadd.f32 %v1844_v41, %v1658_v33  ;;  %v1226_v59 = vpop.f32.mrf.mxu3 }
 0x215   : > { %v1371_v48 = vadd.f32 %v1370_v55, %v1221_v63 }
 0x216   : > { %v2358_v4 = vld.sshfl [vmem:[#allocation1] sm:$0xff pattern:$0x73625140]  ;;  %2355 = vst [vmem:[#allocation1 + $0x21] ss:$4 sm:$0xff] %v2064_v57 }
 0x217   : > { %2431 = vst.msk [vmem:[%s3336_s7 + $0xe0] sm:$0xff] %vm2402_vm2, %v2358_v4  ;;  %v1517_v6 = vadd.f32 %v1516_v34, %v1371_v48 }
 0x218   : > { %2356 = vst [vmem:[#allocation1 + $0x22] ss:$4 sm:$0xff] %v2065_v0  ;;  %v1016_v11 = vpop.f32.mrf.mxu2 }
 0x219   : > { %2357 = vst [vmem:[#allocation1 + $0x23] ss:$4 sm:$0xff] %v2066_v53  ;;  %v1845_v52 = vrot.slane %v1517_v6, 2  ;;  %v1846_v22 = vrot.slane %v1517_v6, 4  ;;  %v1847_v40 = vrot.slane %v1517_v6, 6  ;;  %v2067_v1 = vadd.f32 %v1651_v19, %v1517_v6 }
 0x21a   : > { %v1017_v3 = vadd.f32 %v1016_v11, %v3922_v2 }
 0x21b   : > { %v2068_v25 = vadd.f32 %v1845_v52, %v1652_v24  ;;  %v2069_v47 = vadd.f32 %v1846_v22, %v1653_v38  ;;  %v2070_v56 = vadd.f32 %v1847_v40, %v1654_v61  ;;  %2360 = vst [vmem:[#allocation1] ss:$4 sm:$0xff] %v2067_v1 }
 0x21c   : > { %v1227_v10 = vadd.f32 %v1226_v59, %v1017_v3 }
 0x21d   : > { %2361 = vst [vmem:[#allocation1 + $0x1] ss:$4 sm:$0xff] %v2068_v25 }
 0x21e   : > { %2362 = vst [vmem:[#allocation1 + $0x2] ss:$4 sm:$0xff] %v2069_v47  ;;  %v1375_v7 = vadd.f32 %v1374_v31, %v1227_v10 }
 0x21f   : > { %2363 = vst [vmem:[#allocation1 + $0x3] ss:$4 sm:$0xff] %v2070_v56 }
 0x220   : > { %v2359_v23 = vld.sshfl [vmem:[#allocation1 + $0x20] sm:$0xff pattern:$0x73625140]  ;;  %v1521_v16 = vadd.f32 %v1520_v30, %v1375_v7 }
 0x221   : > { %2432 = vst.msk [vmem:[%s3336_s7 + $0xe8] sm:$0xff] %vm2402_vm2, %v2359_v23 }
 0x222   : > { %v1848_v46 = vrot.slane %v1521_v16, 2  ;;  %v1849_v19 = vrot.slane %v1521_v16, 4  ;;  %v1850_v18 = vrot.slane %v1521_v16, 6  ;;  %v2071_v24 = vadd.f32 %v1655_v37, %v1521_v16 }
 0x224   : > { %v2072_v38 = vadd.f32 %v1848_v46, %v1656_v21  ;;  %v2073_v61 = vadd.f32 %v1849_v19, %v1657_v51  ;;  %2364 = vst [vmem:[#allocation1 + $0x20] ss:$4 sm:$0xff] %v2071_v24  ;;  %v2074_v43 = vadd.f32 %v1850_v18, %v1658_v33 }
 0x226   : > { %v2368_v50 = vld.sshfl [vmem:[#allocation1] sm:$0xff pattern:$0x73625140]  ;;  %2365 = vst [vmem:[#allocation1 + $0x21] ss:$4 sm:$0xff] %v2072_v38 }
 0x227   : > { %2433 = vst.msk [vmem:[%s3336_s7 + $0xf0] sm:$0xff] %vm2402_vm2, %v2368_v50 }
 0x228   : > { %2366 = vst [vmem:[#allocation1 + $0x22] ss:$4 sm:$0xff] %v2073_v61 }
 0x229   : > { %2367 = vst [vmem:[#allocation1 + $0x23] ss:$4 sm:$0xff] %v2074_v43 }
 0x230   : > { %v2369_v8 = vld.sshfl [vmem:[#allocation1 + $0x20] sm:$0xff pattern:$0x73625140] }
 0x231   : > { %2434 = vst.msk [vmem:[%s3336_s7 + $0xf8] sm:$0xff] %vm2402_vm2, %v2369_v8 }
 0x232 PF: > { %s14_s17 = sadd.s32 1, %s2615_s17   ;;  %s3923_s15 = smov %s2611_s16 }
 0x233   : > { %p11_p5 = scmp.ge.s32.totalorder %s14_s17, 4   ;;  %s3924_s16 = smov %s3926_s18 }
 0x235   :  { %13 = sbr.rel (!%p11_p5) target bundleno = 2 (0x2), region = 76 }

// kernel: tpu_custom_call.1
= control target key start
LH: loop header
LB: loop body
LE: loop exit
PB: predicated region body
PF: predicated region fallthrough
CT: control target
= control target key end

     0   :  { %s2642_s15 = smov 0   ;;  %s2644_s16 = smov 0   ;;  %s3756_s0 = inlined_call_operand.vmem [shape: f32[2,8,8,8], index: 0, kind: input, shape index: {}]   ;;  %s3757_s1 = inlined_call_operand.vmem [shape: f32[2,16,16,4], index: 1, kind: input, shape index: {}]   ;;  %s3758_s2 = inlined_call_operand.vmem [shape: f32[4,8], index: 2, kind: input, shape index: {}]   ;;  %s3759_s3 = inlined_call_operand.vmem [shape: f32[1,8], index: 3, kind: input, shape index: {}]   ;;  %s3760_s4 = inlined_call_operand.vmem [shape: f32[2,16,16,8], index: 4, kind: output, shape index: {}]  }
   0x1   :  { %s2646_s17 = smov 0  }
   0x2 LB: > { %s26_s18 = sadd.s32 1, %s2611_s16  ;;  %p2553_p0 = scmp.ge.s32.totalorder %s2615_s17, 1  ;;  %s2615_s17 = sphi %s2646_s17, %s14_s17   ;;  %s2611_s16 = sphi %s2644_s16, %s3924_s16   ;;  %s2607_s15 = sphi %s2642_s15, %s3923_s15  }
   0x3   : > { %p28_p1 = scmp.ge.s32.totalorder %s26_s18, 2  ;;  %p201_p2 = scmp.lt.s32.totalorder %s2615_s17, 3 }
   0x5   : > { %s3926_s18 = smov (%p28_p1, %s26_s18), 0  ;;  %p202_p3 = pnand %p2553_p0, %p201_p2 }
   0x7   : > { %205 = sbr.rel (%p202_p3) target bundleno = 562 (0x232), region = 36 }
   0xc   : > { %v310_v0 = vld [vmem:[%s3758_s2] sm:$0xf]  ;;  %vm412_vm0 = vcmask 1043456   ;;  %p247_p4 = scmp.lt.s32.totalorder %s2607_s15, 1  ;;  %vm315_vm1 = vcmask 31744   ;;  %vm2402_vm2 = vcmask 64512  }
   0xd   : > { %v414_v1 = vsel %vm412_vm0, %v310_v0, 0 }
   0xe   : > { %v431_v2 = vand.u32 4294901760, %v414_v1  ;;  %s3928_s15 = smov (!%p247_p4, %s2607_s15), 1 }
   0xf   : > { %s2563_s21 = sshll.u32 %s3928_s15, 8  ;;  %s2562_s27 = sshll.u32 %s3928_s15, 6 }
  0x10   : > { %2565 = vmatpush.msra.mxu2 %v431_v2  ;;  %v706_v3 = vsub.f32 %v414_v1, %v431_v2  ;;  %432 = vmatpush.msra.mxu0 %v431_v2  ;;  %s2671_s24 = scalar_lea.vmem %s3757_s1, %s2563_s21  ;;  %s3264_s30 = scalar_lea.vmem %s3756_s0, %s2562_s27 }
  0x11   : > { %v294_v4 = vld [vmem:[%s2671_s24 + $0x80] sm:$0xff]  ;;  %v295_v6 = vld [vmem:[%s2671_s24 + $0x88] sm:$0xff]  ;;  %v296_v11 = vld [vmem:[%s2671_s24 + $0x90] sm:$0xff]  ;;  %s3336_s7 = scalar_lea.vmem %s3760_s4, %s2563_s21 }
  0x12   : > { %857 = vmatpush.msrb.mxu2 %v706_v3  ;;  %v707_v5 = vand.u32 4294901760, %v706_v3  ;;  %v278_v7 = vld [vmem:[%s2671_s24] sm:$0xff]  ;;  %v365_v8 = vsel %vm315_vm1, %v294_v4, 0  ;;  %v368_v9 = vsel %vm315_vm1, %v295_v6, 0  ;;  %v279_v12 = vld [vmem:[%s2671_s24 + $0x8] sm:$0xff]  ;;  %v280_v17 = vld [vmem:[%s2671_s24 + $0x10] sm:$0xff] }
  0x13   : > { %v317_v10 = vsel %vm315_vm1, %v278_v7, 0  ;;  %v2681_v13 = vand.u32 4294901760, %v365_v8  ;;  %v2683_v15 = vand.u32 4294901760, %v368_v9  ;;  %v371_v18 = vsel %vm315_vm1, %v296_v11, 0  ;;  %v297_v35 = vld [vmem:[%s2671_s24 + $0x98] sm:$0xff]  ;;  %v298_v51 = vld [vmem:[%s2671_s24 + $0xa0] sm:$0xff] }
  0x14   : > { %v708_v14 = vsub.f32 %v706_v3, %v707_v5  ;;  %v2685_v16 = vand.u32 4294901760, %v317_v10  ;;  %1247 = vmatpush.msrb.mxu0 %v707_v5  ;;  %v320_v19 = vsel %vm315_vm1, %v279_v12, 0  ;;  %v323_v25 = vsel %vm315_vm1, %v280_v17, 0  ;;  %v281_v38 = vld [vmem:[%s2671_s24 + $0x18] sm:$0xff]  ;;  %v282_v52 = vld [vmem:[%s2671_s24 + $0x20] sm:$0xff]  ;;  %v299_v1 = vld [vmem:[%s2671_s24 + $0xa8] sm:$0xff] }
  0x15   : > { %v2691_v20 = vsub.f32 %v365_v8, %v2681_v13  ;;  %v2694_v22 = vsub.f32 %v368_v9, %v2683_v15  ;;  %v2699_v24 = vand.u32 4294901760, %v320_v19  ;;  %v2706_v28 = vand.u32 4294901760, %v371_v18 }
  0x16   : > { %v709_v21 = vand.u32 4294901760, %v708_v14  ;;  %v2697_v23 = vsub.f32 %v317_v10, %v2685_v16  ;;  %v2718_v33 = vand.u32 4294901760, %v323_v25  ;;  %v374_v42 = vsel %vm315_vm1, %v297_v35, 0 }
  0x17   : > { %v3769_v26 = vand.u32 4294901760, %v2691_v20  ;;  %v2709_v29 = vsub.f32 %v320_v19, %v2699_v24  ;;  %v3768_v31 = vand.u32 4294901760, %v2694_v22  ;;  %v2724_v39 = vsub.f32 %v371_v18, %v2706_v28  ;;  %v300_v18 = vld [vmem:[%s2671_s24 + $0xb0] sm:$0xff] }
  0x18   : > { %2566 = vmatpush.msra.mxu3 %v709_v21  ;;  %v3782_v27 = vand.u32 4294901760, %v2697_v23  ;;  %710 = vmatpush.msra.mxu1 %v709_v21  ;;  %v2734_v43 = vsub.f32 %v323_v25, %v2718_v33  ;;  %v326_v44 = vsel %vm315_vm1, %v281_v38, 0  ;;  %v2740_v46 = vand.u32 4294901760, %v374_v42  ;;  %v284_v19 = vld [vmem:[%s2671_s24 + $0x30] sm:$0xff] }
  0x19   : > { %776 = vmatmul.f32.vlgmr.msra.gmra.mxu3 %v2681_v13  ;;  %712 = vmatmul.f32.vlgmr.msra.gmra.mxu1 %v2685_v16  ;;  %v564_v30 = vsub.f32 %v2691_v20, %v3769_v26  ;;  %v3781_v34 = vand.u32 4294901760, %v2709_v29  ;;  %v572_v40 = vsub.f32 %v2694_v22, %v3768_v31  ;;  %v3767_v45 = vand.u32 4294901760, %v2724_v39  ;;  %v289_v31 = vld [vmem:[%s2671_s24 + $0x58] sm:$0xff] }
  0x1a   : > { %1035 = vmatpush.msrb.mxu3 %v431_v2  ;;  %v436_v32 = vsub.f32 %v2697_v23, %v3782_v27  ;;  %1393 = vmatpush.msrb.mxu1 %v431_v2  ;;  %v3780_v49 = vand.u32 4294901760, %v2734_v43  ;;  %v2743_v50 = vand.u32 4294901760, %v326_v44  ;;  %v2748_v53 = vsub.f32 %v374_v42, %v2740_v46  ;;  %v283_v2 = vld [vmem:[%s2671_s24 + $0x28] sm:$0xff] }
  0x1b   : > { %v565_v36 = vand.u32 4294901760, %v564_v30  ;;  %v444_v41 = vsub.f32 %v2709_v29, %v3781_v34  ;;  %v573_v47 = vand.u32 4294901760, %v572_v40  ;;  %v580_v54 = vsub.f32 %v2724_v39, %v3767_v45 }
  0x1c   : > { %v437_v37 = vand.u32 4294901760, %v436_v32  ;;  %v452_v55 = vsub.f32 %v2734_v43, %v3780_v49  ;;  %v377_v56 = vsel %vm315_vm1, %v298_v51, 0  ;;  %v2758_v57 = vsub.f32 %v326_v44, %v2743_v50  ;;  %v291_v49 = vld [vmem:[%s2671_s24 + $0x68] sm:$0xff] }
  0x1d   : > { %566 = vmatmul.f32.vlgmr.msra.gmra.mxu2 %v565_v36  ;;  %v445_v48 = vand.u32 4294901760, %v444_v41  ;;  %v329_v58 = vsel %vm315_vm1, %v282_v52, 0  ;;  %v3765_v59 = vand.u32 4294901760, %v2748_v53  ;;  %v2764_v60 = vand.u32 4294901760, %v377_v56 }
  0x1e   : > { %438 = vmatmul.f32.vlgmr.msra.gmra.mxu0 %v437_v37  ;;  %v581_v61 = vand.u32 4294901760, %v580_v54  ;;  %v453_v62 = vand.u32 4294901760, %v452_v55  ;;  %v3777_v63 = vand.u32 4294901760, %v2758_v57  ;;  %v2767_v0 = vand.u32 4294901760, %v329_v58 }
  0x1f   : > { %v2772_v3 = vsub.f32 %v377_v56, %v2764_v60  ;;  %v588_v4 = vsub.f32 %v2748_v53, %v3765_v59  ;;  %v380_v6 = vsel %vm315_vm1, %v299_v1, 0  ;;  %v332_v8 = vsel %vm315_vm1, %v283_v2, 0 }
  0x20   : > { %v460_v5 = vsub.f32 %v2758_v57, %v3777_v63  ;;  %v2782_v7 = vsub.f32 %v329_v58, %v2767_v0  ;;  %v2788_v10 = vand.u32 4294901760, %v380_v6  ;;  %v2791_v17 = vand.u32 4294901760, %v332_v8 }
  0x21   : > { %780 = vmatmul.f32.gmra.mxu3 %v2683_v15  ;;  %716 = vmatmul.f32.gmra.mxu1 %v2699_v24  ;;  %v3764_v9 = vand.u32 4294901760, %v2772_v3  ;;  %v589_v11 = vand.u32 4294901760, %v588_v4  ;;  %v383_v35 = vsel %vm315_vm1, %v300_v18, 0  ;;  %v335_v36 = vsel %vm315_vm1, %v284_v19, 0 }
  0x22   : > { %v461_v12 = vand.u32 4294901760, %v460_v5  ;;  %v3776_v14 = vand.u32 4294901760, %v2782_v7  ;;  %v2799_v25 = vsub.f32 %v380_v6, %v2788_v10  ;;  %v2805_v32 = vsub.f32 %v332_v8, %v2791_v17  ;;  %v302_v6 = vld [vmem:[%s2671_s24 + $0xc0] sm:$0xff] }
  0x23   : > { %v596_v21 = vsub.f32 %v2772_v3, %v3764_v9  ;;  %v2812_v41 = vand.u32 4294901760, %v383_v35  ;;  %v2815_v44 = vand.u32 4294901760, %v335_v36  ;;  %v286_v8 = vld [vmem:[%s2671_s24 + $0x40] sm:$0xff]  ;;  %v389_v19 = vsel %vm315_vm1, %v302_v6, 0 }
  0x24   : > { %v468_v30 = vsub.f32 %v2782_v7, %v3776_v14  ;;  %v3763_v38 = vand.u32 4294901760, %v2799_v25  ;;  %v3775_v42 = vand.u32 4294901760, %v2805_v32  ;;  %v356_v27 = vsel %vm315_vm1, %v291_v49, 0 }
  0x25   : > { %574 = vmatmul.f32.gmra.mxu2 %v573_v47  ;;  %v597_v37 = vand.u32 4294901760, %v596_v21  ;;  %v301_v47 = vld [vmem:[%s2671_s24 + $0xb8] sm:$0xff]  ;;  %v2823_v52 = vsub.f32 %v383_v35, %v2812_v41  ;;  %v2830_v56 = vsub.f32 %v335_v36, %v2815_v44  ;;  %v2860_v36 = vand.u32 4294901760, %v389_v19 }
  0x26   : > { %446 = vmatmul.f32.gmra.mxu0 %v445_v48  ;;  %v469_v40 = vand.u32 4294901760, %v468_v30  ;;  %v285_v48 = vld [vmem:[%s2671_s24 + $0x38] sm:$0xff]  ;;  %v604_v51 = vsub.f32 %v2799_v25, %v3763_v38  ;;  %v476_v54 = vsub.f32 %v2805_v32, %v3775_v42  ;;  %v386_v55 = vsel %vm315_vm1, %v301_v47, 0 }
  0x27   : > { %v338_v58 = vsel %vm315_vm1, %v285_v48, 0  ;;  %v3762_v1 = vand.u32 4294901760, %v2823_v52  ;;  %v3774_v4 = vand.u32 4294901760, %v2830_v56  ;;  %v341_v30 = vsel %vm315_vm1, %v286_v8, 0  ;;  %3821 = vst [vmem:[#allocation2_spill] sm:$0xff] %v2860_v36 }
  0x28   : > { %v477_v2 = vand.u32 4294901760, %v476_v54  ;;  %v2839_v5 = vand.u32 4294901760, %v338_v58  ;;  %v2863_v48 = vand.u32 4294901760, %v341_v30  ;;  %v287_v54 = vld [vmem:[%s2671_s24 + $0x48] sm:$0xff] }
  0x29   : > { %784 = vmatmul.f32.gmra.mxu3 %v2706_v28  ;;  %720 = vmatmul.f32.gmra.mxu1 %v2718_v33  ;;  %v484_v18 = vsub.f32 %v2830_v56, %v3774_v4  ;;  %v344_v8 = vsel %vm315_vm1, %v287_v54, 0  ;;  %v290_v4 = vld [vmem:[%s2671_s24 + $0x60] sm:$0xff] }
  0x2a   : > { %v2854_v21 = vsub.f32 %v338_v58, %v2839_v5  ;;  %v2871_v58 = vsub.f32 %v389_v19, %v2860_v36  ;;  %v353_v14 = vsel %vm315_vm1, %v290_v4, 0 }
  0x2c   : > { %v3772_v47 = vand.u32 4294901760, %v2854_v21 }
  0x2d   : > { %582 = vmatmul.f32.gmra.mxu2 %v581_v61  ;;  %v605_v61 = vand.u32 4294901760, %v604_v51  ;;  %v303_v51 = vld [vmem:[%s2671_s24 + $0xc8] sm:$0xff] }
  0x2e   : > { %454 = vmatmul.f32.gmra.mxu0 %v453_v62  ;;  %v2835_v62 = vand.u32 4294901760, %v386_v55  ;;  %v392_v6 = vsel %vm315_vm1, %v303_v51, 0 }
  0x31   : > { %788 = vmatmul.f32.gmra.mxu3 %v2740_v46  ;;  %724 = vmatmul.f32.gmra.mxu1 %v2743_v50 }
  0x35   : > { %590 = vmatmul.f32.gmra.mxu2 %v589_v11  ;;  %v2844_v11 = vsub.f32 %v386_v55, %v2835_v62 }
  0x36   : > { %462 = vmatmul.f32.gmra.mxu0 %v461_v12  ;;  %v612_v12 = vsub.f32 %v2823_v52, %v3762_v1  ;;  %v288_v1 = vld [vmem:[%s2671_s24 + $0x50] sm:$0xff] }
  0x37   : > { %v3761_v35 = vand.u32 4294901760, %v2844_v11  ;;  %v347_v9 = vsel %vm315_vm1, %v288_v1, 0 }
  0x38   : > { %v2911_v45 = vand.u32 4294901760, %v347_v9 }
  0x39   : > { %792 = vmatmul.f32.gmra.mxu3 %v2764_v60  ;;  %728 = vmatmul.f32.gmra.mxu1 %v2767_v0  ;;  %v620_v55 = vsub.f32 %v2844_v11, %v3761_v35  ;;  %v2887_v35 = vand.u32 4294901760, %v344_v8 }
  0x3a   : > { %v2926_v26 = vsub.f32 %v347_v9, %v2911_v45 }
  0x3b   : > { %v2902_v38 = vsub.f32 %v344_v8, %v2887_v35 }
  0x3d   : > { %598 = vmatmul.f32.gmra.mxu2 %v597_v37  ;;  %v613_v37 = vand.u32 4294901760, %v612_v12  ;;  %v621_v12 = vand.u32 4294901760, %v620_v55 }
  0x3e   : > { %470 = vmatmul.f32.gmra.mxu0 %v469_v40  ;;  %v485_v40 = vand.u32 4294901760, %v484_v18  ;;  %v3766_v18 = vand.u32 4294901760, %v2871_v58 }
  0x40   : > { %v628_v51 = vsub.f32 %v2871_v58, %v3766_v18  ;;  %v3773_v18 = vand.u32 4294901760, %v2902_v38 }
  0x41   : > { %796 = vmatmul.f32.gmra.mxu3 %v2788_v10  ;;  %732 = vmatmul.f32.gmra.mxu1 %v2791_v17 }
  0x42   : > { %v629_v59 = vand.u32 4294901760, %v628_v51  ;;  %v508_v51 = vsub.f32 %v2902_v38, %v3773_v18 }
  0x45   : > { %606 = vmatmul.f32.gmra.mxu2 %v605_v61  ;;  %v492_v61 = vsub.f32 %v2854_v21, %v3772_v47  ;;  %v3779_v47 = vand.u32 4294901760, %v2926_v26 }
  0x46   : > { %478 = vmatmul.f32.gmra.mxu0 %v477_v2  ;;  %v2877_v2 = vsub.f32 %v341_v30, %v2863_v48  ;;  %v304_v30 = vld [vmem:[%s2671_s24 + $0xd0] sm:$0xff] }
  0x47   : > { %v493_v19 = vand.u32 4294901760, %v492_v61  ;;  %v395_v61 = vsel %vm315_vm1, %v304_v30, 0  ;;  %v305_v30 = vld [vmem:[%s2671_s24 + $0xd8] sm:$0xff] }
  0x49   : > { %800 = vmatmul.f32.gmra.mxu3 %v2812_v41  ;;  %736 = vmatmul.f32.gmra.mxu1 %v2815_v44 }
  0x4d   : > { %614 = vmatmul.f32.gmra.mxu2 %v613_v37  ;;  %v2884_v37 = vand.u32 4294901760, %v392_v6 }
  0x4e   : > { %486 = vmatmul.f32.gmra.mxu0 %v485_v40  ;;  %v3770_v40 = vand.u32 4294901760, %v2877_v2 }
  0x4f   : > { %3822 = vst [vmem:[#allocation3_spill] sm:$0xff] %v2884_v37  ;;  %v2895_v54 = vsub.f32 %v392_v6, %v2884_v37 }
  0x50   : > { %v500_v55 = vsub.f32 %v2877_v2, %v3770_v40 }
  0x51   : > { %804 = vmatmul.f32.gmra.mxu3 %v2835_v62  ;;  %740 = vmatmul.f32.gmra.mxu1 %v2839_v5  ;;  %3823 = vst [vmem:[#allocation4_spill] sm:$0xff] %v2895_v54  ;;  %v3771_v6 = vand.u32 4294901760, %v2895_v54 }
  0x53   : > { %v636_v1 = vsub.f32 %v2895_v54, %v3771_v6  ;;  %v509_v6 = vand.u32 4294901760, %v508_v51 }
  0x55   : > { %622 = vmatmul.f32.gmra.mxu2 %v621_v12  ;;  %v2907_v12 = vand.u32 4294901760, %v395_v61 }
  0x56   : > { %494 = vmatmul.f32.gmra.mxu0 %v493_v19  ;;  %v501_v19 = vand.u32 4294901760, %v500_v55  ;;  %v398_v55 = vsel %vm315_vm1, %v305_v30, 0  ;;  %v306_v30 = vld [vmem:[%s2671_s24 + $0xe0] sm:$0xff] }
  0x57   : > { %3824 = vst [vmem:[#allocation5_spill] sm:$0xff] %v2907_v12  ;;  %v2916_v8 = vsub.f32 %v395_v61, %v2907_v12  ;;  %v350_v61 = vsel %vm315_vm1, %v289_v31, 0  ;;  %v2932_v40 = vand.u32 4294901760, %v398_v55  ;;  %v401_v42 = vsel %vm315_vm1, %v306_v30, 0 }
  0x58   : > { %v2935_v18 = vand.u32 4294901760, %v350_v61 }
  0x59   : > { %808 = vmatmul.f32.gmra.mxu3 %v2860_v36  ;;  %744 = vmatmul.f32.gmra.mxu1 %v2863_v48  ;;  %3825 = vst [vmem:[#allocation6_spill] sm:$0xff] %v2916_v8  ;;  %v2943_v9 = vsub.f32 %v398_v55, %v2932_v40 }
  0x5a   : > { %3826 = vst [vmem:[#allocation7_spill] sm:$0xff] %v2932_v40  ;;  %v2949_v51 = vsub.f32 %v350_v61, %v2935_v18  ;;  %v307_v61 = vld [vmem:[%s2671_s24 + $0xe8] sm:$0xff] }
  0x5b   : > { %3827 = vst [vmem:[#allocation8_spill] sm:$0xff] %v2943_v9  ;;  %v3785_v55 = vand.u32 4294901760, %v2943_v9 }
  0x5d   : > { %630 = vmatmul.f32.gmra.mxu2 %v629_v59  ;;  %v3778_v59 = vand.u32 4294901760, %v2916_v8  ;;  %v652_v4 = vsub.f32 %v2943_v9, %v3785_v55  ;;  %v292_v9 = vld [vmem:[%s2671_s24 + $0x70] sm:$0xff] }
  0x5e   : > { %502 = vmatmul.f32.gmra.mxu0 %v501_v19  ;;  %v637_v19 = vand.u32 4294901760, %v636_v1  ;;  %v516_v1 = vsub.f32 %v2926_v26, %v3779_v47  ;;  %v2959_v47 = vand.u32 4294901760, %v353_v14 }
  0x5f   : > { %v644_v31 = vsub.f32 %v2916_v8, %v3778_v59  ;;  %v3786_v59 = vand.u32 4294901760, %v2949_v51 }
  0x60   : > { %v2974_v34 = vsub.f32 %v353_v14, %v2959_v47 }
  0x61   : > { %812 = vmatmul.f32.gmra.mxu3 %v2884_v37  ;;  %748 = vmatmul.f32.gmra.mxu1 %v2887_v35  ;;  %v645_v63 = vand.u32 4294901760, %v644_v31  ;;  %v524_v31 = vsub.f32 %v2949_v51, %v3786_v59  ;;  %v2983_v59 = vand.u32 4294901760, %v356_v27  ;;  %v293_v37 = vld [vmem:[%s2671_s24 + $0x78] sm:$0xff] }
  0x62   : > { %v3796_v55 = vand.u32 4294901760, %v2974_v34  ;;  %v362_v54 = vsel %vm315_vm1, %v293_v37, 0 }
  0x65   : > { %638 = vmatmul.f32.gmra.mxu2 %v637_v19  ;;  %v517_v19 = vand.u32 4294901760, %v516_v1  ;;  %v404_v1 = vsel %vm315_vm1, %v307_v61, 0  ;;  %v308_v61 = vld [vmem:[%s2671_s24 + $0xf0] sm:$0xff] }
  0x66   : > { %510 = vmatmul.f32.gmra.mxu0 %v509_v6  ;;  %v2956_v6 = vand.u32 4294901760, %v401_v42 }
  0x68   : > { %3828 = vst [vmem:[#allocation9_spill] sm:$0xff] %v2956_v6  ;;  %v2967_v30 = vsub.f32 %v401_v42, %v2956_v6 }
  0x69   : > { %816 = vmatmul.f32.gmra.mxu3 %v2907_v12  ;;  %752 = vmatmul.f32.gmra.mxu1 %v2911_v45  ;;  %v653_v12 = vand.u32 4294901760, %v652_v4  ;;  %v532_v4 = vsub.f32 %v2974_v34, %v3796_v55 }
  0x6a   : > { %3829 = vst [vmem:[#allocation10_spill] sm:$0xff] %v2967_v30  ;;  %v3793_v42 = vand.u32 4294901760, %v2967_v30 }
  0x6c   : > { %v660_v49 = vsub.f32 %v2967_v30, %v3793_v42  ;;  %v533_v42 = vand.u32 4294901760, %v532_v4 }
  0x6d   : > { %646 = vmatmul.f32.gmra.mxu2 %v645_v63  ;;  %v2979_v63 = vand.u32 4294901760, %v404_v1 }
  0x6e   : > { %518 = vmatmul.f32.gmra.mxu0 %v517_v19  ;;  %v525_v19 = vand.u32 4294901760, %v524_v31  ;;  %v407_v31 = vsel %vm315_vm1, %v308_v61, 0  ;;  %v309_v61 = vld [vmem:[%s2671_s24 + $0xf8] sm:$0xff] }
  0x6f   : > { %3830 = vst [vmem:[#allocation11_spill] sm:$0xff] %v2979_v63  ;;  %v2988_v14 = vsub.f32 %v404_v1, %v2979_v63  ;;  %v359_v1 = vsel %vm315_vm1, %v292_v9, 0  ;;  %v3004_v8 = vand.u32 4294901760, %v407_v31 }
  0x70   : > { %v3007_v55 = vand.u32 4294901760, %v359_v1 }
  0x71   : > { %820 = vmatmul.f32.gmra.mxu3 %v2932_v40  ;;  %756 = vmatmul.f32.gmra.mxu1 %v2935_v18  ;;  %v2998_v40 = vsub.f32 %v356_v27, %v2983_v59  ;;  %3831 = vst [vmem:[#allocation12_spill] sm:$0xff] %v3004_v8  ;;  %v3015_v9 = vsub.f32 %v407_v31, %v3004_v8 }
  0x72   : > { %v3021_v4 = vsub.f32 %v359_v1, %v3007_v55 }
  0x73   : > { %v3806_v30 = vand.u32 4294901760, %v2998_v40  ;;  %3832 = vst [vmem:[#allocation13_spill] sm:$0xff] %v3015_v9 }
  0x75   : > { %654 = vmatmul.f32.gmra.mxu2 %v653_v12  ;;  %v3805_v12 = vand.u32 4294901760, %v2988_v14 }
  0x76   : > { %526 = vmatmul.f32.gmra.mxu0 %v525_v19  ;;  %v661_v19 = vand.u32 4294901760, %v660_v49  ;;  %v540_v49 = vsub.f32 %v2998_v40, %v3806_v30  ;;  %v3031_v30 = vand.u32 4294901760, %v362_v54 }
  0x77   : > { %v668_v27 = vsub.f32 %v2988_v14, %v3805_v12  ;;  %v3809_v12 = vand.u32 4294901760, %v3015_v9 }
  0x78   : > { %v541_v31 = vand.u32 4294901760, %v540_v49 }
  0x79   : > { %824 = vmatmul.f32.gmra.mxu3 %v2956_v6  ;;  %760 = vmatmul.f32.gmra.mxu1 %v2959_v47  ;;  %v410_v6 = vsel %vm315_vm1, %v309_v61, 0  ;;  %v669_v36 = vand.u32 4294901760, %v668_v27  ;;  %v676_v1 = vsub.f32 %v3015_v9, %v3809_v12  ;;  %v3043_v27 = vsub.f32 %v362_v54, %v3031_v30 }
  0x7b   : > { %v677_v49 = vand.u32 4294901760, %v676_v1 }
  0x7d   : > { %662 = vmatmul.f32.gmra.mxu2 %v661_v19  ;;  %v3812_v19 = vand.u32 4294901760, %v3021_v4 }
  0x7e   : > { %534 = vmatmul.f32.gmra.mxu0 %v533_v42  ;;  %v3028_v42 = vand.u32 4294901760, %v410_v6 }
  0x7f   : > { %v548_v61 = vsub.f32 %v3021_v4, %v3812_v19 }
  0x80   : > { %3833 = vst [vmem:[#allocation14_spill] sm:$0xff] %v3028_v42  ;;  %v3037_v37 = vsub.f32 %v410_v6, %v3028_v42 }
  0x81   : > { %828 = vmatmul.f32.gmra.mxu3 %v2979_v63  ;;  %764 = vmatmul.f32.gmra.mxu1 %v2983_v59  ;;  %v549_v12 = vand.u32 4294901760, %v548_v61 }
  0x82   : > { %3834 = vst [vmem:[#allocation15_spill] sm:$0xff] %v3037_v37  ;;  %v3810_v63 = vand.u32 4294901760, %v3037_v37 }
  0x84   : > { %v684_v6 = vsub.f32 %v3037_v37, %v3810_v63  ;;  %v3838_v37 = vand.u32 4294901760, %v2734_v43 }
  0x85   : > { %670 = vmatmul.f32.gmra.mxu2 %v669_v36  ;;  %v3811_v36 = vand.u32 4294901760, %v3043_v27 }
  0x86   : > { %542 = vmatmul.f32.gmra.mxu0 %v541_v31  ;;  %v685_v31 = vand.u32 4294901760, %v684_v6 }
  0x87   : > { %v556_v54 = vsub.f32 %v3043_v27, %v3811_v36  ;;  %v3068_v36 = vld [vmem:[%s3759_s3] ss:$0 sm:$0xff] }
  0x89   : > { %832 = vmatmul.f32.gmra.mxu3 %v3004_v8  ;;  %768 = vmatmul.f32.gmra.mxu1 %v3007_v55  ;;  %v557_v1 = vand.u32 4294901760, %v556_v54 }
  0x8d   : > { %678 = vmatmul.f32.gmra.mxu2 %v677_v49  ;;  %v3835_v49 = vand.u32 4294901760, %v2697_v23 }
  0x8e   : > { %550 = vmatmul.f32.gmra.mxu0 %v549_v12 }
  0x91   : > { %836 = vmatmul.f32.gmra.mxu3 %v3028_v42  ;;  %772 = vmatmul.f32.gmra.mxu1 %v3031_v30 }
  0x95   : > { %686 = vmatmul.f32.gmra.mxu2 %v685_v31  ;;  %v3836_v31 = vand.u32 4294901760, %v2709_v29 }
  0x96   : > { %558 = vmatmul.f32.gmra.mxu0 %v557_v1  ;;  %v3057_v61 = vpop.f32.mrf.mxu1 }
  0x99   : > { %1039 = vmatmul.f32.vlgmr.msrb.gmra.mxu3 %v3835_v49  ;;  %1395 = vmatmul.f32.vlgmr.msrb.gmra.mxu1 %v2685_v16 }
  0x9b   : > { %v3062_v12 = vpop.f32.mrf.mxu0 }
  0x9c   : > { %v777_v63 = vpop.f32.mrf.mxu3 }
  0x9d   : > { %860 = vmatmul.f32.vlgmr.msrb.gmra.mxu2 %v2697_v23 }
  0x9e   : > { %1249 = vmatmul.f32.vlgmr.msrb.gmra.mxu0 %v2685_v16  ;;  %v3071_v6 = vpop.f32.mrf.mxu1 }
  0xa0   : > { %v567_v54 = vpop.f32.mrf.mxu2 }
  0xa1   : > { %1045 = vmatmul.f32.gmra.mxu3 %v3836_v31  ;;  %1399 = vmatmul.f32.gmra.mxu1 %v2699_v24  ;;  %v568_v1 = vadd.f32 %v3068_v36, %v567_v54 }
  0xa3   : > { %v3077_v49 = vpop.f32.mrf.mxu0  ;;  %v3079_v23 = vadd.f32 %v777_v63, %v568_v1  ;;  %v3840_v1 = vand.u32 4294901760, %v2758_v57 }
  0xa4   : > { %v781_v19 = vpop.f32.mrf.mxu3 }
  0xa5   : > { %3837 = vst [vmem:[#allocation16_spill] sm:$0xff] %v3079_v23  ;;  %865 = vmatmul.f32.gmra.mxu2 %v2709_v29 }
  0xa6   : > { %1253 = vmatmul.f32.gmra.mxu0 %v2699_v24  ;;  %v3083_v16 = vpop.f32.mrf.mxu1 }
  0xa8   : > { %v575_v42 = vpop.f32.mrf.mxu2 }
  0xa9   : > { %1051 = vmatmul.f32.gmra.mxu3 %v3838_v37  ;;  %1403 = vmatmul.f32.gmra.mxu1 %v2718_v33  ;;  %v576_v31 = vadd.f32 %v3068_v36, %v575_v42 }
  0xab   : > { %v3089_v54 = vpop.f32.mrf.mxu0  ;;  %v3091_v8 = vadd.f32 %v781_v19, %v576_v31  ;;  %v3842_v31 = vand.u32 4294901760, %v2782_v7 }
  0xac   : > { %v785_v63 = vpop.f32.mrf.mxu3 }
  0xad   : > { %3839 = vst [vmem:[#allocation17_spill] sm:$0xff] %v3091_v8  ;;  %870 = vmatmul.f32.gmra.mxu2 %v2734_v43 }
  0xae   : > { %1257 = vmatmul.f32.gmra.mxu0 %v2718_v33  ;;  %v3095_v24 = vpop.f32.mrf.mxu1 }
  0xb0   : > { %v583_v29 = vpop.f32.mrf.mxu2 }
  0xb1   : > { %1057 = vmatmul.f32.gmra.mxu3 %v3840_v1  ;;  %1407 = vmatmul.f32.gmra.mxu1 %v2743_v50  ;;  %v584_v37 = vadd.f32 %v3068_v36, %v583_v29 }
  0xb3   : > { %v3101_v42 = vpop.f32.mrf.mxu0  ;;  %v3103_v23 = vadd.f32 %v785_v63, %v584_v37  ;;  %v3844_v37 = vand.u32 4294901760, %v2805_v32 }
  0xb4   : > { %v789_v19 = vpop.f32.mrf.mxu3 }
  0xb5   : > { %3841 = vst [vmem:[#allocation18_spill] sm:$0xff] %v3103_v23  ;;  %875 = vmatmul.f32.gmra.mxu2 %v2758_v57 }
  0xb6   : > { %1261 = vmatmul.f32.gmra.mxu0 %v2743_v50  ;;  %v3107_v33 = vpop.f32.mrf.mxu1 }
  0xb8   : > { %v591_v43 = vpop.f32.mrf.mxu2 }
  0xb9   : > { %1063 = vmatmul.f32.gmra.mxu3 %v3842_v31  ;;  %1411 = vmatmul.f32.gmra.mxu1 %v2767_v0  ;;  %v592_v1 = vadd.f32 %v3068_v36, %v591_v43 }
  0xbb   : > { %v3113_v29 = vpop.f32.mrf.mxu0  ;;  %v3115_v8 = vadd.f32 %v789_v19, %v592_v1  ;;  %v3846_v1 = vand.u32 4294901760, %v2830_v56 }
  0xbc   : > { %v793_v63 = vpop.f32.mrf.mxu3 }
  0xbd   : > { %3843 = vst [vmem:[#allocation19_spill] sm:$0xff] %v3115_v8  ;;  %880 = vmatmul.f32.gmra.mxu2 %v2782_v7 }
  0xbe   : > { %1265 = vmatmul.f32.gmra.mxu0 %v2767_v0  ;;  %v3119_v50 = vpop.f32.mrf.mxu1 }
  0xc0   : > { %v599_v57 = vpop.f32.mrf.mxu2 }
  0xc1   : > { %1069 = vmatmul.f32.gmra.mxu3 %v3844_v37  ;;  %1415 = vmatmul.f32.gmra.mxu1 %v2791_v17  ;;  %v600_v31 = vadd.f32 %v3068_v36, %v599_v57 }
  0xc3   : > { %v3125_v43 = vpop.f32.mrf.mxu0  ;;  %v3127_v23 = vadd.f32 %v793_v63, %v600_v31  ;;  %v3848_v31 = vand.u32 4294901760, %v2854_v21 }
  0xc4   : > { %v797_v19 = vpop.f32.mrf.mxu3 }
  0xc5   : > { %3845 = vst [vmem:[#allocation20_spill] sm:$0xff] %v3127_v23  ;;  %885 = vmatmul.f32.gmra.mxu2 %v2805_v32 }
  0xc6   : > { %1269 = vmatmul.f32.gmra.mxu0 %v2791_v17  ;;  %v3131_v0 = vpop.f32.mrf.mxu1 }
  0xc8   : > { %v607_v7 = vpop.f32.mrf.mxu2 }
  0xc9   : > { %1075 = vmatmul.f32.gmra.mxu3 %v3846_v1  ;;  %1419 = vmatmul.f32.gmra.mxu1 %v2815_v44  ;;  %v608_v37 = vadd.f32 %v3068_v36, %v607_v7 }
  0xcb   : > { %v3137_v57 = vpop.f32.mrf.mxu0  ;;  %v3139_v8 = vadd.f32 %v797_v19, %v608_v37  ;;  %v3850_v37 = vand.u32 4294901760, %v2877_v2 }
  0xcc   : > { %v801_v63 = vpop.f32.mrf.mxu3 }
  0xcd   : > { %3847 = vst [vmem:[#allocation21_spill] sm:$0xff] %v3139_v8  ;;  %890 = vmatmul.f32.gmra.mxu2 %v2830_v56 }
  0xce   : > { %1273 = vmatmul.f32.gmra.mxu0 %v2815_v44  ;;  %v3143_v17 = vpop.f32.mrf.mxu1 }
  0xd0   : > { %v615_v32 = vpop.f32.mrf.mxu2 }
  0xd1   : > { %1081 = vmatmul.f32.gmra.mxu3 %v3848_v31  ;;  %1423 = vmatmul.f32.gmra.mxu1 %v2839_v5  ;;  %v616_v1 = vadd.f32 %v3068_v36, %v615_v32 }
  0xd3   : > { %v3149_v7 = vpop.f32.mrf.mxu0  ;;  %v3151_v23 = vadd.f32 %v801_v63, %v616_v1  ;;  %v3852_v1 = vand.u32 4294901760, %v2902_v38 }
  0xd4   : > { %v805_v19 = vpop.f32.mrf.mxu3 }
  0xd5   : > { %3849 = vst [vmem:[#allocation22_spill] sm:$0xff] %v3151_v23  ;;  %895 = vmatmul.f32.gmra.mxu2 %v2854_v21 }
  0xd6   : > { %1277 = vmatmul.f32.gmra.mxu0 %v2839_v5  ;;  %v3155_v44 = vpop.f32.mrf.mxu1 }
  0xd8   : > { %v623_v56 = vpop.f32.mrf.mxu2 }
  0xd9   : > { %1087 = vmatmul.f32.gmra.mxu3 %v3850_v37  ;;  %1427 = vmatmul.f32.gmra.mxu1 %v2863_v48  ;;  %v624_v31 = vadd.f32 %v3068_v36, %v623_v56 }
  0xdb   : > { %v3161_v32 = vpop.f32.mrf.mxu0  ;;  %v3163_v8 = vadd.f32 %v805_v19, %v624_v31  ;;  %v3854_v31 = vand.u32 4294901760, %v2926_v26 }
  0xdc   : > { %v809_v63 = vpop.f32.mrf.mxu3 }
  0xdd   : > { %3851 = vst [vmem:[#allocation23_spill] sm:$0xff] %v3163_v8  ;;  %900 = vmatmul.f32.gmra.mxu2 %v2877_v2 }
  0xde   : > { %1281 = vmatmul.f32.gmra.mxu0 %v2863_v48  ;;  %v3167_v5 = vpop.f32.mrf.mxu1 }
  0xe0   : > { %v631_v21 = vpop.f32.mrf.mxu2 }
  0xe1   : > { %1093 = vmatmul.f32.gmra.mxu3 %v3852_v1  ;;  %1431 = vmatmul.f32.gmra.mxu1 %v2887_v35  ;;  %v632_v37 = vadd.f32 %v3068_v36, %v631_v21 }
  0xe3   : > { %v3173_v56 = vpop.f32.mrf.mxu0  ;;  %v3175_v23 = vadd.f32 %v809_v63, %v632_v37  ;;  %v3856_v37 = vand.u32 4294901760, %v2949_v51 }
  0xe4   : > { %v813_v19 = vpop.f32.mrf.mxu3 }
  0xe5   : > { %3853 = vst [vmem:[#allocation24_spill] sm:$0xff] %v3175_v23  ;;  %905 = vmatmul.f32.gmra.mxu2 %v2902_v38 }
  0xe6   : > { %1285 = vmatmul.f32.gmra.mxu0 %v2887_v35  ;;  %v3179_v48 = vpop.f32.mrf.mxu1 }
  0xe8   : > { %v639_v2 = vpop.f32.mrf.mxu2 }
  0xe9   : > { %1099 = vmatmul.f32.gmra.mxu3 %v3854_v31  ;;  %1435 = vmatmul.f32.gmra.mxu1 %v2911_v45  ;;  %v640_v1 = vadd.f32 %v3068_v36, %v639_v2 }
  0xeb   : > { %v3185_v21 = vpop.f32.mrf.mxu0  ;;  %v3187_v8 = vadd.f32 %v813_v19, %v640_v1  ;;  %v3858_v1 = vand.u32 4294901760, %v2974_v34 }
  0xec   : > { %v817_v63 = vpop.f32.mrf.mxu3 }
  0xed   : > { %3855 = vst [vmem:[#allocation25_spill] sm:$0xff] %v3187_v8  ;;  %910 = vmatmul.f32.gmra.mxu2 %v2926_v26 }
  0xee   : > { %1289 = vmatmul.f32.gmra.mxu0 %v2911_v45  ;;  %v3191_v38 = vpop.f32.mrf.mxu1 }
  0xf0   : > { %v647_v35 = vpop.f32.mrf.mxu2 }
  0xf1   : > { %1105 = vmatmul.f32.gmra.mxu3 %v3856_v37  ;;  %1439 = vmatmul.f32.gmra.mxu1 %v2935_v18  ;;  %v648_v31 = vadd.f32 %v3068_v36, %v647_v35 }
  0xf3   : > { %v3197_v2 = vpop.f32.mrf.mxu0  ;;  %v3199_v23 = vadd.f32 %v817_v63, %v648_v31  ;;  %v3861_v31 = vand.u32 4294901760, %v2998_v40 }
  0xf4   : > { %v821_v19 = vpop.f32.mrf.mxu3 }
  0xf5   : > { %3857 = vst [vmem:[#allocation26_spill] sm:$0xff] %v3199_v23  ;;  %915 = vmatmul.f32.gmra.mxu2 %v2949_v51 }
  0xf6   : > { %1293 = vmatmul.f32.gmra.mxu0 %v2935_v18  ;;  %v3203_v26 = vpop.f32.mrf.mxu1 }
  0xf8   : > { %v655_v45 = vpop.f32.mrf.mxu2 }
  0xf9   : > { %1111 = vmatmul.f32.gmra.mxu3 %v3858_v1  ;;  %1443 = vmatmul.f32.gmra.mxu1 %v2959_v47  ;;  %v656_v37 = vadd.f32 %v3068_v36, %v655_v45 }
  0xfb   : > { %v3209_v35 = vpop.f32.mrf.mxu0  ;;  %v3211_v8 = vadd.f32 %v821_v19, %v656_v37  ;;  %v3864_v37 = vand.u32 4294901760, %v3021_v4 }
  0xfc   : > { %v825_v63 = vpop.f32.mrf.mxu3 }
  0xfd   : > { %3859 = vst [vmem:[#allocation27_spill] sm:$0xff] %v3211_v8  ;;  %920 = vmatmul.f32.gmra.mxu2 %v2974_v34 }
  0xfe   : > { %1297 = vmatmul.f32.gmra.mxu0 %v2959_v47  ;;  %v3215_v18 = vpop.f32.mrf.mxu1 }
  0xff   : > { %3860 = vst [vmem:[#allocation28_spill] sm:$0xff] %v3215_v18 }
 0x100   : > { %v663_v51 = vpop.f32.mrf.mxu2 }
 0x101   : > { %1117 = vmatmul.f32.gmra.mxu3 %v3861_v31  ;;  %1447 = vmatmul.f32.gmra.mxu1 %v2983_v59  ;;  %v664_v1 = vadd.f32 %v3068_v36, %v663_v51 }
 0x103   : > { %v3221_v45 = vpop.f32.mrf.mxu0  ;;  %v3223_v23 = vadd.f32 %v825_v63, %v664_v1  ;;  %v3868_v1 = vand.u32 4294901760, %v3043_v27 }
 0x104   : > { %v829_v19 = vpop.f32.mrf.mxu3 }
 0x105   : > { %3862 = vst [vmem:[#allocation29_spill] sm:$0xff] %v3223_v23  ;;  %925 = vmatmul.f32.gmra.mxu2 %v2998_v40 }
 0x106   : > { %1301 = vmatmul.f32.gmra.mxu0 %v2983_v59  ;;  %v3227_v34 = vpop.f32.mrf.mxu1 }
 0x107   : > { %3863 = vst [vmem:[#allocation30_spill] sm:$0xff] %v3227_v34 }
 0x108   : > { %v671_v47 = vpop.f32.mrf.mxu2 }
 0x109   : > { %1123 = vmatmul.f32.gmra.mxu3 %v3864_v37  ;;  %1451 = vmatmul.f32.gmra.mxu1 %v3007_v55  ;;  %v672_v31 = vadd.f32 %v3068_v36, %v671_v47 }
 0x10b   : > { %v3233_v51 = vpop.f32.mrf.mxu0  ;;  %v3235_v8 = vadd.f32 %v829_v19, %v672_v31 }
 0x10c   : > { %3865 = vst [vmem:[#allocation31_spill] sm:$0xff] %v3233_v51  ;;  %v833_v63 = vpop.f32.mrf.mxu3 }
 0x10d   : > { %3866 = vst [vmem:[#allocation32_spill] sm:$0xff] %v3235_v8  ;;  %930 = vmatmul.f32.gmra.mxu2 %v3021_v4  ;;  %v3871_v8 = vand.u32 4294901760, %v2691_v20 }
 0x10e   : > { %1305 = vmatmul.f32.gmra.mxu0 %v3007_v55  ;;  %v3239_v40 = vpop.f32.mrf.mxu1 }
 0x10f   : > { %3867 = vst [vmem:[#allocation33_spill] sm:$0xff] %v3239_v40 }
 0x110   : > { %v679_v59 = vpop.f32.mrf.mxu2 }
 0x111   : > { %1129 = vmatmul.f32.gmra.mxu3 %v3868_v1  ;;  %1455 = vmatmul.f32.gmra.mxu1 %v3031_v30  ;;  %v680_v47 = vadd.f32 %v3068_v36, %v679_v59 }
 0x113   : > { %v3245_v37 = vpop.f32.mrf.mxu0  ;;  %v3247_v19 = vadd.f32 %v833_v63, %v680_v47  ;;  %v440_v63 = vadd.f32 %v3068_v36, %v3062_v12  ;;  %v3873_v12 = vand.u32 4294901760, %v2694_v22 }
 0x114   : > { %3869 = vst [vmem:[#allocation34_spill] sm:$0xff] %v3245_v37  ;;  %v837_v31 = vpop.f32.mrf.mxu3 }
 0x115   : > { %3870 = vst [vmem:[#allocation35_spill] sm:$0xff] %v3247_v19  ;;  %935 = vmatmul.f32.gmra.mxu2 %v3043_v27 }
 0x116   : > { %1309 = vmatmul.f32.gmra.mxu0 %v3031_v30  ;;  %v1396_v55 = vpop.f32.mrf.mxu1  ;;  %v714_v30 = vadd.f32 %v3057_v61, %v440_v63  ;;  %v448_v61 = vadd.f32 %v3068_v36, %v3077_v49  ;;  %v3874_v49 = vand.u32 4294901760, %v2724_v39 }
 0x118   : > { %v687_v4 = vpop.f32.mrf.mxu2  ;;  %v718_v34 = vadd.f32 %v3071_v6, %v448_v61 }
 0x119   : > { %1135 = vmatmul.f32.gmra.mxu3 %v3871_v8  ;;  %1459 = vmatmul.f32.gmra.mxu1 %v2681_v13  ;;  %v688_v1 = vadd.f32 %v3068_v36, %v687_v4  ;;  %v3269_v4 = vld [vmem:[%s3264_s30] sm:$0xff] }
 0x11a   : > { %v1540_v19 = vrot.slane %v3269_v4, 2  ;;  %v1543_v18 = vrot.slane %v3269_v4, 5 }
 0x11b   : > { %v1250_v23 = vpop.f32.mrf.mxu0  ;;  %v3258_v59 = vadd.f32 %v837_v31, %v688_v1 }
 0x11c   : > { %v1040_v47 = vpop.f32.mrf.mxu3 }
 0x11d   : > { %3872 = vst [vmem:[#allocation36_spill] sm:$0xff] %v3258_v59  ;;  %940 = vmatmul.f32.gmra.mxu2 %v2691_v20  ;;  %v1539_v59 = vrot.slane %v3269_v4, 1 }
 0x11e   : > { %1313 = vmatmul.f32.gmra.mxu0 %v2681_v13  ;;  %v1400_v8 = vpop.f32.mrf.mxu1  ;;  %v1541_v13 = vrot.slane %v3269_v4, 3 }
 0x120   : > { %v861_v27 = vpop.f32.mrf.mxu2  ;;  %v3288_v37 = vperm.slane %v1541_v13, 0  ;;  %v456_v13 = vadd.f32 %v3068_v36, %v3089_v54 }
 0x121   : > { %1141 = vmatmul.f32.gmra.mxu3 %v3873_v12  ;;  %1463 = vmatmul.f32.gmra.mxu1 %v2683_v15  ;;  %v862_v20 = vadd.f32 %v861_v27, %v714_v30  ;;  %v1595_v12 = vperm.slane %v3269_v4, 0  ;;  %v3284_v27 = vperm.slane %v1539_v59, 0 }
 0x123   : > { %v1254_v31 = vpop.f32.mrf.mxu0  ;;  %v1041_v1 = vadd.f32 %v1040_v47, %v862_v20  ;;  %v3286_v20 = vperm.slane %v1540_v19, 0  ;;  %v1542_v19 = vrot.slane %v3269_v4, 4 }
 0x124   : > { %v1046_v40 = vpop.f32.mrf.mxu3 }
 0x125   : > { %v1251_v63 = vadd.f32 %v1250_v23, %v1041_v1  ;;  %945 = vmatmul.f32.gmra.mxu2 %v2694_v22 }
 0x126   : > { %1317 = vmatmul.f32.gmra.mxu0 %v2683_v15  ;;  %v3282_v30 = vpop.f32.mrf.mxu1 }
 0x127   : > { %v1397_v47 = vadd.f32 %v1396_v55, %v1251_v63 }
 0x128   : > { %v866_v51 = vpop.f32.mrf.mxu2 }
 0x129   : > { %1147 = vmatmul.f32.gmra.mxu3 %v3874_v49  ;;  %1467 = vmatmul.f32.gmra.mxu1 %v2706_v28  ;;  %v1755_v22 = vrot.slane %v1397_v47, 2  ;;  %v1756_v23 = vrot.slane %v1397_v47, 4  ;;  %v1757_v15 = vrot.slane %v1397_v47, 6  ;;  %v1947_v55 = vadd.f32 %v1595_v12, %v1397_v47 }
 0x12a   : > { %v867_v59 = vadd.f32 %v866_v51, %v718_v34  ;;  %v1544_v47 = vrot.slane %v3269_v4, 6  ;;  %v1545_v34 = vrot.slane %v3269_v4, 7 }
 0x12b   : > { %v1258_v1 = vpop.f32.mrf.mxu0  ;;  %v1948_v6 = vadd.f32 %v1755_v22, %v3284_v27  ;;  %v1949_v61 = vadd.f32 %v1756_v23, %v3286_v20  ;;  %v1950_v63 = vadd.f32 %v1757_v15, %v3288_v37  ;;  %2203 = vst [vmem:[#allocation1] ss:$4 sm:$0xff] %v1947_v55  ;;  %v3309_v22 = vperm.slane %v1542_v19, 0 }
 0x12c   : > { %v1052_v49 = vpop.f32.mrf.mxu3  ;;  %v1047_v9 = vadd.f32 %v1046_v40, %v867_v59  ;;  %v722_v23 = vadd.f32 %v3083_v16, %v456_v13  ;;  %v3312_v15 = vperm.slane %v1543_v18, 0  ;;  %v3314_v55 = vperm.slane %v1544_v47, 0 }
 0x12d   : > { %2205 = vst [vmem:[#allocation1 + $0x1] ss:$4 sm:$0xff] %v1948_v6  ;;  %950 = vmatmul.f32.gmra.mxu2 %v2724_v39  ;;  %v3316_v59 = vperm.slane %v1545_v34, 0  ;;  %v3875_v39 = vand.u32 4294901760, %v2748_v53 }
 0x12e   : > { %1321 = vmatmul.f32.gmra.mxu0 %v2706_v28  ;;  %v3307_v54 = vpop.f32.mrf.mxu1  ;;  %2207 = vst [vmem:[#allocation1 + $0x2] ss:$4 sm:$0xff] %v1949_v61  ;;  %v1255_v51 = vadd.f32 %v1254_v31, %v1047_v9  ;;  %v464_v61 = vadd.f32 %v3068_v36, %v3101_v42 }
 0x12f   : > { %2209 = vst [vmem:[#allocation1 + $0x3] ss:$4 sm:$0xff] %v1950_v63 }
 0x130   : > { %v1401_v40 = vadd.f32 %v1400_v8, %v1255_v51  ;;  %v871_v6 = vpop.f32.mrf.mxu2 }
 0x131   : > { %1153 = vmatmul.f32.gmra.mxu3 %v3875_v39  ;;  %1471 = vmatmul.f32.gmra.mxu1 %v2740_v46  ;;  %v872_v28 = vadd.f32 %v871_v6, %v722_v23 }
 0x132   : > { %v1758_v9 = vrot.slane %v1401_v40, 2  ;;  %v1759_v31 = vrot.slane %v1401_v40, 4  ;;  %v1760_v19 = vrot.slane %v1401_v40, 6  ;;  %v1951_v16 = vadd.f32 %v3309_v22, %v1401_v40 }
 0x133   : > { %v1262_v8 = vpop.f32.mrf.mxu0  ;;  %v1053_v18 = vadd.f32 %v1052_v49, %v872_v28 }
 0x134   : > { %v1058_v13 = vpop.f32.mrf.mxu3  ;;  %v1952_v63 = vadd.f32 %v1758_v9, %v3312_v15  ;;  %v1953_v47 = vadd.f32 %v1759_v31, %v3314_v55  ;;  %v1954_v34 = vadd.f32 %v1760_v19, %v3316_v59  ;;  %2211 = vst [vmem:[#allocation1 + $0x20] ss:$4 sm:$0xff] %v1951_v16 }
 0x135   : > { %v1259_v51 = vadd.f32 %v1258_v1, %v1053_v18  ;;  %955 = vmatmul.f32.gmra.mxu2 %v2748_v53  ;;  %v726_v1 = vadd.f32 %v3095_v24, %v464_v61  ;;  %v472_v24 = vadd.f32 %v3068_v36, %v3113_v29 }
 0x136   : > { %1325 = vmatmul.f32.gmra.mxu0 %v2740_v46  ;;  %v3329_v23 = vpop.f32.mrf.mxu1  ;;  %v2218_v42 = vld.sshfl [vmem:[#allocation1] sm:$0xff pattern:$0x73625140]  ;;  %2213 = vst [vmem:[#allocation1 + $0x21] ss:$4 sm:$0xff] %v1952_v63  ;;  %v3876_v46 = vand.u32 4294901760, %v2772_v3 }
 0x137   : > { %2215 = vst [vmem:[#allocation1 + $0x22] ss:$4 sm:$0xff] %v1953_v47  ;;  %v1405_v49 = vadd.f32 %v3282_v30, %v1259_v51  ;;  %v3359_v63 = vld [vmem:[%s3264_s30 + $0x8] sm:$0xff] }
 0x138   : > { %2217 = vst [vmem:[#allocation1 + $0x23] ss:$4 sm:$0xff] %v1954_v34  ;;  %v876_v53 = vpop.f32.mrf.mxu2 }
 0x139   : > { %1159 = vmatmul.f32.gmra.mxu3 %v3876_v46  ;;  %1475 = vmatmul.f32.gmra.mxu1 %v2764_v60  ;;  %v1761_v40 = vrot.slane %v1405_v49, 2  ;;  %v1762_v6 = vrot.slane %v1405_v49, 4  ;;  %v1763_v39 = vrot.slane %v1405_v49, 6  ;;  %v1955_v28 = vadd.f32 %v1595_v12, %v1405_v49  ;;  %2403 = vst.msk [vmem:[%s3336_s7] sm:$0xff] %vm2402_vm2, %v2218_v42 }
 0x13a   : > { %v877_v9 = vadd.f32 %v876_v53, %v726_v1  ;;  %v730_v12 = vadd.f32 %v3107_v33, %v472_v24  ;;  %v1547_v42 = vrot.slane %v3359_v63, 2  ;;  %v1548_v49 = vrot.slane %v3359_v63, 3 }
 0x13b   : > { %v1266_v31 = vpop.f32.mrf.mxu0  ;;  %v1956_v30 = vadd.f32 %v1761_v40, %v3284_v27  ;;  %v1957_v19 = vadd.f32 %v1762_v6, %v3286_v20  ;;  %v1958_v16 = vadd.f32 %v1763_v39, %v3288_v37  ;;  %2220 = vst [vmem:[#allocation1] ss:$4 sm:$0xff] %v1955_v28  ;;  %v480_v53 = vadd.f32 %v3068_v36, %v3125_v43 }
 0x13c   : > { %v1064_v18 = vpop.f32.mrf.mxu3  ;;  %v1059_v61 = vadd.f32 %v1058_v13, %v877_v9  ;;  %v3877_v13 = vand.u32 4294901760, %v2799_v25  ;;  %v1603_v39 = vperm.slane %v3359_v63, 0 }
 0x13d   : > { %2221 = vst [vmem:[#allocation1 + $0x1] ss:$4 sm:$0xff] %v1956_v30  ;;  %960 = vmatmul.f32.gmra.mxu2 %v2772_v3 }
 0x13e   : > { %1329 = vmatmul.f32.gmra.mxu0 %v2764_v60  ;;  %v3354_v4 = vpop.f32.mrf.mxu1  ;;  %2222 = vst [vmem:[#allocation1 + $0x2] ss:$4 sm:$0xff] %v1957_v19  ;;  %v1263_v29 = vadd.f32 %v1262_v8, %v1059_v61 }
 0x13f   : > { %v2219_v27 = vld.sshfl [vmem:[#allocation1 + $0x20] sm:$0xff pattern:$0x73625140]  ;;  %2223 = vst [vmem:[#allocation1 + $0x3] ss:$4 sm:$0xff] %v1958_v16 }
 0x140   : > { %v1409_v20 = vadd.f32 %v3307_v54, %v1263_v29  ;;  %v881_v37 = vpop.f32.mrf.mxu2  ;;  %2404 = vst.msk [vmem:[%s3336_s7 + $0x8] sm:$0xff] %vm2402_vm2, %v2219_v27  ;;  %v1546_v54 = vrot.slane %v3359_v63, 1 }
 0x141   : > { %1165 = vmatmul.f32.gmra.mxu3 %v3877_v13  ;;  %1479 = vmatmul.f32.gmra.mxu1 %v2788_v10  ;;  %v882_v60 = vadd.f32 %v881_v37, %v730_v12  ;;  %v1550_v13 = vrot.slane %v3359_v63, 5 }
 0x142   : > { %v1764_v3 = vrot.slane %v1409_v20, 2  ;;  %v1765_v47 = vrot.slane %v1409_v20, 4  ;;  %v1766_v8 = vrot.slane %v1409_v20, 6  ;;  %v1959_v33 = vadd.f32 %v3309_v22, %v1409_v20 }
 0x143   : > { %v1270_v34 = vpop.f32.mrf.mxu0  ;;  %v1065_v51 = vadd.f32 %v1064_v18, %v882_v60  ;;  %v1549_v18 = vrot.slane %v3359_v63, 4  ;;  %v1551_v60 = vrot.slane %v3359_v63, 6 }
 0x144   : > { %v1070_v1 = vpop.f32.mrf.mxu3  ;;  %v1960_v46 = vadd.f32 %v1764_v3, %v3312_v15  ;;  %v1961_v40 = vadd.f32 %v1765_v47, %v3314_v55  ;;  %v1962_v6 = vadd.f32 %v1766_v8, %v3316_v59  ;;  %2224 = vst [vmem:[#allocation1 + $0x20] ss:$4 sm:$0xff] %v1959_v33  ;;  %v3381_v15 = vperm.slane %v1546_v54, 0 }
 0x145   : > { %v1267_v22 = vadd.f32 %v1266_v31, %v1065_v51  ;;  %965 = vmatmul.f32.gmra.mxu2 %v2799_v25  ;;  %v3383_v55 = vperm.slane %v1547_v42, 0  ;;  %v3385_v59 = vperm.slane %v1548_v49, 0  ;;  %v734_v25 = vadd.f32 %v3119_v50, %v480_v53 }
 0x146   : > { %1333 = vmatmul.f32.gmra.mxu0 %v2788_v10  ;;  %v3378_v28 = vpop.f32.mrf.mxu1  ;;  %v2228_v9 = vld.sshfl [vmem:[#allocation1] sm:$0xff pattern:$0x73625140]  ;;  %2225 = vst [vmem:[#allocation1 + $0x21] ss:$4 sm:$0xff] %v1960_v46  ;;  %v3878_v10 = vand.u32 4294901760, %v2823_v52  ;;  %v488_v50 = vadd.f32 %v3068_v36, %v3137_v57 }
 0x147   : > { %2226 = vst [vmem:[#allocation1 + $0x22] ss:$4 sm:$0xff] %v1961_v40  ;;  %v1413_v43 = vadd.f32 %v3329_v23, %v1267_v22  ;;  %v1552_v3 = vrot.slane %v3359_v63, 7  ;;  %v3408_v8 = vperm.slane %v1549_v18, 0  ;;  %v3412_v42 = vperm.slane %v1550_v13, 0  ;;  %v3881_v18 = vld [vmem:[#allocation2_spill] sm:$0xff] }
 0x148   : > { %2227 = vst [vmem:[#allocation1 + $0x23] ss:$4 sm:$0xff] %v1962_v6  ;;  %v886_v31 = vpop.f32.mrf.mxu2  ;;  %v738_v33 = vadd.f32 %v3131_v0, %v488_v50  ;;  %v3414_v49 = vperm.slane %v1551_v60, 0  ;;  %v3454_v60 = vld [vmem:[%s3264_s30 + $0x10] sm:$0xff] }
 0x149   : > { %1171 = vmatmul.f32.gmra.mxu3 %v3878_v10  ;;  %1483 = vmatmul.f32.gmra.mxu1 %v2812_v41  ;;  %v1767_v24 = vrot.slane %v1413_v43, 2  ;;  %v1768_v30 = vrot.slane %v1413_v43, 4  ;;  %v1769_v19 = vrot.slane %v1413_v43, 6  ;;  %v1963_v23 = vadd.f32 %v1603_v39, %v1413_v43  ;;  %2405 = vst.msk [vmem:[%s3336_s7 + $0x10] sm:$0xff] %vm2402_vm2, %v2228_v9 }
 0x14a   : > { %v887_v16 = vadd.f32 %v886_v31, %v734_v25  ;;  %v496_v9 = vadd.f32 %v3068_v36, %v3149_v7 }
 0x14b   : > { %v1274_v61 = vpop.f32.mrf.mxu0  ;;  %v1964_v29 = vadd.f32 %v1767_v24, %v3381_v15  ;;  %v1965_v12 = vadd.f32 %v1768_v30, %v3383_v55  ;;  %v1966_v27 = vadd.f32 %v1769_v19, %v3385_v59  ;;  %2230 = vst [vmem:[#allocation1] ss:$4 sm:$0xff] %v1963_v23 }
 0x14c   : > { %v1076_v20 = vpop.f32.mrf.mxu3  ;;  %v1071_v37 = vadd.f32 %v1070_v1, %v887_v16  ;;  %v742_v19 = vadd.f32 %v3143_v17, %v496_v9  ;;  %v3880_v16 = vand.u32 4294901760, %v2871_v58  ;;  %v504_v17 = vadd.f32 %v3068_v36, %v3161_v32 }
 0x14d   : > { %2231 = vst [vmem:[#allocation1 + $0x1] ss:$4 sm:$0xff] %v1964_v29  ;;  %970 = vmatmul.f32.gmra.mxu2 %v2823_v52  ;;  %v3416_v52 = vperm.slane %v1552_v3, 0  ;;  %v3882_v3 = vld [vmem:[#allocation4_spill] sm:$0xff]  ;;  %v1611_v9 = vperm.slane %v3454_v60, 0 }
 0x14e   : > { %1337 = vmatmul.f32.gmra.mxu0 %v2812_v41  ;;  %v3406_v57 = vpop.f32.mrf.mxu1  ;;  %2232 = vst [vmem:[#allocation1 + $0x2] ss:$4 sm:$0xff] %v1965_v12  ;;  %v1271_v47 = vadd.f32 %v1270_v34, %v1071_v37  ;;  %v3879_v41 = vand.u32 4294901760, %v2844_v11 }
 0x14f   : > { %v2229_v51 = vld.sshfl [vmem:[#allocation1 + $0x20] sm:$0xff pattern:$0x73625140]  ;;  %2233 = vst [vmem:[#allocation1 + $0x3] ss:$4 sm:$0xff] %v1966_v27 }
 0x150   : > { %v1417_v54 = vadd.f32 %v3354_v4, %v1271_v47  ;;  %v891_v1 = vpop.f32.mrf.mxu2  ;;  %2406 = vst.msk [vmem:[%s3336_s7 + $0x18] sm:$0xff] %vm2402_vm2, %v2229_v51  ;;  %v3883_v47 = vand.u32 4294901760, %v3882_v3 }
 0x151   : > { %1177 = vmatmul.f32.gmra.mxu3 %v3879_v41  ;;  %1487 = vmatmul.f32.gmra.mxu1 %v2835_v62  ;;  %v892_v34 = vadd.f32 %v891_v1, %v738_v33  ;;  %v3884_v33 = vld [vmem:[#allocation3_spill] sm:$0xff] }
 0x152   : > { %v1770_v0 = vrot.slane %v1417_v54, 2  ;;  %v1771_v53 = vrot.slane %v1417_v54, 4  ;;  %v1772_v46 = vrot.slane %v1417_v54, 6  ;;  %v1967_v4 = vadd.f32 %v3408_v8, %v1417_v54 }
 0x153   : > { %v1278_v40 = vpop.f32.mrf.mxu0  ;;  %v1077_v6 = vadd.f32 %v1076_v20, %v892_v34 }
 0x154   : > { %v1082_v22 = vpop.f32.mrf.mxu3  ;;  %v1968_v43 = vadd.f32 %v1770_v0, %v3412_v42  ;;  %v1969_v25 = vadd.f32 %v1771_v53, %v3414_v49  ;;  %v1970_v31 = vadd.f32 %v1772_v46, %v3416_v52  ;;  %2234 = vst [vmem:[#allocation1 + $0x20] ss:$4 sm:$0xff] %v1967_v4  ;;  %v1554_v0 = vrot.slane %v3454_v60, 2 }
 0x155   : > { %v1275_v10 = vadd.f32 %v1274_v61, %v1077_v6  ;;  %975 = vmatmul.f32.gmra.mxu2 %v2844_v11  ;;  %v1555_v53 = vrot.slane %v3454_v60, 3  ;;  %v512_v4 = vadd.f32 %v3068_v36, %v3173_v56 }
 0x156   : > { %1341 = vmatmul.f32.gmra.mxu0 %v2835_v62  ;;  %v3431_v24 = vpop.f32.mrf.mxu1  ;;  %v2238_v30 = vld.sshfl [vmem:[#allocation1] sm:$0xff pattern:$0x73625140]  ;;  %2235 = vst [vmem:[#allocation1 + $0x21] ss:$4 sm:$0xff] %v1968_v43 }
 0x157   : > { %2236 = vst [vmem:[#allocation1 + $0x22] ss:$4 sm:$0xff] %v1969_v25  ;;  %v1421_v7 = vadd.f32 %v3378_v28, %v1275_v10 }
 0x158   : > { %2237 = vst [vmem:[#allocation1 + $0x23] ss:$4 sm:$0xff] %v1970_v31  ;;  %v896_v23 = vpop.f32.mrf.mxu2  ;;  %v750_v31 = vadd.f32 %v3167_v5, %v512_v4  ;;  %v520_v5 = vadd.f32 %v3068_v36, %v3185_v21 }
 0x159   : > { %1183 = vmatmul.f32.gmra.mxu3 %v3880_v16  ;;  %1491 = vmatmul.f32.gmra.mxu1 %v3881_v18  ;;  %v1773_v11 = vrot.slane %v1421_v7, 2  ;;  %v1774_v61 = vrot.slane %v1421_v7, 4  ;;  %v1775_v50 = vrot.slane %v1421_v7, 6  ;;  %v1971_v62 = vadd.f32 %v1603_v39, %v1421_v7  ;;  %2407 = vst.msk [vmem:[%s3336_s7 + $0x20] sm:$0xff] %vm2402_vm2, %v2238_v30  ;;  %v3885_v30 = vld [vmem:[#allocation6_spill] sm:$0xff] }
 0x15a   : > { %v897_v29 = vadd.f32 %v896_v23, %v742_v19  ;;  %v746_v39 = vadd.f32 %v3155_v44, %v504_v17  ;;  %v3886_v7 = vand.u32 4294901760, %v3885_v30  ;;  %v3887_v19 = vld [vmem:[#allocation5_spill] sm:$0xff] }
 0x15b   : > { %v1282_v12 = vpop.f32.mrf.mxu0  ;;  %v1972_v28 = vadd.f32 %v1773_v11, %v3381_v15  ;;  %v1973_v27 = vadd.f32 %v1774_v61, %v3383_v55  ;;  %v1974_v20 = vadd.f32 %v1775_v50, %v3385_v59  ;;  %2240 = vst [vmem:[#allocation1] ss:$4 sm:$0xff] %v1971_v62  ;;  %v1556_v61 = vrot.slane %v3454_v60, 4 }
 0x15c   : > { %v1088_v37 = vpop.f32.mrf.mxu3  ;;  %v1083_v13 = vadd.f32 %v1082_v22, %v897_v29 }
 0x15d   : > { %2241 = vst [vmem:[#allocation1 + $0x1] ss:$4 sm:$0xff] %v1972_v28  ;;  %980 = vmatmul.f32.gmra.mxu2 %v2871_v58 }
 0x15e   : > { %1345 = vmatmul.f32.gmra.mxu0 %v3881_v18  ;;  %v3449_v63 = vpop.f32.mrf.mxu1  ;;  %2242 = vst [vmem:[#allocation1 + $0x2] ss:$4 sm:$0xff] %v1973_v27  ;;  %v1279_v32 = vadd.f32 %v1278_v40, %v1083_v13  ;;  %v1557_v27 = vrot.slane %v3454_v60, 5 }
 0x15f   : > { %v2239_v15 = vld.sshfl [vmem:[#allocation1 + $0x20] sm:$0xff pattern:$0x73625140]  ;;  %2243 = vst [vmem:[#allocation1 + $0x3] ss:$4 sm:$0xff] %v1974_v20  ;;  %v1558_v20 = vrot.slane %v3454_v60, 6 }
 0x160   : > { %v1425_v55 = vadd.f32 %v3406_v57, %v1279_v32  ;;  %v901_v59 = vpop.f32.mrf.mxu2  ;;  %2408 = vst.msk [vmem:[%s3336_s7 + $0x28] sm:$0xff] %vm2402_vm2, %v2239_v15  ;;  %v1553_v57 = vrot.slane %v3454_v60, 1  ;;  %v3503_v32 = vperm.slane %v1556_v61, 0 }
 0x161   : > { %1189 = vmatmul.f32.gmra.mxu3 %v3883_v47  ;;  %1495 = vmatmul.f32.gmra.mxu1 %v3884_v33  ;;  %v902_v58 = vadd.f32 %v901_v59, %v746_v39  ;;  %v754_v39 = vadd.f32 %v3179_v48, %v520_v5  ;;  %v3507_v59 = vperm.slane %v1557_v27, 0 }
 0x162   : > { %v1776_v51 = vrot.slane %v1425_v55, 2  ;;  %v1777_v54 = vrot.slane %v1425_v55, 4  ;;  %v1778_v1 = vrot.slane %v1425_v55, 6  ;;  %v1975_v44 = vadd.f32 %v3408_v8, %v1425_v55 }
 0x163   : > { %v1286_v41 = vpop.f32.mrf.mxu0  ;;  %v1089_v34 = vadd.f32 %v1088_v37, %v902_v58  ;;  %v1559_v37 = vrot.slane %v3454_v60, 7  ;;  %v3888_v58 = vld [vmem:[#allocation8_spill] sm:$0xff] }
 0x164   : > { %v1094_v46 = vpop.f32.mrf.mxu3  ;;  %v1976_v40 = vadd.f32 %v1776_v51, %v3412_v42  ;;  %v1977_v6 = vadd.f32 %v1777_v54, %v3414_v49  ;;  %v1978_v22 = vadd.f32 %v1778_v1, %v3416_v52  ;;  %2244 = vst [vmem:[#allocation1 + $0x20] ss:$4 sm:$0xff] %v1975_v44  ;;  %v3476_v42 = vperm.slane %v1553_v57, 0  ;;  %v3890_v54 = vld [vmem:[#allocation7_spill] sm:$0xff] }
 0x165   : > { %v1283_v8 = vadd.f32 %v1282_v12, %v1089_v34  ;;  %985 = vmatmul.f32.gmra.mxu2 %v3882_v3  ;;  %v3478_v49 = vperm.slane %v1554_v0, 0  ;;  %v3480_v52 = vperm.slane %v1555_v53, 0  ;;  %v3509_v3 = vperm.slane %v1558_v20, 0 }
 0x166   : > { %1349 = vmatmul.f32.gmra.mxu0 %v3884_v33  ;;  %v3473_v43 = vpop.f32.mrf.mxu1  ;;  %v2248_v25 = vld.sshfl [vmem:[#allocation1] sm:$0xff pattern:$0x73625140]  ;;  %2245 = vst [vmem:[#allocation1 + $0x21] ss:$4 sm:$0xff] %v1976_v40  ;;  %v3511_v47 = vperm.slane %v1559_v37, 0  ;;  %v528_v53 = vadd.f32 %v3068_v36, %v3197_v2 }
 0x167   : > { %2246 = vst [vmem:[#allocation1 + $0x22] ss:$4 sm:$0xff] %v1977_v6  ;;  %v1429_v56 = vadd.f32 %v3431_v24, %v1283_v8  ;;  %v3889_v51 = vand.u32 4294901760, %v3888_v58 }
 0x168   : > { %2247 = vst [vmem:[#allocation1 + $0x23] ss:$4 sm:$0xff] %v1978_v22  ;;  %v906_v10 = vpop.f32.mrf.mxu2 }
 0x169   : > { %1195 = vmatmul.f32.gmra.mxu3 %v3886_v7  ;;  %1499 = vmatmul.f32.gmra.mxu1 %v3887_v19  ;;  %v1779_v23 = vrot.slane %v1429_v56, 2  ;;  %v1780_v16 = vrot.slane %v1429_v56, 4  ;;  %v1781_v18 = vrot.slane %v1429_v56, 6  ;;  %v1979_v24 = vadd.f32 %v1611_v9, %v1429_v56  ;;  %2409 = vst.msk [vmem:[%s3336_s7 + $0x30] sm:$0xff] %vm2402_vm2, %v2248_v25 }
 0x16a   : > { %v907_v11 = vadd.f32 %v906_v10, %v750_v31  ;;  %v758_v25 = vadd.f32 %v3191_v38, %v528_v53  ;;  %v3891_v31 = vld [vmem:[#allocation10_spill] sm:$0xff]  ;;  %v536_v38 = vadd.f32 %v3068_v36, %v3209_v35 }
 0x16b   : > { %v1290_v50 = vpop.f32.mrf.mxu0  ;;  %v1980_v62 = vadd.f32 %v1779_v23, %v3476_v42  ;;  %v1981_v29 = vadd.f32 %v1780_v16, %v3478_v49  ;;  %v1982_v12 = vadd.f32 %v1781_v18, %v3480_v52  ;;  %2250 = vst [vmem:[#allocation1] ss:$4 sm:$0xff] %v1979_v24  ;;  %v3892_v10 = vand.u32 4294901760, %v3891_v31 }
 0x16c   : > { %v1100_v17 = vpop.f32.mrf.mxu3  ;;  %v1095_v28 = vadd.f32 %v1094_v46, %v907_v11  ;;  %v762_v35 = vadd.f32 %v3203_v26, %v536_v38 }
 0x16d   : > { %2251 = vst [vmem:[#allocation1 + $0x1] ss:$4 sm:$0xff] %v1980_v62  ;;  %990 = vmatmul.f32.gmra.mxu2 %v3885_v30  ;;  %v3893_v30 = vld [vmem:[#allocation9_spill] sm:$0xff]  ;;  %v3894_v62 = vand.u32 4294901760, %v2988_v14 }
 0x16e   : > { %1353 = vmatmul.f32.gmra.mxu0 %v3887_v19  ;;  %v3501_v21 = vpop.f32.mrf.mxu1  ;;  %2252 = vst [vmem:[#allocation1 + $0x2] ss:$4 sm:$0xff] %v1981_v29  ;;  %v1287_v13 = vadd.f32 %v1286_v41, %v1095_v28  ;;  %v3895_v29 = vld [vmem:[#allocation11_spill] sm:$0xff] }
 0x16f   : > { %v2249_v15 = vld.sshfl [vmem:[#allocation1 + $0x20] sm:$0xff pattern:$0x73625140]  ;;  %2253 = vst [vmem:[#allocation1 + $0x3] ss:$4 sm:$0xff] %v1982_v12 }
 0x170   : > { %v1433_v55 = vadd.f32 %v3449_v63, %v1287_v13  ;;  %v911_v33 = vpop.f32.mrf.mxu2  ;;  %2410 = vst.msk [vmem:[%s3336_s7 + $0x38] sm:$0xff] %vm2402_vm2, %v2249_v15 }
 0x171   : > { %1201 = vmatmul.f32.gmra.mxu3 %v3889_v51  ;;  %1503 = vmatmul.f32.gmra.mxu1 %v3890_v54  ;;  %v912_v1 = vadd.f32 %v911_v33, %v754_v39 }
 0x172   : > { %v1782_v48 = vrot.slane %v1433_v55, 2  ;;  %v1783_v44 = vrot.slane %v1433_v55, 4  ;;  %v1784_v41 = vrot.slane %v1433_v55, 6  ;;  %v1983_v63 = vadd.f32 %v3503_v32, %v1433_v55  ;;  %v3563_v55 = vld [vmem:[%s3759_s3] ss:$0 sm:$0xff] }
 0x173   : > { %v1294_v34 = vpop.f32.mrf.mxu0  ;;  %v1101_v57 = vadd.f32 %v1100_v17, %v912_v1  ;;  %v544_v33 = vadd.f32 %v3563_v55, %v3221_v45 }
 0x174   : > { %v1106_v0 = vpop.f32.mrf.mxu3  ;;  %v1984_v46 = vadd.f32 %v1782_v48, %v3507_v59  ;;  %v1985_v4 = vadd.f32 %v1783_v44, %v3509_v3  ;;  %v1986_v40 = vadd.f32 %v1784_v41, %v3511_v47  ;;  %2254 = vst [vmem:[#allocation1 + $0x20] ss:$4 sm:$0xff] %v1983_v63  ;;  %v3896_v41 = vld [vmem:[#allocation28_spill] sm:$0xff] }
 0x175   : > { %v1291_v6 = vadd.f32 %v1290_v50, %v1101_v57  ;;  %995 = vmatmul.f32.gmra.mxu2 %v3888_v58 }
 0x176   : > { %1357 = vmatmul.f32.gmra.mxu0 %v3890_v54  ;;  %v3526_v22 = vpop.f32.mrf.mxu1  ;;  %v2258_v8 = vld.sshfl [vmem:[#allocation1] sm:$0xff pattern:$0x73625140]  ;;  %2255 = vst [vmem:[#allocation1 + $0x21] ss:$4 sm:$0xff] %v1984_v46 }
 0x177   : > { %2256 = vst [vmem:[#allocation1 + $0x22] ss:$4 sm:$0xff] %v1985_v4  ;;  %v1437_v2 = vadd.f32 %v3473_v43, %v1291_v6 }
 0x178   : > { %2257 = vst [vmem:[#allocation1 + $0x23] ss:$4 sm:$0xff] %v1986_v40  ;;  %v916_v56 = vpop.f32.mrf.mxu2 }
 0x179   : > { %1207 = vmatmul.f32.gmra.mxu3 %v3892_v10  ;;  %1507 = vmatmul.f32.gmra.mxu1 %v3893_v30  ;;  %v1785_v7 = vrot.slane %v1437_v2, 2  ;;  %v1786_v19 = vrot.slane %v1437_v2, 4  ;;  %v1787_v23 = vrot.slane %v1437_v2, 6  ;;  %v1987_v16 = vadd.f32 %v1611_v9, %v1437_v2  ;;  %2411 = vst.msk [vmem:[%s3336_s7 + $0x40] sm:$0xff] %vm2402_vm2, %v2258_v8  ;;  %v3900_v2 = vld [vmem:[#allocation31_spill] sm:$0xff] }
 0x17a   : > { %v917_v18 = vadd.f32 %v916_v56, %v758_v25  ;;  %v552_v25 = vadd.f32 %v3563_v55, %v3900_v2 }
 0x17b   : > { %v1298_v24 = vpop.f32.mrf.mxu0  ;;  %v1988_v43 = vadd.f32 %v1785_v7, %v3476_v42  ;;  %v1989_v11 = vadd.f32 %v1786_v19, %v3478_v49  ;;  %v1990_v61 = vadd.f32 %v1787_v23, %v3480_v52  ;;  %2260 = vst [vmem:[#allocation1] ss:$4 sm:$0xff] %v1987_v16  ;;  %v3549_v52 = vld [vmem:[%s3264_s30 + $0x18] sm:$0xff] }
 0x17c   : > { %v1112_v50 = vpop.f32.mrf.mxu3  ;;  %v1107_v5 = vadd.f32 %v1106_v0, %v917_v18  ;;  %v1561_v13 = vrot.slane %v3549_v52, 2  ;;  %v1562_v39 = vrot.slane %v3549_v52, 3  ;;  %v1619_v1 = vperm.slane %v3549_v52, 0  ;;  %v3899_v0 = vld [vmem:[#allocation12_spill] sm:$0xff] }
 0x17d   : > { %2261 = vst [vmem:[#allocation1 + $0x1] ss:$4 sm:$0xff] %v1988_v43  ;;  %1000 = vmatmul.f32.gmra.mxu2 %v3891_v31  ;;  %v1564_v19 = vrot.slane %v3549_v52, 5  ;;  %v1565_v23 = vrot.slane %v3549_v52, 6  ;;  %v1566_v16 = vrot.slane %v3549_v52, 7  ;;  %v3901_v43 = vld [vmem:[#allocation30_spill] sm:$0xff] }
 0x17e   : > { %1361 = vmatmul.f32.gmra.mxu0 %v3893_v30  ;;  %v3544_v60 = vpop.f32.mrf.mxu1  ;;  %2262 = vst [vmem:[#allocation1 + $0x2] ss:$4 sm:$0xff] %v1989_v11  ;;  %v1295_v36 = vadd.f32 %v1294_v34, %v1107_v5  ;;  %v3897_v34 = vld [vmem:[#allocation13_spill] sm:$0xff]  ;;  %v770_v11 = vadd.f32 %v3901_v43, %v552_v25 }
 0x17f   : > { %v2259_v9 = vld.sshfl [vmem:[#allocation1 + $0x20] sm:$0xff pattern:$0x73625140]  ;;  %2263 = vst [vmem:[#allocation1 + $0x3] ss:$4 sm:$0xff] %v1990_v61  ;;  %v3898_v57 = vand.u32 4294901760, %v3897_v34 }
 0x180   : > { %v1441_v42 = vadd.f32 %v3501_v21, %v1295_v36  ;;  %v921_v49 = vpop.f32.mrf.mxu2  ;;  %2412 = vst.msk [vmem:[%s3336_s7 + $0x48] sm:$0xff] %vm2402_vm2, %v2259_v9  ;;  %v1560_v21 = vrot.slane %v3549_v52, 1  ;;  %v3607_v5 = vperm.slane %v1564_v19, 0  ;;  %v3609_v36 = vperm.slane %v1565_v23, 0  ;;  %v3902_v9 = vld [vmem:[#allocation15_spill] sm:$0xff] }
 0x181   : > { %1213 = vmatmul.f32.gmra.mxu3 %v3894_v62  ;;  %1511 = vmatmul.f32.gmra.mxu1 %v3895_v29  ;;  %v922_v12 = vadd.f32 %v921_v49, %v762_v35  ;;  %v3904_v49 = vld [vmem:[#allocation14_spill] sm:$0xff]  ;;  %v1626_v62 = vperm.slane %v1566_v16, 0 }
 0x182   : > { %v1788_v17 = vrot.slane %v1441_v42, 2  ;;  %v1789_v28 = vrot.slane %v1441_v42, 4  ;;  %v1790_v27 = vrot.slane %v1441_v42, 6  ;;  %v1991_v26 = vadd.f32 %v3503_v32, %v1441_v42 }
 0x183   : > { %v1302_v20 = vpop.f32.mrf.mxu0  ;;  %v1113_v37 = vadd.f32 %v1112_v50, %v922_v12  ;;  %v3903_v42 = vand.u32 4294901760, %v3902_v9 }
 0x184   : > { %v1118_v15 = vpop.f32.mrf.mxu3  ;;  %v1992_v58 = vadd.f32 %v1788_v17, %v3507_v59  ;;  %v1993_v32 = vadd.f32 %v1789_v28, %v3509_v3  ;;  %v1994_v51 = vadd.f32 %v1790_v27, %v3511_v47  ;;  %2264 = vst [vmem:[#allocation1 + $0x20] ss:$4 sm:$0xff] %v1991_v26  ;;  %v3576_v59 = vperm.slane %v1560_v21, 0 }
 0x185   : > { %v1299_v54 = vadd.f32 %v1298_v24, %v1113_v37  ;;  %1005 = vmatmul.f32.gmra.mxu2 %v2988_v14  ;;  %v3578_v3 = vperm.slane %v1561_v13, 0  ;;  %v3580_v47 = vperm.slane %v1562_v39, 0  ;;  %v766_v14 = vadd.f32 %v3896_v41, %v544_v33  ;;  %v3905_v37 = vld [vmem:[#allocation34_spill] sm:$0xff] }
 0x186   : > { %1365 = vmatmul.f32.gmra.mxu0 %v3895_v29  ;;  %v3573_v48 = vpop.f32.mrf.mxu1  ;;  %v2268_v44 = vld.sshfl [vmem:[#allocation1] sm:$0xff pattern:$0x73625140]  ;;  %2265 = vst [vmem:[#allocation1 + $0x21] ss:$4 sm:$0xff] %v1992_v58  ;;  %v560_v21 = vadd.f32 %v3563_v55, %v3905_v37 }
 0x187   : > { %2266 = vst [vmem:[#allocation1 + $0x22] ss:$4 sm:$0xff] %v1993_v32  ;;  %v1445_v45 = vadd.f32 %v3526_v22, %v1299_v54  ;;  %v1563_v22 = vrot.slane %v3549_v52, 4  ;;  %v3906_v54 = vld [vmem:[#allocation33_spill] sm:$0xff] }
 0x188   : > { %2267 = vst [vmem:[#allocation1 + $0x23] ss:$4 sm:$0xff] %v1994_v51  ;;  %v926_v63 = vpop.f32.mrf.mxu2  ;;  %v774_v55 = vadd.f32 %v3906_v54, %v560_v21 }
 0x189   : > { %1219 = vmatmul.f32.gmra.mxu3 %v3898_v57  ;;  %1515 = vmatmul.f32.gmra.mxu1 %v3899_v0  ;;  %v1791_v53 = vrot.slane %v1445_v45, 2  ;;  %v1792_v46 = vrot.slane %v1445_v45, 4  ;;  %v1793_v4 = vrot.slane %v1445_v45, 6  ;;  %v1995_v40 = vadd.f32 %v1619_v1, %v1445_v45  ;;  %2413 = vst.msk [vmem:[%s3336_s7 + $0x50] sm:$0xff] %vm2402_vm2, %v2268_v44 }
 0x18a   : > { %v927_v6 = vadd.f32 %v926_v63, %v766_v14  ;;  %v3601_v38 = vperm.slane %v1563_v22, 0 }
 0x18b   : > { %v1306_v8 = vpop.f32.mrf.mxu0  ;;  %v1996_v56 = vadd.f32 %v1791_v53, %v3576_v59  ;;  %v1997_v31 = vadd.f32 %v1792_v46, %v3578_v3  ;;  %v1998_v10 = vadd.f32 %v1793_v4, %v3580_v47  ;;  %2270 = vst [vmem:[#allocation1] ss:$4 sm:$0xff] %v1995_v40 }
 0x18c   : > { %v1124_v30 = vpop.f32.mrf.mxu3  ;;  %v1119_v7 = vadd.f32 %v1118_v15, %v927_v6 }
 0x18d   : > { %2271 = vst [vmem:[#allocation1 + $0x1] ss:$4 sm:$0xff] %v1996_v56  ;;  %1010 = vmatmul.f32.gmra.mxu2 %v3897_v34 }
 0x18e   : > { %1369 = vmatmul.f32.gmra.mxu0 %v3899_v0  ;;  %v1456_v18 = vpop.f32.mrf.mxu1  ;;  %2272 = vst [vmem:[#allocation1 + $0x2] ss:$4 sm:$0xff] %v1997_v31  ;;  %v1303_v24 = vadd.f32 %v1302_v20, %v1119_v7 }
 0x18f   : > { %v2269_v61 = vld.sshfl [vmem:[#allocation1 + $0x20] sm:$0xff pattern:$0x73625140]  ;;  %2273 = vst [vmem:[#allocation1 + $0x3] ss:$4 sm:$0xff] %v1998_v10 }
 0x190   : > { %2414 = vst.msk [vmem:[%s3336_s7 + $0x58] sm:$0xff] %vm2402_vm2, %v2269_v61  ;;  %v1449_v50 = vadd.f32 %v3544_v60, %v1303_v24  ;;  %v931_v35 = vpop.f32.mrf.mxu2 }
 0x191   : > { %1225 = vmatmul.f32.gmra.mxu3 %v3903_v42  ;;  %1519 = vmatmul.f32.gmra.mxu1 %v3904_v49  ;;  %v932_v29 = vadd.f32 %v931_v35, %v770_v11 }
 0x192   : > { %v1794_v12 = vrot.slane %v1449_v50, 2  ;;  %v1795_v17 = vrot.slane %v1449_v50, 4  ;;  %v1796_v28 = vrot.slane %v1449_v50, 6  ;;  %v1999_v27 = vadd.f32 %v3601_v38, %v1449_v50 }
 0x193   : > { %v1310_v26 = vpop.f32.mrf.mxu0  ;;  %v1125_v60 = vadd.f32 %v1124_v30, %v932_v29 }
 0x194   : > { %v1130_v20 = vpop.f32.mrf.mxu3  ;;  %v2000_v13 = vadd.f32 %v1794_v12, %v3607_v5  ;;  %v2001_v39 = vadd.f32 %v1795_v17, %v3609_v36  ;;  %2274 = vst [vmem:[#allocation1 + $0x20] ss:$4 sm:$0xff] %v1999_v27  ;;  %v2002_v15 = vadd.f32 %v1796_v28, %v1626_v62  ;;  %v3908_v12 = vld [vmem:[#allocation17_spill] sm:$0xff] }
 0x195   : > { %v1307_v33 = vadd.f32 %v1306_v8, %v1125_v60  ;;  %1015 = vmatmul.f32.gmra.mxu2 %v3902_v9  ;;  %v3631_v8 = vld [vmem:[%s3264_s30 + $0x20] sm:$0xff] }
 0x196   : > { %1373 = vmatmul.f32.gmra.mxu0 %v3904_v49  ;;  %v1460_v58 = vpop.f32.mrf.mxu1  ;;  %v2278_v32 = vld.sshfl [vmem:[#allocation1] sm:$0xff pattern:$0x73625140]  ;;  %2275 = vst [vmem:[#allocation1 + $0x21] ss:$4 sm:$0xff] %v2000_v13  ;;  %v1567_v30 = vrot.slane %v3631_v8, 1 }
 0x197   : > { %2415 = vst.msk [vmem:[%s3336_s7 + $0x60] sm:$0xff] %vm2402_vm2, %v2278_v32  ;;  %v1453_v51 = vadd.f32 %v3573_v48, %v1307_v33  ;;  %v1568_v7 = vrot.slane %v3631_v8, 2  ;;  %v1569_v19 = vrot.slane %v3631_v8, 3  ;;  %v1627_v11 = vperm.slane %v3631_v8, 0 }
 0x198   : > { %2276 = vst [vmem:[#allocation1 + $0x22] ss:$4 sm:$0xff] %v2001_v39  ;;  %v936_v44 = vpop.f32.mrf.mxu2  ;;  %v1628_v35 = vperm.slane %v1567_v30, 0  ;;  %v1570_v28 = vrot.slane %v3631_v8, 4  ;;  %v1571_v13 = vrot.slane %v3631_v8, 5  ;;  %v1572_v39 = vrot.slane %v3631_v8, 6 }
 0x199   : > { %2277 = vst [vmem:[#allocation1 + $0x23] ss:$4 sm:$0xff] %v2002_v15  ;;  %v1797_v45 = vrot.slane %v1453_v51, 2  ;;  %v1798_v41 = vrot.slane %v1453_v51, 4  ;;  %v1799_v14 = vrot.slane %v1453_v51, 6  ;;  %v2003_v63 = vadd.f32 %v1619_v1, %v1453_v51 }
 0x19a   : > { %v937_v34 = vadd.f32 %v936_v44, %v774_v55  ;;  %v1629_v9 = vperm.slane %v1568_v7, 0  ;;  %v1630_v42 = vperm.slane %v1569_v19, 0  ;;  %v1573_v15 = vrot.slane %v3631_v8, 7 }
 0x19b   : > { %v1314_v57 = vpop.f32.mrf.mxu0  ;;  %v2004_v0 = vadd.f32 %v1797_v45, %v3576_v59  ;;  %v2005_v53 = vadd.f32 %v1798_v41, %v3578_v3  ;;  %v2006_v48 = vadd.f32 %v1799_v14, %v3580_v47  ;;  %2280 = vst [vmem:[#allocation1] ss:$4 sm:$0xff] %v2003_v63  ;;  %v3907_v59 = vld [vmem:[#allocation16_spill] sm:$0xff]  ;;  %v1631_v32 = vperm.slane %v1570_v28, 0  ;;  %v3909_v14 = vld [vmem:[#allocation18_spill] sm:$0xff] }
 0x19c   : > { %v1136_v46 = vpop.f32.mrf.mxu3  ;;  %v1131_v4 = vadd.f32 %v1130_v20, %v937_v34  ;;  %v1632_v55 = vperm.slane %v1571_v13, 0  ;;  %v1633_v44 = vperm.slane %v1572_v39, 0  ;;  %v1634_v41 = vperm.slane %v1573_v15, 0 }
 0x19d   : > { %2281 = vst [vmem:[#allocation1 + $0x1] ss:$4 sm:$0xff] %v2004_v0 }
 0x19e   : > { %v1464_v40 = vpop.f32.mrf.mxu1  ;;  %2282 = vst [vmem:[#allocation1 + $0x2] ss:$4 sm:$0xff] %v2005_v53  ;;  %v1311_v6 = vadd.f32 %v1310_v26, %v1131_v4 }
 0x19f   : > { %2283 = vst [vmem:[#allocation1 + $0x3] ss:$4 sm:$0xff] %v2006_v48 }
 0x1a0   : > { %v2279_v52 = vld.sshfl [vmem:[#allocation1 + $0x20] sm:$0xff pattern:$0x73625140]  ;;  %v1457_v1 = vadd.f32 %v1456_v18, %v1311_v6  ;;  %v941_v22 = vpop.f32.mrf.mxu2 }
 0x1a1   : > { %2416 = vst.msk [vmem:[%s3336_s7 + $0x68] sm:$0xff] %vm2402_vm2, %v2279_v52  ;;  %v942_v2 = vadd.f32 %v941_v22, %v3907_v59 }
 0x1a2   : > { %v1800_v3 = vrot.slane %v1457_v1, 2  ;;  %v1801_v25 = vrot.slane %v1457_v1, 4  ;;  %v1802_v47 = vrot.slane %v1457_v1, 6  ;;  %v2007_v56 = vadd.f32 %v3601_v38, %v1457_v1 }
 0x1a3   : > { %v1318_v31 = vpop.f32.mrf.mxu0  ;;  %v1137_v10 = vadd.f32 %v1136_v46, %v942_v2 }
 0x1a4   : > { %v1142_v23 = vpop.f32.mrf.mxu3  ;;  %v2008_v16 = vadd.f32 %v1800_v3, %v3607_v5  ;;  %v2009_v18 = vadd.f32 %v1801_v25, %v3609_v36  ;;  %2284 = vst [vmem:[#allocation1 + $0x20] ss:$4 sm:$0xff] %v2007_v56  ;;  %v2010_v24 = vadd.f32 %v1802_v47, %v1626_v62 }
 0x1a5   : > { %v1315_v43 = vadd.f32 %v1314_v57, %v1137_v10  ;;  %v3910_v10 = vld [vmem:[#allocation19_spill] sm:$0xff] }
 0x1a6   : > { %v1468_v38 = vpop.f32.mrf.mxu1  ;;  %v2288_v61 = vld.sshfl [vmem:[#allocation1] sm:$0xff pattern:$0x73625140]  ;;  %2285 = vst [vmem:[#allocation1 + $0x21] ss:$4 sm:$0xff] %v2008_v16 }
 0x1a7   : > { %2417 = vst.msk [vmem:[%s3336_s7 + $0x70] sm:$0xff] %vm2402_vm2, %v2288_v61  ;;  %v1461_v50 = vadd.f32 %v1460_v58, %v1315_v43 }
 0x1a8   : > { %2286 = vst [vmem:[#allocation1 + $0x22] ss:$4 sm:$0xff] %v2009_v18  ;;  %v946_v49 = vpop.f32.mrf.mxu2 }
 0x1a9   : > { %2287 = vst [vmem:[#allocation1 + $0x23] ss:$4 sm:$0xff] %v2010_v24  ;;  %v1803_v5 = vrot.slane %v1461_v50, 2  ;;  %v1804_v29 = vrot.slane %v1461_v50, 4  ;;  %v1805_v36 = vrot.slane %v1461_v50, 6  ;;  %v2011_v62 = vadd.f32 %v1627_v11, %v1461_v50 }
 0x1aa   : > { %v947_v17 = vadd.f32 %v946_v49, %v3908_v12  ;;  %v3911_v49 = vld [vmem:[#allocation20_spill] sm:$0xff] }
 0x1ab   : > { %v1322_v27 = vpop.f32.mrf.mxu0  ;;  %v2012_v26 = vadd.f32 %v1803_v5, %v1628_v35  ;;  %v2013_v60 = vadd.f32 %v1804_v29, %v1629_v9  ;;  %v2014_v20 = vadd.f32 %v1805_v36, %v1630_v42  ;;  %2290 = vst [vmem:[#allocation1] ss:$4 sm:$0xff] %v2011_v62 }
 0x1ac   : > { %v1148_v37 = vpop.f32.mrf.mxu3  ;;  %v1143_v21 = vadd.f32 %v1142_v23, %v947_v17 }
 0x1ad   : > { %2291 = vst [vmem:[#allocation1 + $0x1] ss:$4 sm:$0xff] %v2012_v26 }
 0x1ae   : > { %v1472_v33 = vpop.f32.mrf.mxu1  ;;  %2292 = vst [vmem:[#allocation1 + $0x2] ss:$4 sm:$0xff] %v2013_v60  ;;  %v1319_v58 = vadd.f32 %v1318_v31, %v1143_v21 }
 0x1af   : > { %2293 = vst [vmem:[#allocation1 + $0x3] ss:$4 sm:$0xff] %v2014_v20 }
 0x1b0   : > { %v2289_v51 = vld.sshfl [vmem:[#allocation1 + $0x20] sm:$0xff pattern:$0x73625140]  ;;  %v1465_v54 = vadd.f32 %v1464_v40, %v1319_v58  ;;  %v951_v45 = vpop.f32.mrf.mxu2 }
 0x1b1   : > { %2418 = vst.msk [vmem:[%s3336_s7 + $0x78] sm:$0xff] %vm2402_vm2, %v2289_v51  ;;  %v952_v63 = vadd.f32 %v951_v45, %v3909_v14 }
 0x1b2   : > { %v1806_v34 = vrot.slane %v1465_v54, 2  ;;  %v1807_v57 = vrot.slane %v1465_v54, 4  ;;  %v1808_v0 = vrot.slane %v1465_v54, 6  ;;  %v2015_v53 = vadd.f32 %v1631_v32, %v1465_v54 }
 0x1b3   : > { %v1326_v48 = vpop.f32.mrf.mxu0  ;;  %v1149_v46 = vadd.f32 %v1148_v37, %v952_v63 }
 0x1b4   : > { %v1154_v4 = vpop.f32.mrf.mxu3  ;;  %v2016_v6 = vadd.f32 %v1806_v34, %v1632_v55  ;;  %v2017_v52 = vadd.f32 %v1807_v57, %v1633_v44  ;;  %2294 = vst [vmem:[#allocation1 + $0x20] ss:$4 sm:$0xff] %v2015_v53  ;;  %v2018_v40 = vadd.f32 %v1808_v0, %v1634_v41 }
 0x1b5   : > { %v1323_v1 = vadd.f32 %v1322_v27, %v1149_v46 }
 0x1b6   : > { %v1476_v22 = vpop.f32.mrf.mxu1  ;;  %v2298_v59 = vld.sshfl [vmem:[#allocation1] sm:$0xff pattern:$0x73625140]  ;;  %2295 = vst [vmem:[#allocation1 + $0x21] ss:$4 sm:$0xff] %v2016_v6 }
 0x1b7   : > { %2419 = vst.msk [vmem:[%s3336_s7 + $0x80] sm:$0xff] %vm2402_vm2, %v2298_v59  ;;  %v1469_v2 = vadd.f32 %v1468_v38, %v1323_v1 }
 0x1b8   : > { %2296 = vst [vmem:[#allocation1 + $0x22] ss:$4 sm:$0xff] %v2017_v52  ;;  %v956_v3 = vpop.f32.mrf.mxu2 }
 0x1b9   : > { %2297 = vst [vmem:[#allocation1 + $0x23] ss:$4 sm:$0xff] %v2018_v40  ;;  %v1809_v25 = vrot.slane %v1469_v2, 2  ;;  %v1810_v47 = vrot.slane %v1469_v2, 4  ;;  %v1811_v56 = vrot.slane %v1469_v2, 6  ;;  %v2019_v31 = vadd.f32 %v1627_v11, %v1469_v2  ;;  %v3661_v11 = vld [vmem:[%s3264_s30 + $0x28] sm:$0xff] }
 0x1ba   : > { %v957_v30 = vadd.f32 %v956_v3, %v3910_v10  ;;  %v1574_v12 = vrot.slane %v3661_v11, 1  ;;  %v1575_v17 = vrot.slane %v3661_v11, 2  ;;  %v1576_v28 = vrot.slane %v3661_v11, 3 }
 0x1bb   : > { %v1330_v7 = vpop.f32.mrf.mxu0  ;;  %v2020_v19 = vadd.f32 %v1809_v25, %v1628_v35  ;;  %v2021_v23 = vadd.f32 %v1810_v47, %v1629_v9  ;;  %v2022_v16 = vadd.f32 %v1811_v56, %v1630_v42  ;;  %2300 = vst [vmem:[#allocation1] ss:$4 sm:$0xff] %v2019_v31  ;;  %v1635_v21 = vperm.slane %v3661_v11, 0  ;;  %v3913_v31 = vld [vmem:[#allocation22_spill] sm:$0xff] }
 0x1bc   : > { %v1160_v18 = vpop.f32.mrf.mxu3  ;;  %v1155_v24 = vadd.f32 %v1154_v4, %v957_v30  ;;  %v1637_v58 = vperm.slane %v1575_v17, 0  ;;  %v1577_v63 = vrot.slane %v3661_v11, 4  ;;  %v1578_v4 = vrot.slane %v3661_v11, 5 }
 0x1bd   : > { %2301 = vst [vmem:[#allocation1 + $0x1] ss:$4 sm:$0xff] %v2020_v19  ;;  %v1579_v6 = vrot.slane %v3661_v11, 6  ;;  %v1580_v52 = vrot.slane %v3661_v11, 7  ;;  %v3688_v11 = vld [vmem:[%s3264_s30 + $0x30] sm:$0xff] }
 0x1be   : > { %v1480_v43 = vpop.f32.mrf.mxu1  ;;  %2302 = vst [vmem:[#allocation1 + $0x2] ss:$4 sm:$0xff] %v2021_v23  ;;  %v1327_v38 = vadd.f32 %v1326_v48, %v1155_v24  ;;  %v1640_v3 = vperm.slane %v1578_v4, 0 }
 0x1bf   : > { %2303 = vst [vmem:[#allocation1 + $0x3] ss:$4 sm:$0xff] %v2022_v16  ;;  %v1641_v25 = vperm.slane %v1579_v6, 0  ;;  %v1642_v56 = vperm.slane %v1580_v52, 0 }
 0x1c0   : > { %v2299_v61 = vld.sshfl [vmem:[#allocation1 + $0x20] sm:$0xff pattern:$0x73625140]  ;;  %v1473_v50 = vadd.f32 %v1472_v33, %v1327_v38  ;;  %v961_v8 = vpop.f32.mrf.mxu2  ;;  %v1636_v33 = vperm.slane %v1574_v12, 0 }
 0x1c1   : > { %2420 = vst.msk [vmem:[%s3336_s7 + $0x88] sm:$0xff] %vm2402_vm2, %v2299_v61  ;;  %v962_v5 = vadd.f32 %v961_v8, %v3911_v49 }
 0x1c2   : > { %v1812_v35 = vrot.slane %v1473_v50, 2  ;;  %v1813_v9 = vrot.slane %v1473_v50, 4  ;;  %v1814_v42 = vrot.slane %v1473_v50, 6  ;;  %v2023_v29 = vadd.f32 %v1631_v32, %v1473_v50 }
 0x1c3   : > { %v1334_v36 = vpop.f32.mrf.mxu0  ;;  %v1161_v62 = vadd.f32 %v1160_v18, %v962_v5  ;;  %v1638_v32 = vperm.slane %v1576_v28, 0 }
 0x1c4   : > { %v1166_v27 = vpop.f32.mrf.mxu3  ;;  %v2024_v26 = vadd.f32 %v1812_v35, %v1632_v55  ;;  %v2025_v60 = vadd.f32 %v1813_v9, %v1633_v44  ;;  %2304 = vst [vmem:[#allocation1 + $0x20] ss:$4 sm:$0xff] %v2023_v29  ;;  %v2026_v20 = vadd.f32 %v1814_v42, %v1634_v41  ;;  %v3912_v41 = vld [vmem:[#allocation21_spill] sm:$0xff] }
 0x1c5   : > { %v1331_v37 = vadd.f32 %v1330_v7, %v1161_v62  ;;  %v3914_v62 = vld [vmem:[#allocation23_spill] sm:$0xff] }
 0x1c6   : > { %v1484_v13 = vpop.f32.mrf.mxu1  ;;  %v2308_v39 = vld.sshfl [vmem:[#allocation1] sm:$0xff pattern:$0x73625140]  ;;  %2305 = vst [vmem:[#allocation1 + $0x21] ss:$4 sm:$0xff] %v2024_v26 }
 0x1c7   : > { %2421 = vst.msk [vmem:[%s3336_s7 + $0x90] sm:$0xff] %vm2402_vm2, %v2308_v39  ;;  %v1477_v15 = vadd.f32 %v1476_v22, %v1331_v37  ;;  %v1639_v22 = vperm.slane %v1577_v63, 0  ;;  %v1583_v63 = vrot.slane %v3688_v11, 3 }
 0x1c8   : > { %2306 = vst [vmem:[#allocation1 + $0x22] ss:$4 sm:$0xff] %v2025_v60  ;;  %v966_v51 = vpop.f32.mrf.mxu2 }
 0x1c9   : > { %2307 = vst [vmem:[#allocation1 + $0x23] ss:$4 sm:$0xff] %v2026_v20  ;;  %v1815_v54 = vrot.slane %v1477_v15, 2  ;;  %v1816_v55 = vrot.slane %v1477_v15, 4  ;;  %v1817_v44 = vrot.slane %v1477_v15, 6  ;;  %v2027_v45 = vadd.f32 %v1635_v21, %v1477_v15 }
 0x1ca   : > { %v967_v14 = vadd.f32 %v966_v51, %v3912_v41  ;;  %v1581_v41 = vrot.slane %v3688_v11, 1 }
 0x1cb   : > { %v1338_v34 = vpop.f32.mrf.mxu0  ;;  %v2028_v57 = vadd.f32 %v1815_v54, %v1636_v33  ;;  %v2029_v0 = vadd.f32 %v1816_v55, %v1637_v58  ;;  %v2030_v53 = vadd.f32 %v1817_v44, %v1638_v32  ;;  %2310 = vst [vmem:[#allocation1] ss:$4 sm:$0xff] %v2027_v45 }
 0x1cc   : > { %v1172_v48 = vpop.f32.mrf.mxu3  ;;  %v1167_v46 = vadd.f32 %v1166_v27, %v967_v14  ;;  %v1582_v14 = vrot.slane %v3688_v11, 2  ;;  %v1644_v52 = vperm.slane %v1581_v41, 0 }
 0x1cd   : > { %2311 = vst [vmem:[#allocation1 + $0x1] ss:$4 sm:$0xff] %v2028_v57 }
 0x1ce   : > { %v1488_v40 = vpop.f32.mrf.mxu1  ;;  %2312 = vst [vmem:[#allocation1 + $0x2] ss:$4 sm:$0xff] %v2029_v0  ;;  %v1335_v1 = vadd.f32 %v1334_v36, %v1167_v46  ;;  %v1643_v46 = vperm.slane %v3688_v11, 0 }
 0x1cf   : > { %2313 = vst [vmem:[#allocation1 + $0x3] ss:$4 sm:$0xff] %v2030_v53 }
 0x1d0   : > { %v2309_v59 = vld.sshfl [vmem:[#allocation1 + $0x20] sm:$0xff pattern:$0x73625140]  ;;  %v1481_v2 = vadd.f32 %v1480_v43, %v1335_v1  ;;  %v971_v47 = vpop.f32.mrf.mxu2  ;;  %v1646_v1 = vperm.slane %v1583_v63, 0 }
 0x1d1   : > { %2422 = vst.msk [vmem:[%s3336_s7 + $0x98] sm:$0xff] %vm2402_vm2, %v2309_v59  ;;  %v972_v10 = vadd.f32 %v971_v47, %v3913_v31  ;;  %v3916_v47 = vld [vmem:[#allocation25_spill] sm:$0xff]  ;;  %v1584_v31 = vrot.slane %v3688_v11, 4 }
 0x1d2   : > { %v1818_v30 = vrot.slane %v1481_v2, 2  ;;  %v1819_v7 = vrot.slane %v1481_v2, 4  ;;  %v1820_v19 = vrot.slane %v1481_v2, 6  ;;  %v2031_v23 = vadd.f32 %v1639_v22, %v1481_v2 }
 0x1d3   : > { %v1342_v16 = vpop.f32.mrf.mxu0  ;;  %v1173_v18 = vadd.f32 %v1172_v48, %v972_v10 }
 0x1d4   : > { %v1178_v24 = vpop.f32.mrf.mxu3  ;;  %v2032_v38 = vadd.f32 %v1818_v30, %v1640_v3  ;;  %v2033_v61 = vadd.f32 %v1819_v7, %v1641_v25  ;;  %2314 = vst [vmem:[#allocation1 + $0x20] ss:$4 sm:$0xff] %v2031_v23  ;;  %v2034_v43 = vadd.f32 %v1820_v19, %v1642_v56 }
 0x1d5   : > { %v1339_v50 = vadd.f32 %v1338_v34, %v1173_v18 }
 0x1d6   : > { %v2318_v8 = vld.sshfl [vmem:[#allocation1] sm:$0xff pattern:$0x73625140]  ;;  %2315 = vst [vmem:[#allocation1 + $0x21] ss:$4 sm:$0xff] %v2032_v38  ;;  %v1492_v5 = vpop.f32.mrf.mxu1  ;;  %v1586_v38 = vrot.slane %v3688_v11, 6 }
 0x1d7   : > { %2423 = vst.msk [vmem:[%s3336_s7 + $0xa0] sm:$0xff] %vm2402_vm2, %v2318_v8  ;;  %v1485_v49 = vadd.f32 %v1484_v13, %v1339_v50  ;;  %v1647_v50 = vperm.slane %v1584_v31, 0 }
 0x1d8   : > { %2316 = vst [vmem:[#allocation1 + $0x22] ss:$4 sm:$0xff] %v2033_v61  ;;  %v976_v35 = vpop.f32.mrf.mxu2  ;;  %v1587_v61 = vrot.slane %v3688_v11, 7 }
 0x1d9   : > { %2317 = vst [vmem:[#allocation1 + $0x23] ss:$4 sm:$0xff] %v2034_v43  ;;  %v1821_v9 = vrot.slane %v1485_v49, 2  ;;  %v1822_v42 = vrot.slane %v1485_v49, 4  ;;  %v1823_v29 = vrot.slane %v1485_v49, 6  ;;  %v2035_v36 = vadd.f32 %v1635_v21, %v1485_v49  ;;  %v3915_v21 = vld [vmem:[#allocation24_spill] sm:$0xff] }
 0x1da   : > { %v977_v12 = vadd.f32 %v976_v35, %v3914_v62  ;;  %v1649_v35 = vperm.slane %v1586_v38, 0 }
 0x1db   : > { %v1346_v17 = vpop.f32.mrf.mxu0  ;;  %v2036_v28 = vadd.f32 %v1821_v9, %v1636_v33  ;;  %v2037_v27 = vadd.f32 %v1822_v42, %v1637_v58  ;;  %v2038_v26 = vadd.f32 %v1823_v29, %v1638_v32  ;;  %2320 = vst [vmem:[#allocation1] ss:$4 sm:$0xff] %v2035_v36  ;;  %v1650_v42 = vperm.slane %v1587_v61, 0  ;;  %v3917_v29 = vld [vmem:[#allocation26_spill] sm:$0xff] }
 0x1dc   : > { %v1184_v60 = vpop.f32.mrf.mxu3  ;;  %v1179_v20 = vadd.f32 %v1178_v24, %v977_v12  ;;  %v1585_v24 = vrot.slane %v3688_v11, 5 }
 0x1dd   : > { %2321 = vst [vmem:[#allocation1 + $0x1] ss:$4 sm:$0xff] %v2036_v28 }
 0x1de   : > { %2322 = vst [vmem:[#allocation1 + $0x2] ss:$4 sm:$0xff] %v2037_v27  ;;  %v1343_v37 = vadd.f32 %v1342_v16, %v1179_v20  ;;  %v1496_v54 = vpop.f32.mrf.mxu1 }
 0x1df   : > { %2323 = vst [vmem:[#allocation1 + $0x3] ss:$4 sm:$0xff] %v2038_v26 }
 0x1e0   : > { %v2319_v13 = vld.sshfl [vmem:[#allocation1 + $0x20] sm:$0xff pattern:$0x73625140]  ;;  %v1489_v39 = vadd.f32 %v1488_v40, %v1343_v37  ;;  %v981_v15 = vpop.f32.mrf.mxu2  ;;  %v1645_v40 = vperm.slane %v1582_v14, 0 }
 0x1e1   : > { %2424 = vst.msk [vmem:[%s3336_s7 + $0xa8] sm:$0xff] %vm2402_vm2, %v2319_v13  ;;  %v982_v51 = vadd.f32 %v981_v15, %v3915_v21 }
 0x1e2   : > { %v1824_v33 = vrot.slane %v1489_v39, 2  ;;  %v1825_v58 = vrot.slane %v1489_v39, 4  ;;  %v1826_v32 = vrot.slane %v1489_v39, 6  ;;  %v2039_v55 = vadd.f32 %v1639_v22, %v1489_v39 }
 0x1e3   : > { %v1350_v44 = vpop.f32.mrf.mxu0  ;;  %v1185_v45 = vadd.f32 %v1184_v60, %v982_v51 }
 0x1e4   : > { %v1190_v34 = vpop.f32.mrf.mxu3  ;;  %v2040_v57 = vadd.f32 %v1824_v33, %v1640_v3  ;;  %v2041_v0 = vadd.f32 %v1825_v58, %v1641_v25  ;;  %2324 = vst [vmem:[#allocation1 + $0x20] ss:$4 sm:$0xff] %v2039_v55  ;;  %v2042_v53 = vadd.f32 %v1826_v32, %v1642_v56 }
 0x1e5   : > { %v1347_v48 = vadd.f32 %v1346_v17, %v1185_v45 }
 0x1e6   : > { %v2328_v4 = vld.sshfl [vmem:[#allocation1] sm:$0xff pattern:$0x73625140]  ;;  %2325 = vst [vmem:[#allocation1 + $0x21] ss:$4 sm:$0xff] %v2040_v57  ;;  %v1500_v16 = vpop.f32.mrf.mxu1 }
 0x1e7   : > { %2425 = vst.msk [vmem:[%s3336_s7 + $0xb0] sm:$0xff] %vm2402_vm2, %v2328_v4  ;;  %v1493_v6 = vadd.f32 %v1492_v5, %v1347_v48  ;;  %v1648_v5 = vperm.slane %v1585_v24, 0 }
 0x1e8   : > { %2326 = vst [vmem:[#allocation1 + $0x22] ss:$4 sm:$0xff] %v2041_v0  ;;  %v986_v22 = vpop.f32.mrf.mxu2 }
 0x1e9   : > { %2327 = vst [vmem:[#allocation1 + $0x23] ss:$4 sm:$0xff] %v2042_v53  ;;  %v1827_v59 = vrot.slane %v1493_v6, 2  ;;  %v1828_v2 = vrot.slane %v1493_v6, 4  ;;  %v1829_v3 = vrot.slane %v1493_v6, 6  ;;  %v2043_v25 = vadd.f32 %v1643_v46, %v1493_v6 }
 0x1ea   : > { %v987_v56 = vadd.f32 %v986_v22, %v3916_v47 }
 0x1eb   : > { %v1354_v10 = vpop.f32.mrf.mxu0  ;;  %v2044_v30 = vadd.f32 %v1827_v59, %v1644_v52  ;;  %v2045_v7 = vadd.f32 %v1828_v2, %v1645_v40  ;;  %v2046_v19 = vadd.f32 %v1829_v3, %v1646_v1  ;;  %2330 = vst [vmem:[#allocation1] ss:$4 sm:$0xff] %v2043_v25 }
 0x1ec   : > { %v1196_v23 = vpop.f32.mrf.mxu3  ;;  %v1191_v18 = vadd.f32 %v1190_v34, %v987_v56 }
 0x1ed   : > { %2331 = vst [vmem:[#allocation1 + $0x1] ss:$4 sm:$0xff] %v2044_v30 }
 0x1ee   : > { %2332 = vst [vmem:[#allocation1 + $0x2] ss:$4 sm:$0xff] %v2045_v7  ;;  %v1351_v43 = vadd.f32 %v1350_v44, %v1191_v18  ;;  %v1504_v15 = vpop.f32.mrf.mxu1  ;;  %v3918_v44 = vld [vmem:[#allocation27_spill] sm:$0xff] }
 0x1ef   : > { %2333 = vst [vmem:[#allocation1 + $0x3] ss:$4 sm:$0xff] %v2046_v19 }
 0x1f0   : > { %v2329_v8 = vld.sshfl [vmem:[#allocation1 + $0x20] sm:$0xff pattern:$0x73625140]  ;;  %v1497_v49 = vadd.f32 %v1496_v54, %v1351_v43  ;;  %v991_v9 = vpop.f32.mrf.mxu2 }
 0x1f1   : > { %2426 = vst.msk [vmem:[%s3336_s7 + $0xb8] sm:$0xff] %vm2402_vm2, %v2329_v8  ;;  %v992_v36 = vadd.f32 %v991_v9, %v3917_v29 }
 0x1f2   : > { %v1830_v62 = vrot.slane %v1497_v49, 2  ;;  %v1831_v12 = vrot.slane %v1497_v49, 4  ;;  %v1832_v17 = vrot.slane %v1497_v49, 6  ;;  %v2047_v28 = vadd.f32 %v1647_v50, %v1497_v49 }
 0x1f3   : > { %v1197_v27 = vadd.f32 %v1196_v23, %v992_v36  ;;  %v1358_v60 = vpop.f32.mrf.mxu0 }
 0x1f4   : > { %v1202_v26 = vpop.f32.mrf.mxu3  ;;  %v2048_v20 = vadd.f32 %v1830_v62, %v1648_v5  ;;  %v2049_v37 = vadd.f32 %v1831_v12, %v1649_v35  ;;  %2334 = vst [vmem:[#allocation1 + $0x20] ss:$4 sm:$0xff] %v2047_v28  ;;  %v2050_v13 = vadd.f32 %v1832_v17, %v1650_v42 }
 0x1f5   : > { %v1355_v39 = vadd.f32 %v1354_v10, %v1197_v27 }
 0x1f6   : > { %v2338_v21 = vld.sshfl [vmem:[#allocation1] sm:$0xff pattern:$0x73625140]  ;;  %2335 = vst [vmem:[#allocation1 + $0x21] ss:$4 sm:$0xff] %v2048_v20  ;;  %v1508_v48 = vpop.f32.mrf.mxu1 }
 0x1f7   : > { %2427 = vst.msk [vmem:[%s3336_s7 + $0xc0] sm:$0xff] %vm2402_vm2, %v2338_v21  ;;  %v1501_v51 = vadd.f32 %v1500_v16, %v1355_v39 }
 0x1f8   : > { %2336 = vst [vmem:[#allocation1 + $0x22] ss:$4 sm:$0xff] %v2049_v37  ;;  %v996_v54 = vpop.f32.mrf.mxu2 }
 0x1f9   : > { %2337 = vst [vmem:[#allocation1 + $0x23] ss:$4 sm:$0xff] %v2050_v13  ;;  %v1833_v33 = vrot.slane %v1501_v51, 2  ;;  %v1834_v58 = vrot.slane %v1501_v51, 4  ;;  %v1835_v32 = vrot.slane %v1501_v51, 6  ;;  %v2051_v55 = vadd.f32 %v1643_v46, %v1501_v51  ;;  %v3715_v46 = vld [vmem:[%s3264_s30 + $0x38] sm:$0xff] }
 0x1fa   : > { %v997_v45 = vadd.f32 %v996_v54, %v3918_v44  ;;  %v1588_v25 = vrot.slane %v3715_v46, 1  ;;  %v1589_v47 = vrot.slane %v3715_v46, 2  ;;  %v1590_v56 = vrot.slane %v3715_v46, 3 }
 0x1fb   : > { %v2052_v41 = vadd.f32 %v1833_v33, %v1644_v52  ;;  %v2053_v14 = vadd.f32 %v1834_v58, %v1645_v40  ;;  %v2054_v63 = vadd.f32 %v1835_v32, %v1646_v1  ;;  %2340 = vst [vmem:[#allocation1] ss:$4 sm:$0xff] %v2051_v55  ;;  %v1362_v0 = vpop.f32.mrf.mxu0  ;;  %v3919_v52 = vld [vmem:[#allocation29_spill] sm:$0xff]  ;;  %v1651_v19 = vperm.slane %v3715_v46, 0  ;;  %v3921_v58 = vld [vmem:[#allocation35_spill] sm:$0xff] }
 0x1fc   : > { %v1208_v34 = vpop.f32.mrf.mxu3  ;;  %v1203_v57 = vadd.f32 %v1202_v26, %v997_v45  ;;  %v1652_v24 = vperm.slane %v1588_v25, 0  ;;  %v1653_v38 = vperm.slane %v1589_v47, 0  ;;  %v1654_v61 = vperm.slane %v1590_v56, 0 }
 0x1fd   : > { %2341 = vst [vmem:[#allocation1 + $0x1] ss:$4 sm:$0xff] %v2052_v41  ;;  %v1591_v36 = vrot.slane %v3715_v46, 4  ;;  %v1592_v27 = vrot.slane %v3715_v46, 5  ;;  %v1593_v26 = vrot.slane %v3715_v46, 6 }
 0x1fe   : > { %2342 = vst [vmem:[#allocation1 + $0x2] ss:$4 sm:$0xff] %v2053_v14  ;;  %v1359_v53 = vadd.f32 %v1358_v60, %v1203_v57  ;;  %v1512_v9 = vpop.f32.mrf.mxu1  ;;  %v1594_v60 = vrot.slane %v3715_v46, 7 }
 0x1ff   : > { %2343 = vst [vmem:[#allocation1 + $0x3] ss:$4 sm:$0xff] %v2054_v63  ;;  %v1655_v37 = vperm.slane %v1591_v36, 0  ;;  %v1656_v21 = vperm.slane %v1592_v27, 0  ;;  %v1657_v51 = vperm.slane %v1593_v26, 0 }
 0x200   : > { %v2339_v4 = vld.sshfl [vmem:[#allocation1 + $0x20] sm:$0xff pattern:$0x73625140]  ;;  %v1505_v6 = vadd.f32 %v1504_v15, %v1359_v53  ;;  %v1001_v11 = vpop.f32.mrf.mxu2  ;;  %v1658_v33 = vperm.slane %v1594_v60, 0 }
 0x201   : > { %2428 = vst.msk [vmem:[%s3336_s7 + $0xc8] sm:$0xff] %vm2402_vm2, %v2339_v4  ;;  %v1002_v22 = vadd.f32 %v1001_v11, %v3919_v52 }
 0x202   : > { %v1836_v40 = vrot.slane %v1505_v6, 2  ;;  %v1837_v1 = vrot.slane %v1505_v6, 4  ;;  %v1838_v59 = vrot.slane %v1505_v6, 6  ;;  %v2055_v2 = vadd.f32 %v1647_v50, %v1505_v6 }
 0x203   : > { %v1209_v3 = vadd.f32 %v1208_v34, %v1002_v22  ;;  %v1366_v43 = vpop.f32.mrf.mxu0 }
 0x204   : > { %v2056_v31 = vadd.f32 %v1836_v40, %v1648_v5  ;;  %v2057_v10 = vadd.f32 %v1837_v1, %v1649_v35  ;;  %2344 = vst [vmem:[#allocation1 + $0x20] ss:$4 sm:$0xff] %v2055_v2  ;;  %v2058_v30 = vadd.f32 %v1838_v59, %v1650_v42  ;;  %v1214_v23 = vpop.f32.mrf.mxu3  ;;  %v3920_v42 = vld [vmem:[#allocation32_spill] sm:$0xff] }
 0x205   : > { %v1363_v7 = vadd.f32 %v1362_v0, %v1209_v3  ;;  %v3922_v2 = vld [vmem:[#allocation36_spill] sm:$0xff] }
 0x206   : > { %v2348_v16 = vld.sshfl [vmem:[#allocation1] sm:$0xff pattern:$0x73625140]  ;;  %2345 = vst [vmem:[#allocation1 + $0x21] ss:$4 sm:$0xff] %v2056_v31  ;;  %v1516_v34 = vpop.f32.mrf.mxu1 }
 0x207   : > { %2429 = vst.msk [vmem:[%s3336_s7 + $0xd0] sm:$0xff] %vm2402_vm2, %v2348_v16  ;;  %v1509_v18 = vadd.f32 %v1508_v48, %v1363_v7 }
 0x208   : > { %2346 = vst [vmem:[#allocation1 + $0x22] ss:$4 sm:$0xff] %v2057_v10  ;;  %v1006_v50 = vpop.f32.mrf.mxu2 }
 0x209   : > { %2347 = vst [vmem:[#allocation1 + $0x23] ss:$4 sm:$0xff] %v2058_v30  ;;  %v1839_v8 = vrot.slane %v1509_v18, 2  ;;  %v1840_v49 = vrot.slane %v1509_v18, 4  ;;  %v1841_v5 = vrot.slane %v1509_v18, 6  ;;  %v2059_v35 = vadd.f32 %v1651_v19, %v1509_v18 }
 0x20a   : > { %v1007_v29 = vadd.f32 %v1006_v50, %v3920_v42 }
 0x20b   : > { %v2060_v62 = vadd.f32 %v1839_v8, %v1652_v24  ;;  %v2061_v12 = vadd.f32 %v1840_v49, %v1653_v38  ;;  %v2062_v17 = vadd.f32 %v1841_v5, %v1654_v61  ;;  %2350 = vst [vmem:[#allocation1] ss:$4 sm:$0xff] %v2059_v35  ;;  %v1370_v55 = vpop.f32.mrf.mxu0 }
 0x20c   : > { %v1215_v28 = vadd.f32 %v1214_v23, %v1007_v29  ;;  %v1220_v13 = vpop.f32.mrf.mxu3 }
 0x20d   : > { %2351 = vst [vmem:[#allocation1 + $0x1] ss:$4 sm:$0xff] %v2060_v62 }
 0x20e   : > { %2352 = vst [vmem:[#allocation1 + $0x2] ss:$4 sm:$0xff] %v2061_v12  ;;  %v1367_v20 = vadd.f32 %v1366_v43, %v1215_v28  ;;  %v1520_v30 = vpop.f32.mrf.mxu1 }
 0x20f   : > { %2353 = vst [vmem:[#allocation1 + $0x3] ss:$4 sm:$0xff] %v2062_v17 }
 0x210   : > { %v2349_v39 = vld.sshfl [vmem:[#allocation1 + $0x20] sm:$0xff pattern:$0x73625140]  ;;  %v1513_v15 = vadd.f32 %v1512_v9, %v1367_v20  ;;  %v1011_v54 = vpop.f32.mrf.mxu2 }
 0x211   : > { %2430 = vst.msk [vmem:[%s3336_s7 + $0xd8] sm:$0xff] %vm2402_vm2, %v2349_v39  ;;  %v1012_v32 = vadd.f32 %v1011_v54, %v3921_v58 }
 0x212   : > { %v1842_v44 = vrot.slane %v1513_v15, 2  ;;  %v1843_v45 = vrot.slane %v1513_v15, 4  ;;  %v1844_v41 = vrot.slane %v1513_v15, 6  ;;  %v2063_v14 = vadd.f32 %v1655_v37, %v1513_v15 }
 0x213   : > { %v1221_v63 = vadd.f32 %v1220_v13, %v1012_v32  ;;  %v1374_v31 = vpop.f32.mrf.mxu0 }
 0x214   : > { %v2064_v57 = vadd.f32 %v1842_v44, %v1656_v21  ;;  %v2065_v0 = vadd.f32 %v1843_v45, %v1657_v51  ;;  %2354 = vst [vmem:[#allocation1 + $0x20] ss:$4 sm:$0xff] %v2063_v14  ;;  %v2066_v53 = vadd.f32 %v1844_v41, %v1658_v33  ;;  %v1226_v59 = vpop.f32.mrf.mxu3 }
 0x215   : > { %v1371_v48 = vadd.f32 %v1370_v55, %v1221_v63 }
 0x216   : > { %v2358_v4 = vld.sshfl [vmem:[#allocation1] sm:$0xff pattern:$0x73625140]  ;;  %2355 = vst [vmem:[#allocation1 + $0x21] ss:$4 sm:$0xff] %v2064_v57 }
 0x217   : > { %2431 = vst.msk [vmem:[%s3336_s7 + $0xe0] sm:$0xff] %vm2402_vm2, %v2358_v4  ;;  %v1517_v6 = vadd.f32 %v1516_v34, %v1371_v48 }
 0x218   : > { %2356 = vst [vmem:[#allocation1 + $0x22] ss:$4 sm:$0xff] %v2065_v0  ;;  %v1016_v11 = vpop.f32.mrf.mxu2 }
 0x219   : > { %2357 = vst [vmem:[#allocation1 + $0x23] ss:$4 sm:$0xff] %v2066_v53  ;;  %v1845_v52 = vrot.slane %v1517_v6, 2  ;;  %v1846_v22 = vrot.slane %v1517_v6, 4  ;;  %v1847_v40 = vrot.slane %v1517_v6, 6  ;;  %v2067_v1 = vadd.f32 %v1651_v19, %v1517_v6 }
 0x21a   : > { %v1017_v3 = vadd.f32 %v1016_v11, %v3922_v2 }
 0x21b   : > { %v2068_v25 = vadd.f32 %v1845_v52, %v1652_v24  ;;  %v2069_v47 = vadd.f32 %v1846_v22, %v1653_v38  ;;  %v2070_v56 = vadd.f32 %v1847_v40, %v1654_v61  ;;  %2360 = vst [vmem:[#allocation1] ss:$4 sm:$0xff] %v2067_v1 }
 0x21c   : > { %v1227_v10 = vadd.f32 %v1226_v59, %v1017_v3 }
 0x21d   : > { %2361 = vst [vmem:[#allocation1 + $0x1] ss:$4 sm:$0xff] %v2068_v25 }
 0x21e   : > { %2362 = vst [vmem:[#allocation1 + $0x2] ss:$4 sm:$0xff] %v2069_v47  ;;  %v1375_v7 = vadd.f32 %v1374_v31, %v1227_v10 }
 0x21f   : > { %2363 = vst [vmem:[#allocation1 + $0x3] ss:$4 sm:$0xff] %v2070_v56 }
 0x220   : > { %v2359_v23 = vld.sshfl [vmem:[#allocation1 + $0x20] sm:$0xff pattern:$0x73625140]  ;;  %v1521_v16 = vadd.f32 %v1520_v30, %v1375_v7 }
 0x221   : > { %2432 = vst.msk [vmem:[%s3336_s7 + $0xe8] sm:$0xff] %vm2402_vm2, %v2359_v23 }
 0x222   : > { %v1848_v46 = vrot.slane %v1521_v16, 2  ;;  %v1849_v19 = vrot.slane %v1521_v16, 4  ;;  %v1850_v18 = vrot.slane %v1521_v16, 6  ;;  %v2071_v24 = vadd.f32 %v1655_v37, %v1521_v16 }
 0x224   : > { %v2072_v38 = vadd.f32 %v1848_v46, %v1656_v21  ;;  %v2073_v61 = vadd.f32 %v1849_v19, %v1657_v51  ;;  %2364 = vst [vmem:[#allocation1 + $0x20] ss:$4 sm:$0xff] %v2071_v24  ;;  %v2074_v43 = vadd.f32 %v1850_v18, %v1658_v33 }
 0x226   : > { %v2368_v50 = vld.sshfl [vmem:[#allocation1] sm:$0xff pattern:$0x73625140]  ;;  %2365 = vst [vmem:[#allocation1 + $0x21] ss:$4 sm:$0xff] %v2072_v38 }
 0x227   : > { %2433 = vst.msk [vmem:[%s3336_s7 + $0xf0] sm:$0xff] %vm2402_vm2, %v2368_v50 }
 0x228   : > { %2366 = vst [vmem:[#allocation1 + $0x22] ss:$4 sm:$0xff] %v2073_v61 }
 0x229   : > { %2367 = vst [vmem:[#allocation1 + $0x23] ss:$4 sm:$0xff] %v2074_v43 }
 0x230   : > { %v2369_v8 = vld.sshfl [vmem:[#allocation1 + $0x20] sm:$0xff pattern:$0x73625140] }
 0x231   : > { %2434 = vst.msk [vmem:[%s3336_s7 + $0xf8] sm:$0xff] %vm2402_vm2, %v2369_v8 }
 0x232 PF: > { %s14_s17 = sadd.s32 1, %s2615_s17   ;;  %s3923_s15 = smov %s2611_s16 }
 0x233   : > { %p11_p5 = scmp.ge.s32.totalorder %s14_s17, 4   ;;  %s3924_s16 = smov %s3926_s18 }
 0x235   :  { %13 = sbr.rel (!%p11_p5) target bundleno = 2 (0x2), region = 76 }

// kernel: tpu_custom_call.1
= control target key start
LH: loop header
LB: loop body
LE: loop exit
PB: predicated region body
PF: predicated region fallthrough
CT: control target
= control target key end

     0   :  { %s1682_s15 = smov 0   ;;  %s1684_s16 = smov 0   ;;  %s1999_s0 = inlined_call_operand.vmem [shape: f32[2,8,8,8], index: 0, kind: input, shape index: {}]   ;;  %s2000_s1 = inlined_call_operand.vmem [shape: f32[2,16,16,4], index: 1, kind: input, shape index: {}]   ;;  %s2001_s2 = inlined_call_operand.vmem [shape: f32[4,8], index: 2, kind: input, shape index: {}]   ;;  %s2002_s3 = inlined_call_operand.vmem [shape: f32[1,8], index: 3, kind: input, shape index: {}]   ;;  %s2003_s4 = inlined_call_operand.vmem [shape: f32[2,16,16,8], index: 4, kind: output, shape index: {}]  }
   0x1   :  { %s1686_s17 = smov 0  }
   0x2 LB: > { %s26_s18 = sadd.s32 1, %s1651_s16  ;;  %p1559_p0 = scmp.ge.s32.totalorder %s1655_s17, 1  ;;  %s1655_s17 = sphi %s1686_s17, %s14_s17   ;;  %s1651_s16 = sphi %s1684_s16, %s2005_s16   ;;  %s1647_s15 = sphi %s1682_s15, %s2004_s15  }
   0x3   : > { %p28_p1 = scmp.ge.s32.totalorder %s26_s18, 2  ;;  %p201_p2 = scmp.lt.s32.totalorder %s1655_s17, 3 }
   0x5   : > { %s2007_s18 = smov (%p28_p1, %s26_s18), 0  ;;  %p202_p3 = pnand %p1559_p0, %p201_p2 }
   0x6   : > { %p247_p4 = scmp.lt.s32.totalorder (!%p202_p3), %s1647_s15, 1 }
   0x7   : > { %205 = sbr.rel (%p202_p3) target bundleno = 378 (0x17a), region = 36 }
   0xc   : > { %v310_v0 = vld [vmem:[%s2001_s2] sm:$0xf]  ;;  %vm412_vm0 = vcmask 1043456   ;;  %s2009_s15 = smov (!%p247_p4, %s1647_s15), 1  ;;  %vm315_vm1 = vcmask 31744   ;;  %vm1408_vm2 = vcmask 64512  }
   0xd   : > { %1566 = vmatpush.msk.msra.mxu0 %vm412_vm0, %v310_v0  ;;  %1604 = vmatpush.msk.msra.mxu1 %vm412_vm0, %v310_v0  ;;  %s1602_s21 = sshll.u32 %s2009_s15, 8  ;;  %s1601_s25 = sshll.u32 %s2009_s15, 6  ;;  %v1787_v34 = vld [vmem:[%s2002_s3] ss:$0 sm:$0xff] }
   0xe   : > { %1605 = vmatpush.msk.msra.mxu2 %vm412_vm0, %v310_v0  ;;  %1606 = vmatpush.msk.msra.mxu3 %vm412_vm0, %v310_v0  ;;  %s1711_s24 = scalar_lea.vmem %s2000_s1, %s1602_s21  ;;  %s1780_s28 = scalar_lea.vmem %s1999_s0, %s1601_s25 }
   0xf   : > { %v278_v1 = vld [vmem:[%s1711_s24] sm:$0xff]  ;;  %v279_v3 = vld [vmem:[%s1711_s24 + $0x8] sm:$0xff]  ;;  %v280_v5 = vld [vmem:[%s1711_s24 + $0x10] sm:$0xff]  ;;  %s1796_s7 = scalar_lea.vmem %s2003_s4, %s1602_s21 }
  0x10   : > { %1567 = vmatmul.msk.f32.vlgmr.msra.gmra.mxu0 %vm315_vm1, %v278_v1  ;;  %v286_v2 = vld [vmem:[%s1711_s24 + $0x40] sm:$0xff]  ;;  %v287_v4 = vld [vmem:[%s1711_s24 + $0x48] sm:$0xff]  ;;  %v288_v6 = vld [vmem:[%s1711_s24 + $0x50] sm:$0xff] }
  0x11   : > { %1575 = vmatmul.msk.f32.vlgmr.msra.gmra.mxu1 %vm315_vm1, %v286_v2  ;;  %v281_v7 = vld [vmem:[%s1711_s24 + $0x18] sm:$0xff]  ;;  %v294_v9 = vld [vmem:[%s1711_s24 + $0x80] sm:$0xff]  ;;  %v295_v13 = vld [vmem:[%s1711_s24 + $0x88] sm:$0xff] }
  0x12   : > { %v289_v8 = vld [vmem:[%s1711_s24 + $0x58] sm:$0xff]  ;;  %1583 = vmatmul.msk.f32.vlgmr.msra.gmra.mxu2 %vm315_vm1, %v294_v9  ;;  %v302_v10 = vld [vmem:[%s1711_s24 + $0xc0] sm:$0xff]  ;;  %v303_v14 = vld [vmem:[%s1711_s24 + $0xc8] sm:$0xff] }
  0x13   : > { %1591 = vmatmul.msk.f32.vlgmr.msra.gmra.mxu3 %vm315_vm1, %v302_v10  ;;  %v282_v11 = vld [vmem:[%s1711_s24 + $0x20] sm:$0xff]  ;;  %v283_v15 = vld [vmem:[%s1711_s24 + $0x28] sm:$0xff]  ;;  %v296_v17 = vld [vmem:[%s1711_s24 + $0x90] sm:$0xff] }
  0x14   : > { %v290_v12 = vld [vmem:[%s1711_s24 + $0x60] sm:$0xff]  ;;  %v291_v16 = vld [vmem:[%s1711_s24 + $0x68] sm:$0xff]  ;;  %v304_v18 = vld [vmem:[%s1711_s24 + $0xd0] sm:$0xff] }
  0x15   : > { %v284_v19 = vld [vmem:[%s1711_s24 + $0x30] sm:$0xff]  ;;  %v297_v21 = vld [vmem:[%s1711_s24 + $0x98] sm:$0xff]  ;;  %v298_v25 = vld [vmem:[%s1711_s24 + $0xa0] sm:$0xff] }
  0x16   : > { %v292_v20 = vld [vmem:[%s1711_s24 + $0x70] sm:$0xff]  ;;  %v305_v22 = vld [vmem:[%s1711_s24 + $0xd8] sm:$0xff]  ;;  %v306_v26 = vld [vmem:[%s1711_s24 + $0xe0] sm:$0xff] }
  0x17   : > { %v285_v23 = vld [vmem:[%s1711_s24 + $0x38] sm:$0xff]  ;;  %v299_v27 = vld [vmem:[%s1711_s24 + $0xa8] sm:$0xff]  ;;  %v300_v28 = vld [vmem:[%s1711_s24 + $0xb0] sm:$0xff] }
  0x18   : > { %1568 = vmatmul.msk.f32.gmra.mxu0 %vm315_vm1, %v279_v3  ;;  %v293_v24 = vld [vmem:[%s1711_s24 + $0x78] sm:$0xff]  ;;  %v307_v30 = vld [vmem:[%s1711_s24 + $0xe8] sm:$0xff]  ;;  %v308_v31 = vld [vmem:[%s1711_s24 + $0xf0] sm:$0xff] }
  0x19   : > { %1576 = vmatmul.msk.f32.gmra.mxu1 %vm315_vm1, %v287_v4  ;;  %v301_v29 = vld [vmem:[%s1711_s24 + $0xb8] sm:$0xff]  ;;  %v529_v33 = vld [vmem:[%s1780_s28] sm:$0xff] }
  0x1a   : > { %1584 = vmatmul.msk.f32.gmra.mxu2 %vm315_vm1, %v295_v13  ;;  %v309_v32 = vld [vmem:[%s1711_s24 + $0xf8] sm:$0xff]  ;;  %v545_v35 = vrot.slane %v529_v33, 1  ;;  %v546_v36 = vrot.slane %v529_v33, 2  ;;  %v547_v37 = vrot.slane %v529_v33, 3  ;;  %v601_v38 = vperm.slane %v529_v33, 0 }
  0x1b   : > { %1592 = vmatmul.msk.f32.gmra.mxu3 %vm315_vm1, %v303_v14  ;;  %v548_v44 = vrot.slane %v529_v33, 4  ;;  %v549_v49 = vrot.slane %v529_v33, 5  ;;  %v550_v50 = vrot.slane %v529_v33, 6  ;;  %v551_v54 = vrot.slane %v529_v33, 7 }
  0x1c   : > { %v602_v41 = vperm.slane %v545_v35, 0  ;;  %v603_v42 = vperm.slane %v546_v36, 0  ;;  %v604_v43 = vperm.slane %v547_v37, 0 }
  0x1d   : > { %v605_v55 = vperm.slane %v548_v44, 0  ;;  %v606_v58 = vperm.slane %v549_v49, 0  ;;  %v607_v59 = vperm.slane %v550_v50, 0  ;;  %v608_v60 = vperm.slane %v551_v54, 0 }
  0x20   : > { %1569 = vmatmul.msk.f32.gmra.mxu0 %vm315_vm1, %v280_v5 }
  0x21   : > { %1577 = vmatmul.msk.f32.gmra.mxu1 %vm315_vm1, %v288_v6 }
  0x22   : > { %1585 = vmatmul.msk.f32.gmra.mxu2 %vm315_vm1, %v296_v17  ;;  %v1803_v17 = vld [vmem:[%s1780_s28 + $0x8] sm:$0xff] }
  0x23   : > { %1593 = vmatmul.msk.f32.gmra.mxu3 %vm315_vm1, %v304_v18  ;;  %v555_v37 = vrot.slane %v1803_v17, 4  ;;  %v557_v44 = vrot.slane %v1803_v17, 6 }
  0x25   : > { %v613_v49 = vperm.slane %v555_v37, 0  ;;  %v615_v54 = vperm.slane %v557_v44, 0 }
  0x28   : > { %1570 = vmatmul.msk.f32.gmra.mxu0 %vm315_vm1, %v281_v7 }
  0x29   : > { %1578 = vmatmul.msk.f32.gmra.mxu1 %vm315_vm1, %v289_v8 }
  0x2a   : > { %1586 = vmatmul.msk.f32.gmra.mxu2 %vm315_vm1, %v297_v21 }
  0x2b   : > { %1594 = vmatmul.msk.f32.gmra.mxu3 %vm315_vm1, %v305_v22 }
  0x30   : > { %1571 = vmatmul.msk.f32.gmra.mxu0 %vm315_vm1, %v282_v11 }
  0x31   : > { %1579 = vmatmul.msk.f32.gmra.mxu1 %vm315_vm1, %v290_v12 }
  0x32   : > { %1587 = vmatmul.msk.f32.gmra.mxu2 %vm315_vm1, %v298_v25 }
  0x33   : > { %1595 = vmatmul.msk.f32.gmra.mxu3 %vm315_vm1, %v306_v26 }
  0x38   : > { %1572 = vmatmul.msk.f32.gmra.mxu0 %vm315_vm1, %v283_v15 }
  0x39   : > { %1580 = vmatmul.msk.f32.gmra.mxu1 %vm315_vm1, %v291_v16 }
  0x3a   : > { %1588 = vmatmul.msk.f32.gmra.mxu2 %vm315_vm1, %v299_v27 }
  0x3b   : > { %1596 = vmatmul.msk.f32.gmra.mxu3 %vm315_vm1, %v307_v30 }
  0x40   : > { %1573 = vmatmul.msk.f32.gmra.mxu0 %vm315_vm1, %v284_v19 }
  0x41   : > { %1581 = vmatmul.msk.f32.gmra.mxu1 %vm315_vm1, %v292_v20 }
  0x42   : > { %1589 = vmatmul.msk.f32.gmra.mxu2 %vm315_vm1, %v300_v28  ;;  %v554_v28 = vrot.slane %v1803_v17, 3 }
  0x43   : > { %1597 = vmatmul.msk.f32.gmra.mxu3 %vm315_vm1, %v308_v31 }
  0x44   : > { %v612_v36 = vperm.slane %v554_v28, 0 }
  0x48   : > { %1574 = vmatmul.msk.f32.gmra.mxu0 %vm315_vm1, %v285_v23  ;;  %v552_v23 = vrot.slane %v1803_v17, 1 }
  0x49   : > { %1582 = vmatmul.msk.f32.gmra.mxu1 %vm315_vm1, %v293_v24  ;;  %v553_v24 = vrot.slane %v1803_v17, 2 }
  0x4a   : > { %1590 = vmatmul.msk.f32.gmra.mxu2 %vm315_vm1, %v301_v29  ;;  %v609_v29 = vperm.slane %v1803_v17, 0  ;;  %v610_v33 = vperm.slane %v552_v23, 0 }
  0x4b   : > { %1598 = vmatmul.msk.f32.gmra.mxu3 %vm315_vm1, %v309_v32  ;;  %v611_v35 = vperm.slane %v553_v24, 0 }
  0x8d   : > { %v433_v39 = vpop.f32.mrf.mxu0 }
  0x8e   : > { %v434_v40 = vadd.f32 %v1787_v34, %v433_v39  ;;  %v1805_v18 = vpop.f32.mrf.mxu1 }
  0x90   : > { %v761_v45 = vrot.slane %v434_v40, 2  ;;  %v762_v46 = vrot.slane %v434_v40, 4  ;;  %v763_v47 = vrot.slane %v434_v40, 6  ;;  %v953_v48 = vadd.f32 %v601_v38, %v434_v40 }
  0x92   : > { %v954_v51 = vadd.f32 %v761_v45, %v602_v41  ;;  %v955_v52 = vadd.f32 %v762_v46, %v603_v42  ;;  %v956_v53 = vadd.f32 %v763_v47, %v604_v43  ;;  %1209 = vst [vmem:[#allocation1] ss:$4 sm:$0xff] %v953_v48  ;;  %v558_v48 = vrot.slane %v1803_v17, 7 }
  0x94   : > { %1211 = vst [vmem:[#allocation1 + $0x1] ss:$4 sm:$0xff] %v954_v51 }
  0x95   : > { %1213 = vst [vmem:[#allocation1 + $0x2] ss:$4 sm:$0xff] %v955_v52  ;;  %v436_v56 = vpop.f32.mrf.mxu0 }
  0x96   : > { %1215 = vst [vmem:[#allocation1 + $0x3] ss:$4 sm:$0xff] %v956_v53  ;;  %v437_v57 = vadd.f32 %v1787_v34, %v436_v56 }
  0x98   : > { %v764_v61 = vrot.slane %v437_v57, 2  ;;  %v765_v62 = vrot.slane %v437_v57, 4  ;;  %v766_v63 = vrot.slane %v437_v57, 6  ;;  %v957_v0 = vadd.f32 %v605_v55, %v437_v57 }
  0x9a   : > { %v958_v1 = vadd.f32 %v764_v61, %v606_v58  ;;  %v959_v2 = vadd.f32 %v765_v62, %v607_v59  ;;  %v960_v3 = vadd.f32 %v766_v63, %v608_v60  ;;  %1217 = vst [vmem:[#allocation1 + $0x20] ss:$4 sm:$0xff] %v957_v0 }
  0x9c   : > { %1219 = vst [vmem:[#allocation1 + $0x21] ss:$4 sm:$0xff] %v958_v1 }
  0x9d   : > { %v1224_v4 = vld.sshfl [vmem:[#allocation1] sm:$0xff pattern:$0x73625140]  ;;  %1221 = vst [vmem:[#allocation1 + $0x22] ss:$4 sm:$0xff] %v959_v2  ;;  %v439_v5 = vpop.f32.mrf.mxu0 }
  0x9e   : > { %1223 = vst [vmem:[#allocation1 + $0x23] ss:$4 sm:$0xff] %v960_v3  ;;  %v440_v6 = vadd.f32 %v1787_v34, %v439_v5 }
  0x9f   : > { %1409 = vst.msk [vmem:[%s1796_s7] sm:$0xff] %vm1408_vm2, %v1224_v4 }
  0xa0   : > { %v767_v7 = vrot.slane %v440_v6, 2  ;;  %v768_v8 = vrot.slane %v440_v6, 4  ;;  %v769_v9 = vrot.slane %v440_v6, 6  ;;  %v961_v10 = vadd.f32 %v601_v38, %v440_v6 }
  0xa2   : > { %v962_v11 = vadd.f32 %v767_v7, %v602_v41  ;;  %v963_v12 = vadd.f32 %v768_v8, %v603_v42  ;;  %v964_v13 = vadd.f32 %v769_v9, %v604_v43  ;;  %1226 = vst [vmem:[#allocation1] ss:$4 sm:$0xff] %v961_v10  ;;  %v1817_v42 = vpop.f32.mrf.mxu1  ;;  %v556_v43 = vrot.slane %v1803_v17, 5  ;;  %v1829_v7 = vld [vmem:[%s1780_s28 + $0x10] sm:$0xff] }
  0xa3   : > { %v563_v44 = vrot.slane %v1829_v7, 5 }
  0xa4   : > { %1227 = vst [vmem:[#allocation1 + $0x1] ss:$4 sm:$0xff] %v962_v11  ;;  %v614_v53 = vperm.slane %v556_v43, 0  ;;  %v461_v43 = vadd.f32 %v1787_v34, %v1817_v42 }
  0xa5   : > { %v1225_v14 = vld.sshfl [vmem:[#allocation1 + $0x20] sm:$0xff pattern:$0x73625140]  ;;  %1228 = vst [vmem:[#allocation1 + $0x2] ss:$4 sm:$0xff] %v963_v12  ;;  %v442_v15 = vpop.f32.mrf.mxu0  ;;  %v458_v12 = vadd.f32 %v1787_v34, %v1805_v18 }
  0xa6   : > { %1229 = vst [vmem:[#allocation1 + $0x3] ss:$4 sm:$0xff] %v964_v13  ;;  %v443_v16 = vadd.f32 %v1787_v34, %v442_v15  ;;  %v559_v13 = vrot.slane %v1829_v7, 1 }
  0xa7   : > { %1410 = vst.msk [vmem:[%s1796_s7 + $0x8] sm:$0xff] %vm1408_vm2, %v1225_v14  ;;  %v785_v24 = vrot.slane %v458_v12, 2 }
  0xa8   : > { %v770_v19 = vrot.slane %v443_v16, 2  ;;  %v771_v20 = vrot.slane %v443_v16, 4  ;;  %v772_v21 = vrot.slane %v443_v16, 6  ;;  %v965_v22 = vadd.f32 %v605_v55, %v443_v16 }
  0xa9   : > { %v616_v55 = vperm.slane %v558_v48, 0  ;;  %v560_v16 = vrot.slane %v1829_v7, 2  ;;  %v618_v18 = vperm.slane %v559_v13, 0 }
  0xaa   : > { %v966_v25 = vadd.f32 %v770_v19, %v606_v58  ;;  %v967_v26 = vadd.f32 %v771_v20, %v607_v59  ;;  %v968_v27 = vadd.f32 %v772_v21, %v608_v60  ;;  %1230 = vst [vmem:[#allocation1 + $0x20] ss:$4 sm:$0xff] %v965_v22  ;;  %v463_v63 = vpop.f32.mrf.mxu1  ;;  %v561_v19 = vrot.slane %v1829_v7, 3 }
  0xab   : > { %v617_v20 = vperm.slane %v1829_v7, 0 }
  0xac   : > { %1231 = vst [vmem:[#allocation1 + $0x21] ss:$4 sm:$0xff] %v966_v25  ;;  %v786_v25 = vrot.slane %v458_v12, 4 }
  0xad   : > { %v1234_v30 = vld.sshfl [vmem:[#allocation1] sm:$0xff pattern:$0x73625140]  ;;  %1232 = vst [vmem:[#allocation1 + $0x22] ss:$4 sm:$0xff] %v967_v26  ;;  %v445_v31 = vpop.f32.mrf.mxu0  ;;  %v619_v26 = vperm.slane %v560_v16, 0 }
  0xae   : > { %1233 = vst [vmem:[#allocation1 + $0x23] ss:$4 sm:$0xff] %v968_v27  ;;  %v446_v32 = vadd.f32 %v1787_v34, %v445_v31  ;;  %v787_v31 = vrot.slane %v458_v12, 6 }
  0xaf   : > { %1411 = vst.msk [vmem:[%s1796_s7 + $0x10] sm:$0xff] %vm1408_vm2, %v1234_v30  ;;  %v620_v30 = vperm.slane %v561_v19, 0 }
  0xb0   : > { %v773_v38 = vrot.slane %v446_v32, 2  ;;  %v774_v39 = vrot.slane %v446_v32, 4  ;;  %v775_v40 = vrot.slane %v446_v32, 6  ;;  %v969_v41 = vadd.f32 %v609_v29, %v446_v32 }
  0xb1   : > { %v985_v32 = vadd.f32 %v617_v20, %v458_v12 }
  0xb2   : > { %v970_v45 = vadd.f32 %v773_v38, %v610_v33  ;;  %v971_v46 = vadd.f32 %v774_v39, %v611_v35  ;;  %v972_v47 = vadd.f32 %v775_v40, %v612_v36  ;;  %1236 = vst [vmem:[#allocation1] ss:$4 sm:$0xff] %v969_v41  ;;  %v1831_v11 = vpop.f32.mrf.mxu1  ;;  %v988_v39 = vadd.f32 %v787_v31, %v620_v30 }
  0xb3   : > { %v464_v40 = vadd.f32 %v1787_v34, %v463_v63  ;;  %v562_v41 = vrot.slane %v1829_v7, 4 }
  0xb4   : > { %1237 = vst [vmem:[#allocation1 + $0x1] ss:$4 sm:$0xff] %v970_v45 }
  0xb5   : > { %v1235_v50 = vld.sshfl [vmem:[#allocation1 + $0x20] sm:$0xff pattern:$0x73625140]  ;;  %1238 = vst [vmem:[#allocation1 + $0x2] ss:$4 sm:$0xff] %v971_v46  ;;  %v448_v51 = vpop.f32.mrf.mxu0  ;;  %v791_v45 = vrot.slane %v464_v40, 2 }
  0xb6   : > { %1239 = vst [vmem:[#allocation1 + $0x3] ss:$4 sm:$0xff] %v972_v47  ;;  %v449_v52 = vadd.f32 %v1787_v34, %v448_v51  ;;  %v564_v46 = vrot.slane %v1829_v7, 6  ;;  %v565_v47 = vrot.slane %v1829_v7, 7  ;;  %v792_v48 = vrot.slane %v464_v40, 4 }
  0xb7   : > { %1412 = vst.msk [vmem:[%s1796_s7 + $0x18] sm:$0xff] %vm1408_vm2, %v1235_v50  ;;  %v621_v50 = vperm.slane %v562_v41, 0  ;;  %v993_v51 = vadd.f32 %v617_v20, %v464_v40 }
  0xb8   : > { %v776_v56 = vrot.slane %v449_v52, 2  ;;  %v777_v57 = vrot.slane %v449_v52, 4  ;;  %v778_v58 = vrot.slane %v449_v52, 6  ;;  %v973_v59 = vadd.f32 %v613_v49, %v449_v52 }
  0xb9   : > { %v622_v52 = vperm.slane %v563_v44, 0  ;;  %v624_v42 = vperm.slane %v565_v47, 0 }
  0xba   : > { %v974_v60 = vadd.f32 %v776_v56, %v614_v53  ;;  %v975_v61 = vadd.f32 %v777_v57, %v615_v54  ;;  %v976_v62 = vadd.f32 %v778_v58, %v616_v55  ;;  %1240 = vst [vmem:[#allocation1 + $0x20] ss:$4 sm:$0xff] %v973_v59  ;;  %v469_v38 = vpop.f32.mrf.mxu1  ;;  %v1852_v56 = vld [vmem:[%s1780_s28 + $0x18] sm:$0xff]  ;;  %v623_v58 = vperm.slane %v564_v46, 0 }
  0xbb   : > { %v789_v59 = vrot.slane %v461_v43, 4 }
  0xbc   : > { %1241 = vst [vmem:[#allocation1 + $0x21] ss:$4 sm:$0xff] %v974_v60  ;;  %v995_v60 = vadd.f32 %v792_v48, %v619_v26 }
  0xbd   : > { %v1244_v0 = vld.sshfl [vmem:[#allocation1] sm:$0xff pattern:$0x73625140]  ;;  %1242 = vst [vmem:[#allocation1 + $0x22] ss:$4 sm:$0xff] %v975_v61  ;;  %v451_v1 = vpop.f32.mrf.mxu0  ;;  %v790_v61 = vrot.slane %v461_v43, 6 }
  0xbe   : > { %1243 = vst [vmem:[#allocation1 + $0x23] ss:$4 sm:$0xff] %v976_v62  ;;  %v452_v2 = vadd.f32 %v1787_v34, %v451_v1  ;;  %v470_v1 = vadd.f32 %v1787_v34, %v469_v38 }
  0xbf   : > { %1413 = vst.msk [vmem:[%s1796_s7 + $0x20] sm:$0xff] %vm1408_vm2, %v1244_v0  ;;  %v989_v0 = vadd.f32 %v621_v50, %v461_v43  ;;  %v992_v7 = vadd.f32 %v790_v61, %v624_v42 }
  0xc0   : > { %v779_v3 = vrot.slane %v452_v2, 2  ;;  %v780_v4 = vrot.slane %v452_v2, 4  ;;  %v781_v5 = vrot.slane %v452_v2, 6  ;;  %v977_v6 = vadd.f32 %v609_v29, %v452_v2 }
  0xc1   : > { %v566_v2 = vrot.slane %v1852_v56, 1  ;;  %v797_v12 = vrot.slane %v470_v1, 2  ;;  %v799_v16 = vrot.slane %v470_v1, 6 }
  0xc2   : > { %v978_v8 = vadd.f32 %v779_v3, %v610_v33  ;;  %v979_v9 = vadd.f32 %v780_v4, %v611_v35  ;;  %v980_v10 = vadd.f32 %v781_v5, %v612_v36  ;;  %1246 = vst [vmem:[#allocation1] ss:$4 sm:$0xff] %v977_v6  ;;  %v986_v33 = vadd.f32 %v785_v24, %v618_v18  ;;  %v472_v57 = vpop.f32.mrf.mxu1 }
  0xc3   : > { %v987_v36 = vadd.f32 %v786_v25, %v619_v26  ;;  %v567_v4 = vrot.slane %v1852_v56, 2  ;;  %v991_v5 = vadd.f32 %v789_v59, %v623_v58  ;;  %v568_v6 = vrot.slane %v1852_v56, 3 }
  0xc4   : > { %1247 = vst [vmem:[#allocation1 + $0x1] ss:$4 sm:$0xff] %v978_v8  ;;  %v625_v8 = vperm.slane %v1852_v56, 0 }
  0xc5   : > { %v1245_v14 = vld.sshfl [vmem:[#allocation1 + $0x20] sm:$0xff pattern:$0x73625140]  ;;  %1248 = vst [vmem:[#allocation1 + $0x2] ss:$4 sm:$0xff] %v979_v9  ;;  %v454_v15 = vpop.f32.mrf.mxu0  ;;  %v467_v9 = vadd.f32 %v1787_v34, %v1831_v11  ;;  %v627_v13 = vperm.slane %v567_v4, 0 }
  0xc6   : > { %1249 = vst [vmem:[#allocation1 + $0x3] ss:$4 sm:$0xff] %v980_v10  ;;  %v455_v17 = vadd.f32 %v1787_v34, %v454_v15  ;;  %v626_v10 = vperm.slane %v566_v2, 0  ;;  %v628_v15 = vperm.slane %v568_v6, 0  ;;  %v1001_v19 = vadd.f32 %v625_v8, %v470_v1 }
  0xc7   : > { %1414 = vst.msk [vmem:[%s1796_s7 + $0x28] sm:$0xff] %vm1408_vm2, %v1245_v14  ;;  %v798_v14 = vrot.slane %v470_v1, 4  ;;  %v796_v24 = vrot.slane %v467_v9, 6 }
  0xc8   : > { %v782_v21 = vrot.slane %v455_v17, 2  ;;  %v783_v22 = vrot.slane %v455_v17, 4  ;;  %v981_v23 = vadd.f32 %v613_v49, %v455_v17  ;;  %v784_v27 = vrot.slane %v455_v17, 6  ;;  %v1863_v17 = vpop.f32.mrf.mxu2 }
  0xc9   : > { %v793_v49 = vrot.slane %v464_v40, 6  ;;  %v1003_v11 = vadd.f32 %v798_v14, %v627_v13  ;;  %v1004_v25 = vadd.f32 %v799_v16, %v628_v15  ;;  %v1000_v31 = vadd.f32 %v796_v24, %v624_v42 }
  0xca   : > { %v982_v28 = vadd.f32 %v782_v21, %v614_v53  ;;  %v983_v29 = vadd.f32 %v783_v22, %v615_v54  ;;  %1250 = vst [vmem:[#allocation1 + $0x20] ss:$4 sm:$0xff] %v981_v23  ;;  %v984_v37 = vadd.f32 %v784_v27, %v616_v55  ;;  %v788_v53 = vrot.slane %v461_v43, 2  ;;  %v475_v20 = vpop.f32.mrf.mxu1 }
  0xcb   : > { %v994_v55 = vadd.f32 %v791_v45, %v618_v18  ;;  %v996_v62 = vadd.f32 %v793_v49, %v620_v30  ;;  %v794_v22 = vrot.slane %v467_v9, 2  ;;  %v1002_v23 = vadd.f32 %v797_v12, %v626_v10 }
  0xcc   : > { %1251 = vst [vmem:[#allocation1 + $0x21] ss:$4 sm:$0xff] %v982_v28  ;;  %v990_v3 = vadd.f32 %v788_v53, %v622_v52  ;;  %v795_v18 = vrot.slane %v467_v9, 4  ;;  %v476_v26 = vadd.f32 %v1787_v34, %v475_v20  ;;  %v997_v27 = vadd.f32 %v621_v50, %v467_v9 }
  0xcd   : > { %v1254_v35 = vld.sshfl [vmem:[#allocation1] sm:$0xff pattern:$0x73625140]  ;;  %1252 = vst [vmem:[#allocation1 + $0x22] ss:$4 sm:$0xff] %v983_v29  ;;  %v998_v29 = vadd.f32 %v794_v22, %v622_v52  ;;  %v572_v40 = vrot.slane %v1852_v56, 7  ;;  %v482_v61 = vadd.f32 %v1787_v34, %v1863_v17 }
  0xce   : > { %1256 = vst [vmem:[#allocation1] ss:$4 sm:$0xff] %v985_v32  ;;  %v999_v30 = vadd.f32 %v795_v18, %v623_v58  ;;  %v803_v32 = vrot.slane %v476_v26, 2  ;;  %v1009_v45 = vadd.f32 %v625_v8, %v476_v26 }
  0xcf   : > { %1257 = vst [vmem:[#allocation1 + $0x1] ss:$4 sm:$0xff] %v986_v33  ;;  %v569_v33 = vrot.slane %v1852_v56, 4  ;;  %v632_v52 = vperm.slane %v572_v40, 0  ;;  %v811_v9 = vrot.slane %v482_v61, 6 }
  0xd0   : > { %1258 = vst [vmem:[#allocation1 + $0x2] ss:$4 sm:$0xff] %v987_v36  ;;  %v473_v36 = vadd.f32 %v1787_v34, %v472_v57  ;;  %v1871_v38 = vpop.f32.mrf.mxu2  ;;  %v1010_v41 = vadd.f32 %v803_v32, %v626_v10  ;;  %v1884_v57 = vld [vmem:[%s1780_s28 + $0x20] sm:$0xff] }
  0xd1   : > { %1259 = vst [vmem:[#allocation1 + $0x3] ss:$4 sm:$0xff] %v988_v39  ;;  %v571_v39 = vrot.slane %v1852_v56, 6  ;;  %v629_v44 = vperm.slane %v569_v33, 0  ;;  %v575_v1 = vrot.slane %v1884_v57, 3  ;;  %v633_v2 = vperm.slane %v1884_v57, 0 }
  0xd2   : > { %1253 = vst [vmem:[#allocation1 + $0x23] ss:$4 sm:$0xff] %v984_v37  ;;  %v570_v37 = vrot.slane %v1852_v56, 5  ;;  %v800_v48 = vrot.slane %v473_v36, 2  ;;  %v801_v50 = vrot.slane %v473_v36, 4  ;;  %v802_v53 = vrot.slane %v473_v36, 6 }
  0xd3   : > { %1415 = vst.msk [vmem:[%s1796_s7 + $0x30] sm:$0xff] %vm1408_vm2, %v1254_v35  ;;  %v804_v35 = vrot.slane %v476_v26, 4  ;;  %v631_v49 = vperm.slane %v571_v39, 0  ;;  %v636_v8 = vperm.slane %v575_v1, 0  ;;  %v1017_v10 = vadd.f32 %v633_v2, %v482_v61 }
  0xd4   : > { %v630_v47 = vperm.slane %v570_v37, 0  ;;  %v1008_v59 = vadd.f32 %v802_v53, %v632_v52 }
  0xd5   : > { %v1011_v46 = vadd.f32 %v804_v35, %v627_v13  ;;  %v1007_v58 = vadd.f32 %v801_v50, %v631_v49 }
  0xd6   : > { %v1006_v56 = vadd.f32 %v800_v48, %v630_v47 }
  0xd8   : > { %v1264_v54 = vld.sshfl [vmem:[#allocation1] sm:$0xff pattern:$0x73625140] }
  0xd9   : > { %1266 = vst [vmem:[#allocation1] ss:$4 sm:$0xff] %v993_v51  ;;  %v1255_v63 = vld.sshfl [vmem:[#allocation1 + $0x20] sm:$0xff pattern:$0x73625140]  ;;  %v805_v51 = vrot.slane %v476_v26, 6  ;;  %v485_v26 = vadd.f32 %v1787_v34, %v1871_v38 }
  0xda   : > { %1267 = vst [vmem:[#allocation1 + $0x1] ss:$4 sm:$0xff] %v994_v55  ;;  %v1005_v55 = vadd.f32 %v629_v44, %v473_v36 }
  0xdb   : > { %1268 = vst [vmem:[#allocation1 + $0x2] ss:$4 sm:$0xff] %v995_v60  ;;  %v1012_v42 = vadd.f32 %v805_v51, %v628_v15  ;;  %v487_v60 = vpop.f32.mrf.mxu2  ;;  %v812_v40 = vrot.slane %v485_v26, 2 }
  0xdc   : > { %1269 = vst [vmem:[#allocation1 + $0x3] ss:$4 sm:$0xff] %v996_v62  ;;  %v573_v62 = vrot.slane %v1884_v57, 1 }
  0xdd   : > { %1260 = vst [vmem:[#allocation1 + $0x20] ss:$4 sm:$0xff] %v989_v0  ;;  %v574_v0 = vrot.slane %v1884_v57, 2 }
  0xde   : > { %1261 = vst [vmem:[#allocation1 + $0x21] ss:$4 sm:$0xff] %v990_v3  ;;  %v634_v4 = vperm.slane %v573_v62, 0 }
  0xdf   : > { %1262 = vst [vmem:[#allocation1 + $0x22] ss:$4 sm:$0xff] %v991_v5  ;;  %v809_v5 = vrot.slane %v482_v61, 2  ;;  %v635_v6 = vperm.slane %v574_v0, 0 }
  0xe0   : > { %1263 = vst [vmem:[#allocation1 + $0x23] ss:$4 sm:$0xff] %v992_v7  ;;  %v810_v7 = vrot.slane %v482_v61, 4 }
  0xe1   : > { %1416 = vst.msk [vmem:[%s1796_s7 + $0x38] sm:$0xff] %vm1408_vm2, %v1255_v63  ;;  %v478_v63 = vpop.f32.mrf.mxu1  ;;  %v1018_v14 = vadd.f32 %v809_v5, %v634_v4 }
  0xe2   : > { %1417 = vst.msk [vmem:[%s1796_s7 + $0x40] sm:$0xff] %vm1408_vm2, %v1264_v54  ;;  %v479_v3 = vadd.f32 %v1787_v34, %v478_v63 }
  0xe3   : > { %v1274_v21 = vld.sshfl [vmem:[#allocation1] sm:$0xff pattern:$0x73625140]  ;;  %v490_v17 = vpop.f32.mrf.mxu2 }
  0xe4   : > { %1276 = vst [vmem:[#allocation1] ss:$4 sm:$0xff] %v1001_v19  ;;  %v806_v13 = vrot.slane %v479_v3, 2  ;;  %v807_v16 = vrot.slane %v479_v3, 4  ;;  %v1019_v19 = vadd.f32 %v810_v7, %v635_v6  ;;  %v808_v20 = vrot.slane %v479_v3, 6 }
  0xe5   : > { %1277 = vst [vmem:[#allocation1 + $0x1] ss:$4 sm:$0xff] %v1002_v23  ;;  %v488_v23 = vadd.f32 %v1787_v34, %v487_v60  ;;  %v1013_v18 = vadd.f32 %v629_v44, %v479_v3 }
  0xe6   : > { %1278 = vst [vmem:[#allocation1 + $0x2] ss:$4 sm:$0xff] %v1003_v11  ;;  %v1014_v22 = vadd.f32 %v806_v13, %v630_v47  ;;  %v1015_v11 = vadd.f32 %v807_v16, %v631_v49  ;;  %v1016_v24 = vadd.f32 %v808_v20, %v632_v52  ;;  %v814_v47 = vrot.slane %v485_v26, 6 }
  0xe7   : > { %v1265_v28 = vld.sshfl [vmem:[#allocation1 + $0x20] sm:$0xff pattern:$0x73625140]  ;;  %1279 = vst [vmem:[#allocation1 + $0x3] ss:$4 sm:$0xff] %v1004_v25  ;;  %v576_v25 = vrot.slane %v1884_v57, 4  ;;  %v1025_v37 = vadd.f32 %v633_v2, %v488_v23 }
  0xe8   : > { %1270 = vst [vmem:[#allocation1 + $0x20] ss:$4 sm:$0xff] %v997_v27  ;;  %v577_v27 = vrot.slane %v1884_v57, 5  ;;  %v817_v32 = vrot.slane %v488_v23, 6 }
  0xe9   : > { %1271 = vst [vmem:[#allocation1 + $0x21] ss:$4 sm:$0xff] %v998_v29  ;;  %v578_v29 = vrot.slane %v1884_v57, 6  ;;  %v637_v35 = vperm.slane %v576_v25, 0 }
  0xea   : > { %1272 = vst [vmem:[#allocation1 + $0x22] ss:$4 sm:$0xff] %v999_v30  ;;  %v816_v30 = vrot.slane %v488_v23, 4  ;;  %v638_v39 = vperm.slane %v577_v27, 0  ;;  %v1028_v48 = vadd.f32 %v817_v32, %v636_v8 }
  0xeb   : > { %1273 = vst [vmem:[#allocation1 + $0x23] ss:$4 sm:$0xff] %v1000_v31  ;;  %v579_v31 = vrot.slane %v1884_v57, 7  ;;  %v493_v33 = vpop.f32.mrf.mxu2  ;;  %v1021_v49 = vadd.f32 %v637_v35, %v485_v26 }
  0xec   : > { %1418 = vst.msk [vmem:[%s1796_s7 + $0x48] sm:$0xff] %vm1408_vm2, %v1265_v28  ;;  %v815_v28 = vrot.slane %v488_v23, 2  ;;  %v1027_v44 = vadd.f32 %v816_v30, %v635_v6  ;;  %v1022_v50 = vadd.f32 %v812_v40, %v638_v39  ;;  %v494_v52 = vadd.f32 %v1787_v34, %v493_v33 }
  0xed   : > { %1419 = vst.msk [vmem:[%s1796_s7 + $0x50] sm:$0xff] %vm1408_vm2, %v1274_v21  ;;  %v1020_v21 = vadd.f32 %v811_v9, %v636_v8  ;;  %v505_v8 = vpop.f32.mrf.mxu3 }
  0xee   : > { %v1284_v43 = vld.sshfl [vmem:[#allocation1] sm:$0xff pattern:$0x73625140]  ;;  %v1026_v38 = vadd.f32 %v815_v28, %v634_v4  ;;  %v822_v62 = vrot.slane %v494_v52, 4 }
  0xef   : > { %1421 = vst.msk [vmem:[%s1796_s7 + $0x60] sm:$0xff] %vm1408_vm2, %v1284_v43  ;;  %v813_v43 = vrot.slane %v485_v26, 4 }
  0xf0   : > { %1286 = vst [vmem:[#allocation1] ss:$4 sm:$0xff] %v1009_v45  ;;  %v1907_v45 = vld [vmem:[%s1780_s28 + $0x28] sm:$0xff] }
  0xf1   : > { %1287 = vst [vmem:[#allocation1 + $0x1] ss:$4 sm:$0xff] %v1010_v41  ;;  %v639_v41 = vperm.slane %v578_v29, 0  ;;  %v580_v53 = vrot.slane %v1907_v45, 1  ;;  %v641_v57 = vperm.slane %v1907_v45, 0  ;;  %v582_v63 = vrot.slane %v1907_v45, 3 }
  0xf2   : > { %v1275_v54 = vld.sshfl [vmem:[#allocation1 + $0x20] sm:$0xff pattern:$0x73625140]  ;;  %1288 = vst [vmem:[#allocation1 + $0x2] ss:$4 sm:$0xff] %v1011_v46  ;;  %v640_v46 = vperm.slane %v579_v31, 0 }
  0xf3   : > { %1420 = vst.msk [vmem:[%s1796_s7 + $0x58] sm:$0xff] %vm1408_vm2, %v1275_v54  ;;  %v1023_v54 = vadd.f32 %v813_v43, %v639_v41  ;;  %v496_v60 = vpop.f32.mrf.mxu2  ;;  %v1033_v1 = vadd.f32 %v641_v57, %v494_v52  ;;  %v644_v7 = vperm.slane %v582_v63, 0  ;;  %v586_v23 = vrot.slane %v1907_v45, 7 }
  0xf4   : > { %1280 = vst [vmem:[#allocation1 + $0x20] ss:$4 sm:$0xff] %v1005_v55  ;;  %v581_v55 = vrot.slane %v1907_v45, 2  ;;  %v497_v20 = vadd.f32 %v1787_v34, %v496_v60 }
  0xf5   : > { %1281 = vst [vmem:[#allocation1 + $0x21] ss:$4 sm:$0xff] %v1006_v56  ;;  %v1024_v56 = vadd.f32 %v814_v47, %v640_v46  ;;  %v648_v30 = vperm.slane %v586_v23, 0 }
  0xf6   : > { %1282 = vst [vmem:[#allocation1 + $0x22] ss:$4 sm:$0xff] %v1007_v58  ;;  %v491_v58 = vadd.f32 %v1787_v34, %v490_v17  ;;  %v643_v61 = vperm.slane %v581_v55, 0  ;;  %v824_v26 = vrot.slane %v497_v20, 2  ;;  %v825_v28 = vrot.slane %v497_v20, 4 }
  0xf7   : > { %1283 = vst [vmem:[#allocation1 + $0x23] ss:$4 sm:$0xff] %v1008_v59  ;;  %v821_v59 = vrot.slane %v494_v52, 2  ;;  %v826_v31 = vrot.slane %v497_v20, 6 }
  0xf8   : > { %1289 = vst [vmem:[#allocation1 + $0x3] ss:$4 sm:$0xff] %v1012_v42  ;;  %v642_v42 = vperm.slane %v580_v53, 0  ;;  %v818_v2 = vrot.slane %v491_v58, 2  ;;  %v819_v4 = vrot.slane %v491_v58, 4  ;;  %v1035_v5 = vadd.f32 %v822_v62, %v643_v61 }
  0xf9   : > { %v820_v6 = vrot.slane %v491_v58, 6 }
  0xfa   : > { %v1034_v3 = vadd.f32 %v821_v59, %v642_v42  ;;  %v1030_v13 = vadd.f32 %v818_v2, %v638_v39 }
  0xfb   : > { %v499_v16 = vpop.f32.mrf.mxu2 }
  0xfe   : > { %v1285_v12 = vld.sshfl [vmem:[#allocation1 + $0x20] sm:$0xff pattern:$0x73625140] }
  0xff   : > { %1422 = vst.msk [vmem:[%s1796_s7 + $0x68] sm:$0xff] %vm1408_vm2, %v1285_v12  ;;  %v1294_v15 = vld.sshfl [vmem:[#allocation1] sm:$0xff pattern:$0x73625140]  ;;  %v823_v12 = vrot.slane %v494_v52, 6  ;;  %v506_v52 = vadd.f32 %v1787_v34, %v505_v8 }
 0x100   : > { %1296 = vst [vmem:[#allocation1] ss:$4 sm:$0xff] %v1017_v10  ;;  %v1029_v10 = vadd.f32 %v637_v35, %v491_v58 }
 0x101   : > { %1297 = vst [vmem:[#allocation1 + $0x1] ss:$4 sm:$0xff] %v1018_v14  ;;  %v1031_v14 = vadd.f32 %v819_v4, %v639_v41  ;;  %v1036_v17 = vadd.f32 %v823_v12, %v644_v7  ;;  %v1040_v41 = vadd.f32 %v826_v31, %v648_v30  ;;  %v834_v63 = vrot.slane %v506_v52, 4 }
 0x102   : > { %1298 = vst [vmem:[#allocation1 + $0x2] ss:$4 sm:$0xff] %v1019_v19  ;;  %v583_v19 = vrot.slane %v1907_v45, 4 }
 0x103   : > { %1299 = vst [vmem:[#allocation1 + $0x3] ss:$4 sm:$0xff] %v1020_v21  ;;  %v584_v21 = vrot.slane %v1907_v45, 5 }
 0x104   : > { %1423 = vst.msk [vmem:[%s1796_s7 + $0x70] sm:$0xff] %vm1408_vm2, %v1294_v15  ;;  %v1032_v15 = vadd.f32 %v820_v6, %v640_v46 }
 0x105   : > { %1290 = vst [vmem:[#allocation1 + $0x20] ss:$4 sm:$0xff] %v1013_v18  ;;  %v500_v18 = vadd.f32 %v1787_v34, %v499_v16  ;;  %v646_v25 = vperm.slane %v584_v21, 0 }
 0x106   : > { %1291 = vst [vmem:[#allocation1 + $0x21] ss:$4 sm:$0xff] %v1014_v22  ;;  %v585_v22 = vrot.slane %v1907_v45, 6 }
 0x107   : > { %1292 = vst [vmem:[#allocation1 + $0x22] ss:$4 sm:$0xff] %v1015_v11  ;;  %v645_v11 = vperm.slane %v583_v19, 0  ;;  %v827_v32 = vrot.slane %v500_v18, 2  ;;  %v1038_v39 = vadd.f32 %v824_v26, %v646_v25  ;;  %v829_v40 = vrot.slane %v500_v18, 6 }
 0x108   : > { %1293 = vst [vmem:[#allocation1 + $0x23] ss:$4 sm:$0xff] %v1016_v24  ;;  %v1929_v24 = vpop.f32.mrf.mxu3  ;;  %v647_v27 = vperm.slane %v585_v22, 0  ;;  %v1041_v46 = vadd.f32 %v641_v57, %v500_v18 }
 0x109   : > { %v1037_v35 = vadd.f32 %v645_v11, %v497_v20  ;;  %v1042_v43 = vadd.f32 %v827_v32, %v642_v42  ;;  %v833_v42 = vrot.slane %v506_v52, 2 }
 0x10a   : > { %v1304_v36 = vld.sshfl [vmem:[#allocation1] sm:$0xff pattern:$0x73625140] }
 0x10b   : > { %1425 = vst.msk [vmem:[%s1796_s7 + $0x80] sm:$0xff] %vm1408_vm2, %v1304_v36  ;;  %v828_v36 = vrot.slane %v500_v18, 4 }
 0x10c   : > { %1306 = vst [vmem:[#allocation1] ss:$4 sm:$0xff] %v1025_v37  ;;  %v502_v37 = vpop.f32.mrf.mxu2 }
 0x10d   : > { %1307 = vst [vmem:[#allocation1 + $0x1] ss:$4 sm:$0xff] %v1026_v38  ;;  %v1039_v38 = vadd.f32 %v825_v28, %v647_v27  ;;  %v1043_v47 = vadd.f32 %v828_v36, %v643_v61 }
 0x10e   : > { %1308 = vst [vmem:[#allocation1 + $0x2] ss:$4 sm:$0xff] %v1027_v44  ;;  %v503_v44 = vadd.f32 %v1787_v34, %v502_v37 }
 0x10f   : > { %1309 = vst [vmem:[#allocation1 + $0x3] ss:$4 sm:$0xff] %v1028_v48  ;;  %v1295_v51 = vld.sshfl [vmem:[#allocation1 + $0x20] sm:$0xff pattern:$0x73625140]  ;;  %v535_v48 = vld [vmem:[%s1780_s28 + $0x30] sm:$0xff] }
 0x110   : > { %1300 = vst [vmem:[#allocation1 + $0x20] ss:$4 sm:$0xff] %v1021_v49  ;;  %v1044_v49 = vadd.f32 %v829_v40, %v644_v7  ;;  %v587_v53 = vrot.slane %v535_v48, 1  ;;  %v588_v55 = vrot.slane %v535_v48, 2  ;;  %v649_v58 = vperm.slane %v535_v48, 0 }
 0x111   : > { %1301 = vst [vmem:[#allocation1 + $0x21] ss:$4 sm:$0xff] %v1022_v50  ;;  %v511_v50 = vpop.f32.mrf.mxu3  ;;  %v1045_v60 = vadd.f32 %v645_v11, %v503_v44  ;;  %v832_v2 = vrot.slane %v503_v44, 6  ;;  %v590_v12 = vrot.slane %v535_v48, 4  ;;  %v592_v16 = vrot.slane %v535_v48, 6 }
 0x112   : > { %1302 = vst [vmem:[#allocation1 + $0x22] ss:$4 sm:$0xff] %v1023_v54  ;;  %v831_v54 = vrot.slane %v503_v44, 4  ;;  %v650_v57 = vperm.slane %v587_v53, 0  ;;  %v651_v62 = vperm.slane %v588_v55, 0 }
 0x113   : > { %1303 = vst [vmem:[#allocation1 + $0x23] ss:$4 sm:$0xff] %v1024_v56  ;;  %v589_v56 = vrot.slane %v535_v48, 3  ;;  %v653_v22 = vperm.slane %v590_v12, 0 }
 0x114   : > { %1424 = vst.msk [vmem:[%s1796_s7 + $0x78] sm:$0xff] %vm1408_vm2, %v1295_v51  ;;  %v830_v51 = vrot.slane %v503_v44, 2  ;;  %v1047_v61 = vadd.f32 %v831_v54, %v647_v27  ;;  %v1050_v4 = vadd.f32 %v833_v42, %v650_v57  ;;  %v1051_v7 = vadd.f32 %v834_v63, %v651_v62  ;;  %v1959_v44 = vld [vmem:[%s2002_s3] ss:$0 sm:$0xff] }
 0x115   : > { %v655_v27 = vperm.slane %v592_v16, 0 }
 0x116   : > { %v1314_v0 = vld.sshfl [vmem:[#allocation1] sm:$0xff pattern:$0x73625140]  ;;  %v1046_v45 = vadd.f32 %v830_v51, %v646_v25 }
 0x117   : > { %1427 = vst.msk [vmem:[%s1796_s7 + $0x90] sm:$0xff] %vm1408_vm2, %v1314_v0  ;;  %v652_v0 = vperm.slane %v589_v56, 0 }
 0x118   : > { %1316 = vst [vmem:[#allocation1] ss:$4 sm:$0xff] %v1033_v1  ;;  %v835_v1 = vrot.slane %v506_v52, 6 }
 0x119   : > { %1317 = vst [vmem:[#allocation1 + $0x1] ss:$4 sm:$0xff] %v1034_v3  ;;  %v1049_v3 = vadd.f32 %v649_v58, %v506_v52  ;;  %v514_v6 = vpop.f32.mrf.mxu3 }
 0x11a   : > { %v1305_v9 = vld.sshfl [vmem:[#allocation1 + $0x20] sm:$0xff pattern:$0x73625140]  ;;  %1318 = vst [vmem:[#allocation1 + $0x2] ss:$4 sm:$0xff] %v1035_v5  ;;  %v1052_v8 = vadd.f32 %v835_v1, %v652_v0 }
 0x11b   : > { %1426 = vst.msk [vmem:[%s1796_s7 + $0x88] sm:$0xff] %vm1408_vm2, %v1305_v9  ;;  %v1048_v9 = vadd.f32 %v832_v2, %v648_v30  ;;  %v1950_v30 = vld [vmem:[%s1780_s28 + $0x38] sm:$0xff] }
 0x11c   : > { %1310 = vst [vmem:[#allocation1 + $0x20] ss:$4 sm:$0xff] %v1029_v10  ;;  %v512_v10 = vadd.f32 %v1787_v34, %v511_v50  ;;  %v596_v51 = vrot.slane %v1950_v30, 3  ;;  %v597_v2 = vrot.slane %v1950_v30, 4 }
 0x11d   : > { %1311 = vst [vmem:[#allocation1 + $0x21] ss:$4 sm:$0xff] %v1030_v13  ;;  %v509_v13 = vadd.f32 %v1787_v34, %v1929_v24 }
 0x11e   : > { %1312 = vst [vmem:[#allocation1 + $0x22] ss:$4 sm:$0xff] %v1031_v14  ;;  %v591_v14 = vrot.slane %v535_v48, 5  ;;  %v840_v19 = vrot.slane %v512_v10, 4  ;;  %v841_v20 = vrot.slane %v512_v10, 6  ;;  %v1057_v18 = vadd.f32 %v649_v58, %v512_v10 }
 0x11f   : > { %1313 = vst [vmem:[#allocation1 + $0x23] ss:$4 sm:$0xff] %v1032_v15  ;;  %v839_v15 = vrot.slane %v512_v10, 2  ;;  %v836_v25 = vrot.slane %v509_v13, 2  ;;  %v838_v31 = vrot.slane %v509_v13, 6 }
 0x120   : > { %1319 = vst [vmem:[#allocation1 + $0x3] ss:$4 sm:$0xff] %v1036_v17  ;;  %v593_v17 = vrot.slane %v535_v48, 7  ;;  %v654_v11 = vperm.slane %v591_v14, 0  ;;  %v1059_v24 = vadd.f32 %v840_v19, %v651_v62  ;;  %v1060_v32 = vadd.f32 %v841_v20, %v652_v0 }
 0x121   : > { %v517_v21 = vpop.f32.mrf.mxu3  ;;  %v1058_v26 = vadd.f32 %v839_v15, %v650_v57  ;;  %v660_v57 = vperm.slane %v596_v51, 0 }
 0x122   : > { %v656_v28 = vperm.slane %v593_v17, 0  ;;  %v1054_v36 = vadd.f32 %v836_v25, %v654_v11  ;;  %v518_v37 = vadd.f32 %v1787_v34, %v517_v21  ;;  %v515_v34 = vadd.f32 %v1959_v44, %v514_v6 }
 0x123   : > { %v600_v6 = vrot.slane %v1950_v30, 7 }
 0x124   : > { %v846_v50 = vrot.slane %v518_v37, 4  ;;  %v842_v54 = vrot.slane %v515_v34, 2  ;;  %v843_v56 = vrot.slane %v515_v34, 4 }
 0x125   : > { %v664_v15 = vperm.slane %v600_v6, 0 }
 0x126   : > { %v1315_v29 = vld.sshfl [vmem:[#allocation1 + $0x20] sm:$0xff pattern:$0x73625140]  ;;  %v1063_v62 = vadd.f32 %v843_v56, %v655_v27 }
 0x127   : > { %1428 = vst.msk [vmem:[%s1796_s7 + $0x98] sm:$0xff] %vm1408_vm2, %v1315_v29  ;;  %v1324_v33 = vld.sshfl [vmem:[#allocation1] sm:$0xff pattern:$0x73625140]  ;;  %v837_v29 = vrot.slane %v509_v13, 4 }
 0x128   : > { %1429 = vst.msk [vmem:[%s1796_s7 + $0xa0] sm:$0xff] %vm1408_vm2, %v1324_v33 }
 0x129   : > { %1320 = vst [vmem:[#allocation1 + $0x20] ss:$4 sm:$0xff] %v1037_v35  ;;  %v1053_v35 = vadd.f32 %v653_v22, %v509_v13  ;;  %v1055_v40 = vadd.f32 %v837_v29, %v655_v27  ;;  %v520_v48 = vpop.f32.mrf.mxu3 }
 0x12a   : > { %1321 = vst [vmem:[#allocation1 + $0x21] ss:$4 sm:$0xff] %v1038_v39  ;;  %v594_v39 = vrot.slane %v1950_v30, 1 }
 0x12b   : > { %1322 = vst [vmem:[#allocation1 + $0x22] ss:$4 sm:$0xff] %v1039_v38  ;;  %v595_v38 = vrot.slane %v1950_v30, 2 }
 0x12c   : > { %1323 = vst [vmem:[#allocation1 + $0x23] ss:$4 sm:$0xff] %v1040_v41  ;;  %v1056_v41 = vadd.f32 %v838_v31, %v656_v28 }
 0x12d   : > { %1326 = vst [vmem:[#allocation1] ss:$4 sm:$0xff] %v1041_v46  ;;  %v658_v46 = vperm.slane %v594_v39, 0 }
 0x12e   : > { %1327 = vst [vmem:[#allocation1 + $0x1] ss:$4 sm:$0xff] %v1042_v43  ;;  %v657_v43 = vperm.slane %v1950_v30, 0 }
 0x12f   : > { %1328 = vst [vmem:[#allocation1 + $0x2] ss:$4 sm:$0xff] %v1043_v47  ;;  %v845_v47 = vrot.slane %v518_v37, 2 }
 0x130   : > { %1329 = vst [vmem:[#allocation1 + $0x3] ss:$4 sm:$0xff] %v1044_v49  ;;  %v659_v49 = vperm.slane %v595_v38, 0  ;;  %v1065_v53 = vadd.f32 %v657_v43, %v518_v37 }
 0x131   : > { %v1066_v55 = vadd.f32 %v845_v47, %v658_v46  ;;  %v523_v0 = vpop.f32.mrf.mxu3 }
 0x132   : > { %v1067_v58 = vadd.f32 %v846_v50, %v659_v49 }
 0x133   : > { %v1325_v59 = vld.sshfl [vmem:[#allocation1 + $0x20] sm:$0xff pattern:$0x73625140] }
 0x134   : > { %1430 = vst.msk [vmem:[%s1796_s7 + $0xa8] sm:$0xff] %vm1408_vm2, %v1325_v59  ;;  %v1061_v59 = vadd.f32 %v653_v22, %v515_v34 }
 0x135   : > { %1330 = vst [vmem:[#allocation1 + $0x20] ss:$4 sm:$0xff] %v1045_v60  ;;  %v847_v60 = vrot.slane %v518_v37, 6 }
 0x136   : > { %1331 = vst [vmem:[#allocation1 + $0x21] ss:$4 sm:$0xff] %v1046_v45  ;;  %v844_v45 = vrot.slane %v515_v34, 6 }
 0x137   : > { %v1334_v5 = vld.sshfl [vmem:[#allocation1] sm:$0xff pattern:$0x73625140]  ;;  %1332 = vst [vmem:[#allocation1 + $0x22] ss:$4 sm:$0xff] %v1047_v61  ;;  %v1062_v61 = vadd.f32 %v842_v54, %v654_v11  ;;  %v1068_v1 = vadd.f32 %v847_v60, %v660_v57 }
 0x138   : > { %1336 = vst [vmem:[#allocation1] ss:$4 sm:$0xff] %v1049_v3  ;;  %v1064_v63 = vadd.f32 %v844_v45, %v656_v28  ;;  %v521_v3 = vadd.f32 %v1959_v44, %v520_v48 }
 0x139   : > { %1337 = vst [vmem:[#allocation1 + $0x1] ss:$4 sm:$0xff] %v1050_v4  ;;  %v598_v4 = vrot.slane %v1950_v30, 5  ;;  %v526_v22 = vpop.f32.mrf.mxu3 }
 0x13a   : > { %1338 = vst [vmem:[#allocation1 + $0x2] ss:$4 sm:$0xff] %v1051_v7  ;;  %v524_v7 = vadd.f32 %v1959_v44, %v523_v0  ;;  %v848_v10 = vrot.slane %v521_v3, 2  ;;  %v849_v13 = vrot.slane %v521_v3, 4  ;;  %v850_v16 = vrot.slane %v521_v3, 6 }
 0x13b   : > { %1339 = vst [vmem:[#allocation1 + $0x3] ss:$4 sm:$0xff] %v1052_v8  ;;  %v661_v8 = vperm.slane %v597_v2, 0  ;;  %v527_v27 = vadd.f32 %v1959_v44, %v526_v22 }
 0x13c   : > { %1431 = vst.msk [vmem:[%s1796_s7 + $0xb0] sm:$0xff] %vm1408_vm2, %v1334_v5  ;;  %v599_v5 = vrot.slane %v1950_v30, 6  ;;  %v851_v17 = vrot.slane %v524_v7, 2  ;;  %v852_v21 = vrot.slane %v524_v7, 4  ;;  %v1072_v25 = vadd.f32 %v850_v16, %v664_v15 }
 0x13d   : > { %1333 = vst [vmem:[#allocation1 + $0x23] ss:$4 sm:$0xff] %v1048_v9  ;;  %v662_v9 = vperm.slane %v598_v4, 0  ;;  %v1069_v20 = vadd.f32 %v661_v8, %v521_v3  ;;  %v1073_v28 = vadd.f32 %v657_v43, %v524_v7  ;;  %v854_v31 = vrot.slane %v527_v27, 2 }
 0x13e   : > { %v663_v12 = vperm.slane %v599_v5, 0  ;;  %v1075_v29 = vadd.f32 %v852_v21, %v659_v49  ;;  %v1077_v37 = vadd.f32 %v661_v8, %v527_v27 }
 0x140   : > { %v1071_v11 = vadd.f32 %v849_v13, %v663_v12 }
 0x142   : > { %v1344_v23 = vld.sshfl [vmem:[#allocation1] sm:$0xff pattern:$0x73625140] }
 0x143   : > { %1433 = vst.msk [vmem:[%s1796_s7 + $0xc0] sm:$0xff] %vm1408_vm2, %v1344_v23  ;;  %v1070_v23 = vadd.f32 %v848_v10, %v662_v9 }
 0x144   : > { %1346 = vst [vmem:[#allocation1] ss:$4 sm:$0xff] %v1057_v18  ;;  %v1335_v33 = vld.sshfl [vmem:[#allocation1 + $0x20] sm:$0xff pattern:$0x73625140]  ;;  %v853_v18 = vrot.slane %v524_v7, 6 }
 0x145   : > { %1347 = vst [vmem:[#allocation1 + $0x1] ss:$4 sm:$0xff] %v1058_v26  ;;  %v1074_v26 = vadd.f32 %v851_v17, %v658_v46 }
 0x146   : > { %1348 = vst [vmem:[#allocation1 + $0x2] ss:$4 sm:$0xff] %v1059_v24  ;;  %v1076_v24 = vadd.f32 %v853_v18, %v660_v57 }
 0x147   : > { %1349 = vst [vmem:[#allocation1 + $0x3] ss:$4 sm:$0xff] %v1060_v32  ;;  %v855_v32 = vrot.slane %v527_v27, 4 }
 0x148   : > { %1340 = vst [vmem:[#allocation1 + $0x20] ss:$4 sm:$0xff] %v1053_v35  ;;  %v1078_v35 = vadd.f32 %v854_v31, %v662_v9 }
 0x149   : > { %1341 = vst [vmem:[#allocation1 + $0x21] ss:$4 sm:$0xff] %v1054_v36  ;;  %v1079_v39 = vadd.f32 %v855_v32, %v663_v12 }
 0x14a   : > { %1342 = vst [vmem:[#allocation1 + $0x22] ss:$4 sm:$0xff] %v1055_v40 }
 0x14b   : > { %1343 = vst [vmem:[#allocation1 + $0x23] ss:$4 sm:$0xff] %v1056_v41 }
 0x14c   : > { %1432 = vst.msk [vmem:[%s1796_s7 + $0xb8] sm:$0xff] %vm1408_vm2, %v1335_v33  ;;  %v856_v33 = vrot.slane %v527_v27, 6 }
 0x14e   : > { %v1354_v52 = vld.sshfl [vmem:[#allocation1] sm:$0xff pattern:$0x73625140]  ;;  %v1080_v30 = vadd.f32 %v856_v33, %v664_v15 }
 0x14f   : > { %1435 = vst.msk [vmem:[%s1796_s7 + $0xd0] sm:$0xff] %vm1408_vm2, %v1354_v52 }
 0x150   : > { %1356 = vst [vmem:[#allocation1] ss:$4 sm:$0xff] %v1065_v53 }
 0x151   : > { %1357 = vst [vmem:[#allocation1 + $0x1] ss:$4 sm:$0xff] %v1066_v55 }
 0x152   : > { %v1345_v42 = vld.sshfl [vmem:[#allocation1 + $0x20] sm:$0xff pattern:$0x73625140]  ;;  %1358 = vst [vmem:[#allocation1 + $0x2] ss:$4 sm:$0xff] %v1067_v58 }
 0x153   : > { %1434 = vst.msk [vmem:[%s1796_s7 + $0xc8] sm:$0xff] %vm1408_vm2, %v1345_v42 }
 0x154   : > { %1350 = vst [vmem:[#allocation1 + $0x20] ss:$4 sm:$0xff] %v1061_v59 }
 0x155   : > { %1351 = vst [vmem:[#allocation1 + $0x21] ss:$4 sm:$0xff] %v1062_v61 }
 0x156   : > { %1352 = vst [vmem:[#allocation1 + $0x22] ss:$4 sm:$0xff] %v1063_v62 }
 0x157   : > { %1353 = vst [vmem:[#allocation1 + $0x23] ss:$4 sm:$0xff] %v1064_v63 }
 0x158   : > { %1359 = vst [vmem:[#allocation1 + $0x3] ss:$4 sm:$0xff] %v1068_v1 }
 0x15e   : > { %v1355_v14 = vld.sshfl [vmem:[#allocation1 + $0x20] sm:$0xff pattern:$0x73625140] }
 0x15f   : > { %1436 = vst.msk [vmem:[%s1796_s7 + $0xd8] sm:$0xff] %vm1408_vm2, %v1355_v14  ;;  %v1364_v19 = vld.sshfl [vmem:[#allocation1] sm:$0xff pattern:$0x73625140] }
 0x160   : > { %1437 = vst.msk [vmem:[%s1796_s7 + $0xe0] sm:$0xff] %vm1408_vm2, %v1364_v19 }
 0x161   : > { %1360 = vst [vmem:[#allocation1 + $0x20] ss:$4 sm:$0xff] %v1069_v20 }
 0x162   : > { %1361 = vst [vmem:[#allocation1 + $0x21] ss:$4 sm:$0xff] %v1070_v23 }
 0x163   : > { %1362 = vst [vmem:[#allocation1 + $0x22] ss:$4 sm:$0xff] %v1071_v11 }
 0x164   : > { %1363 = vst [vmem:[#allocation1 + $0x23] ss:$4 sm:$0xff] %v1072_v25 }
 0x165   : > { %1366 = vst [vmem:[#allocation1] ss:$4 sm:$0xff] %v1073_v28 }
 0x166   : > { %1367 = vst [vmem:[#allocation1 + $0x1] ss:$4 sm:$0xff] %v1074_v26 }
 0x167   : > { %1368 = vst [vmem:[#allocation1 + $0x2] ss:$4 sm:$0xff] %v1075_v29 }
 0x168   : > { %1369 = vst [vmem:[#allocation1 + $0x3] ss:$4 sm:$0xff] %v1076_v24 }
 0x16b   : > { %v1365_v36 = vld.sshfl [vmem:[#allocation1 + $0x20] sm:$0xff pattern:$0x73625140] }
 0x16c   : > { %1438 = vst.msk [vmem:[%s1796_s7 + $0xe8] sm:$0xff] %vm1408_vm2, %v1365_v36 }
 0x16d   : > { %1370 = vst [vmem:[#allocation1 + $0x20] ss:$4 sm:$0xff] %v1077_v37 }
 0x16e   : > { %1371 = vst [vmem:[#allocation1 + $0x21] ss:$4 sm:$0xff] %v1078_v35 }
 0x16f   : > { %v1374_v40 = vld.sshfl [vmem:[#allocation1] sm:$0xff pattern:$0x73625140]  ;;  %1372 = vst [vmem:[#allocation1 + $0x22] ss:$4 sm:$0xff] %v1079_v39 }
 0x170   : > { %1439 = vst.msk [vmem:[%s1796_s7 + $0xf0] sm:$0xff] %vm1408_vm2, %v1374_v40 }
 0x171   : > { %1373 = vst [vmem:[#allocation1 + $0x23] ss:$4 sm:$0xff] %v1080_v30 }
 0x178   : > { %v1375_v38 = vld.sshfl [vmem:[#allocation1 + $0x20] sm:$0xff pattern:$0x73625140] }
 0x179   : > { %1440 = vst.msk [vmem:[%s1796_s7 + $0xf8] sm:$0xff] %vm1408_vm2, %v1375_v38 }
 0x17a PF: > { %s14_s17 = sadd.s32 1, %s1655_s17   ;;  %s2004_s15 = smov %s1651_s16 }
 0x17b   : > { %p11_p5 = scmp.ge.s32.totalorder %s14_s17, 4   ;;  %s2005_s16 = smov %s2007_s18 }
 0x17d   :  { %13 = sbr.rel (!%p11_p5) target bundleno = 2 (0x2), region = 76 }

</bundles_post_ra>
